<compile_context>
chip_gen: v7x
topology: tpu7x:2x2x1
jax: 0.10.0
libtpu: 0.0.40
codegen_flags: <defaults>
</compile_context>

<pallas_src>
import functools

import jax
import jax.numpy as jnp
from jax.experimental import pallas as pl
from jax.experimental.pallas import tpu as pltpu

NUM_CLASSES = 18          # num_features / num_classes in the PyTorch module
NUM_CLASSES_PAD = 128     # lane-dense padding for the logits store
EFF_FEAT = 1408           # efficientnet-b2 extract_features channel width
RES_FEAT = 2048           # resnet50 fc.in_features
EFF_STEM = 32             # proxy stem widths
RES_STEM = 64
EFF_KPAD = 32             # 3*3*3 = 27  -> 32
RES_KPAD = 256            # 7*7*3 = 147 -> 256

_VMEM = pl.BlockSpec(memory_space=pltpu.MemorySpace.VMEM)


def _round_up(x, m):
    return (x + m - 1) // m * m


def _apply_act(x, kind):
    if kind == "silu":            # EfficientNet swish
        return x * jax.nn.sigmoid(x)
    if kind == "relu":            # ResNet activation
        return jnp.maximum(x, 0.0)
    return x


# ---------------------------------------------------------------------------
# Pallas kernels
# ---------------------------------------------------------------------------
def _branch_kernel(patch_ref, ws_ref, bs_ref, wh_ref, bh_ref, pooled_ref, *,
                   act, s_valid, tm):
    """Per (batch, spatial-tile): stem matmul + act + 1x1 projection + act + pooled sum.

    patch_ref : (1, TM, Kp)  bf16   im2col patches for this tile
    ws_ref    : (Kp, Cs)     bf16   stem weight (K zero-padded)
    bs_ref    : (1, Cs)      f32
    wh_ref    : (Cs, Cf)     bf16   1x1 projection weight
    bh_ref    : (1, Cf)      f32
    pooled_ref: (1, 1, Cf)   f32    revisited accumulator across the spatial grid axis
    """
    s = pl.program_id(1)

    @pl.when(s == 0)
    def _():
        pooled_ref[...] = jnp.zeros_like(pooled_ref)

    x = patch_ref[0]                                                   # (TM, Kp) bf16
    h = jnp.dot(x, ws_ref[...], preferred_element_type=jnp.float32)    # MXU, f32 acc
    h = _apply_act(h + bs_ref[...], act)                               # f32 VPU math
    feat = jnp.dot(h.astype(wh_ref.dtype), wh_ref[...],
                   preferred_element_type=jnp.float32)                 # (TM, Cf) f32
    feat = _apply_act(feat + bh_ref[...], act)

    # Mask rows that belong to the zero-padded spatial remainder (bias/act make them != 0).
    rows = s * tm + jax.lax.broadcasted_iota(jnp.int32, (tm, 1), 0)
    feat = jnp.where(rows < s_valid, feat, 0.0)

    pooled_ref[...] = pooled_ref[...] + jnp.sum(feat, axis=0, keepdims=True)[None]

    @pl.when(s == pl.num_programs(1) - 1)
    def _():
        pooled_ref[...] = pooled_ref[...] * jnp.float32(1.0 / s_valid)


def _head_kernel(pe_ref, pr_ref, we_ref, be_ref, wr_ref, br_ref, o_ref):
    """Fused: Linear(1408->C) + Linear(2048->C) + torch.add (Dropout2d is eval identity).

    Weights are pre-transposed and column-padded to 128 lanes -> lane-dense output store.
    """
    out = jnp.dot(pe_ref[...], we_ref[...],
                  preferred_element_type=jnp.float32) + be_ref[...]
    out = out + jnp.dot(pr_ref[...], wr_ref[...],
                        preferred_element_type=jnp.float32) + br_ref[...]
    o_ref[...] = out.astype(o_ref.dtype)


# ---------------------------------------------------------------------------
# pallas_call wrappers
# ---------------------------------------------------------------------------
def branch_pooled_features(patches, s_valid, tm, w_stem, b_stem, w_head, b_head, act):
    """(B, S_pad, Kp) patches -> (B, Cf) mean-pooled fused branch features."""
    b, s_pad, kp = patches.shape
    cs = w_stem.shape[1]
    cf = w_head.shape[1]
    grid = (b, s_pad // tm)

    kern = functools.partial(_branch_kernel, act=act, s_valid=s_valid, tm=tm)
    flops = 2 * b * s_pad * (kp * cs + cs * cf)
    transcend = b * s_pad * (cs + cf) if act == "silu" else 0
    bytes_accessed = (patches.size * patches.dtype.itemsize
                      + w_stem.size * 2 + w_head.size * 2
                      + (cs + cf) * 4 + b * cf * 4)

    pooled = pl.pallas_call(
        kern,
        out_shape=jax.ShapeDtypeStruct((b, 1, cf), jnp.float32),
        grid_spec=pltpu.PrefetchScalarGridSpec(
            num_scalar_prefetch=0,
            grid=grid,
            in_specs=[
                pl.BlockSpec((1, tm, kp), lambda bi, si: (bi, si, 0)),   # patches tile
                pl.BlockSpec((kp, cs), lambda bi, si: (0, 0)),           # stem W (resident)
                pl.BlockSpec((1, cs), lambda bi, si: (0, 0)),            # stem b
                pl.BlockSpec((cs, cf), lambda bi, si: (0, 0)),           # 1x1 W (resident)
                pl.BlockSpec((1, cf), lambda bi, si: (0, 0)),            # 1x1 b
            ],
            out_specs=pl.BlockSpec((1, 1, cf), lambda bi, si: (bi, 0, 0)),
        ),
        compiler_params=pltpu.CompilerParams(
            dimension_semantics=("parallel", "arbitrary"),   # batch || , spatial reduction
            vmem_limit_bytes=32 * 1024 * 1024),
        cost_estimate=pl.CostEstimate(flops=flops, transcendentals=transcend,
                                      bytes_accessed=bytes_accessed),
    )(patches, w_stem, b_stem, w_head, b_head)
    return pooled.reshape(b, cf)


def fused_heads(pooled_e, pooled_r, we, be, wr, br):
    b = pooled_e.shape[0]
    out = pl.pallas_call(
        _head_kernel,
        out_shape=jax.ShapeDtypeStruct((b, NUM_CLASSES_PAD), jnp.float32),
        in_specs=[_VMEM] * 6,
        out_specs=_VMEM,
    )(pooled_e, pooled_r, we, be, wr, br)
    return out[:, :NUM_CLASSES]


# ---------------------------------------------------------------------------
# Glue: im2col with K padding + spatial tiling (plain JAX; hot path is in Pallas)
# ---------------------------------------------------------------------------
def im2col_padded(x_nhwc, kh, kw, stride, pad, k_pad):
    n, h, w, c = x_nhwc.shape
    xp = jnp.pad(x_nhwc, ((0, 0), (pad, pad), (pad, pad), (0, 0)))
    ho = (h + 2 * pad - kh) // stride + 1
    wo = (w + 2 * pad - kw) // stride + 1
    cols = []
    for i in range(kh):
        for j in range(kw):
            cols.append(xp[:, i:i + ho * stride:stride, j:j + wo * stride:stride, :])
    patches = jnp.concatenate(cols, axis=-1).reshape(n, ho * wo, kh * kw * c)
    s = ho * wo
    tm = min(512, _round_up(s, 8))            # M-tile: multiple of 8, capped for VMEM budget
    s_pad = _round_up(s, tm)
    patches = jnp.pad(patches, ((0, 0), (0, s_pad - s), (0, k_pad - kh * kw * c)))
    return patches.astype(jnp.bfloat16), s, tm


def _conv_w_to_mat(w_oihw, k_pad):
    """(O, I, kh, kw) torch conv weight -> (k_pad, O) matmul weight matching im2col."""
    o, i, kh, kw = w_oihw.shape
    m = jnp.transpose(w_oihw, (2, 3, 1, 0)).reshape(kh * kw * i, o)
    return jnp.pad(m, ((0, k_pad - kh * kw * i), (0, 0)))


# ---------------------------------------------------------------------------
# Params & model
# ---------------------------------------------------------------------------
def init_params(key):
    ks = jax.random.split(key, 8)

    def conv_w(k, o, i, kh, kw):
        fan_in = i * kh * kw
        return jax.random.normal(k, (o, i, kh, kw), jnp.float32) * (2.0 / fan_in) ** 0.5

    def lin_wb(kw_, kb_, o, i):
        bound = 1.0 / (i ** 0.5)
        w = jax.random.uniform(kw_, (o, i), jnp.float32, -bound, bound)
        b = jax.random.uniform(kb_, (o,), jnp.float32, -bound, bound)
        # pre-transposed (in, out) and lane-padded to 128 columns for the head kernel
        wp = jnp.pad(jnp.transpose(w), ((0, 0), (0, NUM_CLASSES_PAD - o)))
        bp = jnp.pad(b, (0, NUM_CLASSES_PAD - o)).reshape(1, NUM_CLASSES_PAD)
        return wp, bp

    eff_fc_w, eff_fc_b = lin_wb(ks[2], ks[3], NUM_CLASSES, EFF_FEAT)   # nn.Linear(1408, 18)
    res_fc_w, res_fc_b = lin_wb(ks[6], ks[7], NUM_CLASSES, RES_FEAT)   # replaced resnet50 fc

    return {
        # EfficientNet-b2 proxy branch (bf16 MXU weights, f32 biases)
        "eff_stem_w": _conv_w_to_mat(conv_w(ks[0], EFF_STEM, 3, 3, 3),
                                     EFF_KPAD).astype(jnp.bfloat16),
        "eff_stem_b": jnp.zeros((1, EFF_STEM), jnp.float32),
        "eff_head_w": (jax.random.normal(ks[1], (EFF_STEM, EFF_FEAT), jnp.float32)
                       * (2.0 / EFF_STEM) ** 0.5).astype(jnp.bfloat16),
        "eff_head_b": jnp.zeros((1, EFF_FEAT), jnp.float32),
        "eff_fc_w": eff_fc_w, "eff_fc_b": eff_fc_b,
        # ResNet50 proxy branch
        "res_stem_w": _conv_w_to_mat(conv_w(ks[4], RES_STEM, 3, 7, 7),
                                     RES_KPAD).astype(jnp.bfloat16),
        "res_stem_b": jnp.zeros((1, RES_STEM), jnp.float32),
        "res_head_w": (jax.random.normal(ks[5], (RES_STEM, RES_FEAT), jnp.float32)
                       * (2.0 / RES_STEM) ** 0.5).astype(jnp.bfloat16),
        "res_head_b": jnp.zeros((1, RES_FEAT), jnp.float32),
        "res_fc_w": res_fc_w, "res_fc_b": res_fc_b,
    }


def efficient_resnet_forward(params, x_nchw):
    # PyTorch input is NCHW -> internal NHWC.
    x = jnp.transpose(x_nchw, (0, 2, 3, 1)).astype(jnp.float32)

    # ---- EfficientNet branch: stem -> 1x1 projection -> mean-pool, fused in Pallas ----
    p_e, s_e, tm_e = im2col_padded(x, 3, 3, stride=2, pad=1, k_pad=EFF_KPAD)
    pooled_e = branch_pooled_features(p_e, s_e, tm_e,
                                      params["eff_stem_w"], params["eff_stem_b"],
                                      params["eff_head_w"], params["eff_head_b"],
                                      act="silu")                       # (B, 1408)

    # ---- ResNet50 branch proxy, same fused structure ----
    p_r, s_r, tm_r = im2col_padded(x, 7, 7, stride=2, pad=3, k_pad=RES_KPAD)
    pooled_r = branch_pooled_features(p_r, s_r, tm_r,
                                      params["res_stem_w"], params["res_stem_b"],
                                      params["res_head_w"], params["res_head_b"],
                                      act="relu")                       # (B, 2048)

    # ---- fused: (dropout=id) -> Linear per branch -> torch.add, lane-dense store ----
    return fused_heads(pooled_e, pooled_r,
                       params["eff_fc_w"], params["eff_fc_b"],
                       params["res_fc_w"], params["res_fc_b"])


if __name__ == "__main__":
    key = jax.random.PRNGKey(0)
    pkey, xkey = jax.random.split(key)
    params = init_params(pkey)
    x = jax.random.normal(xkey, (2, 3, 16, 16), jnp.float32)   # NCHW, like the PyTorch module
    out = jax.jit(efficient_resnet_forward)(params, x)
    out = jax.block_until_ready(out)
    assert out.shape == (2, NUM_CLASSES), out.shape
    assert bool(jnp.all(jnp.isfinite(out)))
    print("KERNEL_OK")
</pallas_src>

<mosaic_0001>
module attributes {stable_mosaic.version = 11 : i64} {
  func.func @_branch_kernel(%arg0: i32, %arg1: i32, %arg2: memref<1x64x32xbf16, #tpu.memory_space<vmem>>, %arg3: memref<32x32xbf16, #tpu.memory_space<vmem>>, %arg4: memref<1x32xf32, #tpu.memory_space<vmem>>, %arg5: memref<32x1408xbf16, #tpu.memory_space<vmem>>, %arg6: memref<1x1408xf32, #tpu.memory_space<vmem>>, %arg7: memref<1x1x1408xf32, #tpu.memory_space<vmem>>) attributes {dimension_semantics = [#tpu.dimension_semantics<parallel>, #tpu.dimension_semantics<arbitrary>], iteration_bounds = array<i64: 2, 1>, scalar_prefetch = 0 : i64, scratch_operands = 0 : i64, tpu.core_type = #tpu.core_type<tc>, window_params = [{transform_indices = @transform_0, window_bounds = array<i64: 1, 64, 32>}, {pipeline_mode = #tpu.pipeline_mode<synchronous>, transform_indices = @transform_1, window_bounds = array<i64: 32, 32>}, {pipeline_mode = #tpu.pipeline_mode<synchronous>, transform_indices = @transform_2, window_bounds = array<i64: 1, 32>}, {pipeline_mode = #tpu.pipeline_mode<synchronous>, transform_indices = @transform_3, window_bounds = array<i64: 32, 1408>}, {pipeline_mode = #tpu.pipeline_mode<synchronous>, transform_indices = @transform_4, window_bounds = array<i64: 1, 1408>}, {transform_indices = @transform_5, window_bounds = array<i64: 1, 1, 1408>}]} {
    %c0_i32 = arith.constant 0 : i32
    %0 = arith.cmpi eq, %arg1, %c0_i32 : i32
    %1 = arith.extui %0 : i1 to i32
    %c0_i32_0 = arith.constant 0 : i32
    %2 = arith.cmpi ne, %1, %c0_i32_0 : i32
    scf.if %2 {
      %cst_25 = arith.constant 0.000000e+00 : f32
      %47 = vector.broadcast %cst_25 : f32 to vector<1x1x1408xf32>
      %c0_26 = arith.constant 0 : index
      %c0_27 = arith.constant 0 : index
      %c0_28 = arith.constant 0 : index
      %48 = vector.load %arg7[%c0_26, %c0_27, %c0_28] : memref<1x1x1408xf32, #tpu.memory_space<vmem>>, vector<1x1x1408xf32>
      tpu.vector_store %arg7[%c0_26, %c0_27, %c0_28], %47 {strides = array<i32>} : memref<1x1x1408xf32, #tpu.memory_space<vmem>>, vector<1x1x1408xf32>,
    } else {
    }
    %c0 = arith.constant 0 : index
    %c0_1 = arith.constant 0 : index
    %c0_2 = arith.constant 0 : index
    %3 = vector.load %arg2[%c0, %c0_1, %c0_2] : memref<1x64x32xbf16, #tpu.memory_space<vmem>>, vector<1x64x32xbf16>
    %4 = vector.shape_cast %3 : vector<1x64x32xbf16> to vector<64x32xbf16>
    %c0_3 = arith.constant 0 : index
    %c0_4 = arith.constant 0 : index
    %5 = vector.load %arg3[%c0_3, %c0_4] : memref<32x32xbf16, #tpu.memory_space<vmem>>, vector<32x32xbf16>
    %cst = arith.constant dense<0.000000e+00> : vector<64x32xf32>
    %6 = tpu.matmul %4, %5, %cst {dimension_numbers = #tpu.dot_dimension_numbers<[1], [0], [0], [1], [0, 0, 1, 1], [], []>} : vector<64x32xbf16>, vector<32x32xbf16>, vector<64x32xf32> -> vector<64x32xf32>
    %c0_5 = arith.constant 0 : index
    %c0_6 = arith.constant 0 : index
    %7 = vector.load %arg4[%c0_5, %c0_6] : memref<1x32xf32, #tpu.memory_space<vmem>>, vector<1x32xf32>
    %8 = vector.broadcast %7 : vector<1x32xf32> to vector<64x32xf32>
    %9 = arith.addf %6, %8 : vector<64x32xf32>
    %10 = arith.negf %9 : vector<64x32xf32>
    %11 = math.exp %10 : vector<64x32xf32>
    %cst_7 = arith.constant 1.000000e+00 : f32
    %12 = vector.broadcast %cst_7 : f32 to vector<64x32xf32>
    %13 = arith.addf %12, %11 : vector<64x32xf32>
    %14 = arith.divf %12, %13 : vector<64x32xf32>
    %15 = arith.mulf %9, %14 : vector<64x32xf32>
    %16 = arith.truncf %15 : vector<64x32xf32> to vector<64x32xbf16>
    %c0_8 = arith.constant 0 : index
    %c0_9 = arith.constant 0 : index
    %17 = vector.load %arg5[%c0_8, %c0_9] : memref<32x1408xbf16, #tpu.memory_space<vmem>>, vector<32x1408xbf16>
    %cst_10 = arith.constant dense<0.000000e+00> : vector<64x1408xf32>
    %18 = tpu.matmul %16, %17, %cst_10 {dimension_numbers = #tpu.dot_dimension_numbers<[1], [0], [0], [1], [0, 0, 1, 1], [], []>} : vector<64x32xbf16>, vector<32x1408xbf16>, vector<64x1408xf32> -> vector<64x1408xf32>
    %c0_11 = arith.constant 0 : index
    %c0_12 = arith.constant 0 : index
    %19 = vector.load %arg6[%c0_11, %c0_12] : memref<1x1408xf32, #tpu.memory_space<vmem>>, vector<1x1408xf32>
    %20 = vector.broadcast %19 : vector<1x1408xf32> to vector<64x1408xf32>
    %21 = arith.addf %18, %20 : vector<64x1408xf32>
    %22 = arith.negf %21 : vector<64x1408xf32>
    %23 = math.exp %22 : vector<64x1408xf32>
    %cst_13 = arith.constant 1.000000e+00 : f32
    %24 = vector.broadcast %cst_13 : f32 to vector<64x1408xf32>
    %25 = arith.addf %24, %23 : vector<64x1408xf32>
    %26 = arith.divf %24, %25 : vector<64x1408xf32>
    %27 = arith.mulf %21, %26 : vector<64x1408xf32>
    %c64_i32 = arith.constant 64 : i32
    %28 = arith.muli %arg1, %c64_i32 : i32
    %29 = tpu.iota {dimensions = array<i32: 0>} : vector<64x1xi32>
    %30 = vector.broadcast %28 : i32 to vector<64x1xi32>
    %31 = arith.addi %30, %29 : vector<64x1xi32>
    %c64_i32_14 = arith.constant 64 : i32
    %32 = vector.broadcast %c64_i32_14 : i32 to vector<64x1xi32>
    %33 = arith.cmpi slt, %31, %32 : vector<64x1xi32>
    %cst_15 = arith.constant 0.000000e+00 : f32
    %34 = vector.shape_cast %33 : vector<64x1xi1> to vector<64x1xi1>
    %35 = vector.broadcast %34 : vector<64x1xi1> to vector<64x1408xi1>
    %36 = vector.broadcast %cst_15 : f32 to vector<64x1408xf32>
    %37 = arith.select %35, %27, %36 : vector<64x1408xi1>, vector<64x1408xf32>
    %c0_16 = arith.constant 0 : index
    %c0_17 = arith.constant 0 : index
    %c0_18 = arith.constant 0 : index
    %38 = vector.load %arg7[%c0_16, %c0_17, %c0_18] : memref<1x1x1408xf32, #tpu.memory_space<vmem>>, vector<1x1x1408xf32>
    %cst_19 = arith.constant dense<0.000000e+00> : vector<1408xf32>
    %39 = vector.multi_reduction <add>, %37, %cst_19 [0] : vector<64x1408xf32> to vector<1408xf32>
    %40 = vector.shape_cast %39 : vector<1408xf32> to vector<1x1408xf32>
    %41 = vector.shape_cast %40 : vector<1x1408xf32> to vector<1x1x1408xf32>
    %42 = arith.addf %38, %41 : vector<1x1x1408xf32>
    %c0_20 = arith.constant 0 : index
    %c0_21 = arith.constant 0 : index
    %c0_22 = arith.constant 0 : index
    %43 = vector.load %arg7[%c0_20, %c0_21, %c0_22] : memref<1x1x1408xf32, #tpu.memory_space<vmem>>, vector<1x1x1408xf32>
    tpu.vector_store %arg7[%c0_20, %c0_21, %c0_22], %42 {strides = array<i32>} : memref<1x1x1408xf32, #tpu.memory_space<vmem>>, vector<1x1x1408xf32>,
    %c0_i32_23 = arith.constant 0 : i32
    %44 = arith.cmpi eq, %arg1, %c0_i32_23 : i32
    %45 = arith.extui %44 : i1 to i32
    %c0_i32_24 = arith.constant 0 : i32
    %46 = arith.cmpi ne, %45, %c0_i32_24 : i32
    scf.if %46 {
      %c0_25 = arith.constant 0 : index
      %c0_26 = arith.constant 0 : index
      %c0_27 = arith.constant 0 : index
      %47 = vector.load %arg7[%c0_25, %c0_26, %c0_27] : memref<1x1x1408xf32, #tpu.memory_space<vmem>>, vector<1x1x1408xf32>
      %cst_28 = arith.constant 1.562500e-02 : f32
      %48 = vector.broadcast %cst_28 : f32 to vector<1x1x1408xf32>
      %49 = arith.mulf %47, %48 : vector<1x1x1408xf32>
      %c0_29 = arith.constant 0 : index
      %c0_30 = arith.constant 0 : index
      %c0_31 = arith.constant 0 : index
      %50 = vector.load %arg7[%c0_29, %c0_30, %c0_31] : memref<1x1x1408xf32, #tpu.memory_space<vmem>>, vector<1x1x1408xf32>
      tpu.vector_store %arg7[%c0_29, %c0_30, %c0_31], %49 {strides = array<i32>} : memref<1x1x1408xf32, #tpu.memory_space<vmem>>, vector<1x1x1408xf32>,
    } else {
    }
    return
  }
  func.func @transform_0(%arg0: i32, %arg1: i32) -> (i32, i32, i32) {
    %c0_i32 = arith.constant 0 : i32
    %c0_i32_0 = arith.constant 0 : i32
    return %arg0, %arg1, %c0_i32 : i32, i32, i32
  }
  func.func @transform_1(%arg0: i32, %arg1: i32) -> (i32, i32) {
    %c0_i32 = arith.constant 0 : i32
    %c0_i32_0 = arith.constant 0 : i32
    %c0_i32_1 = arith.constant 0 : i32
    return %c0_i32, %c0_i32_0 : i32, i32
  }
  func.func @transform_2(%arg0: i32, %arg1: i32) -> (i32, i32) {
    %c0_i32 = arith.constant 0 : i32
    %c0_i32_0 = arith.constant 0 : i32
    %c0_i32_1 = arith.constant 0 : i32
    return %c0_i32, %c0_i32_0 : i32, i32
  }
  func.func @transform_3(%arg0: i32, %arg1: i32) -> (i32, i32) {
    %c0_i32 = arith.constant 0 : i32
    %c0_i32_0 = arith.constant 0 : i32
    %c0_i32_1 = arith.constant 0 : i32
    return %c0_i32, %c0_i32_0 : i32, i32
  }
  func.func @transform_4(%arg0: i32, %arg1: i32) -> (i32, i32) {
    %c0_i32 = arith.constant 0 : i32
    %c0_i32_0 = arith.constant 0 : i32
    %c0_i32_1 = arith.constant 0 : i32
    return %c0_i32, %c0_i32_0 : i32, i32
  }
  func.func @transform_5(%arg0: i32, %arg1: i32) -> (i32, i32, i32) {
    %c0_i32 = arith.constant 0 : i32
    %c0_i32_0 = arith.constant 0 : i32
    %c0_i32_1 = arith.constant 0 : i32
    return %arg0, %c0_i32, %c0_i32_0 : i32, i32, i32
  }
}

module attributes {stable_mosaic.version = 11 : i64} {
  func.func @_branch_kernel(%arg0: i32, %arg1: i32, %arg2: memref<1x64x256xbf16, #tpu.memory_space<vmem>>, %arg3: memref<256x64xbf16, #tpu.memory_space<vmem>>, %arg4: memref<1x64xf32, #tpu.memory_space<vmem>>, %arg5: memref<64x2048xbf16, #tpu.memory_space<vmem>>, %arg6: memref<1x2048xf32, #tpu.memory_space<vmem>>, %arg7: memref<1x1x2048xf32, #tpu.memory_space<vmem>>) attributes {dimension_semantics = [#tpu.dimension_semantics<parallel>, #tpu.dimension_semantics<arbitrary>], iteration_bounds = array<i64: 2, 1>, scalar_prefetch = 0 : i64, scratch_operands = 0 : i64, tpu.core_type = #tpu.core_type<tc>, window_params = [{transform_indices = @transform_0, window_bounds = array<i64: 1, 64, 256>}, {pipeline_mode = #tpu.pipeline_mode<synchronous>, transform_indices = @transform_1, window_bounds = array<i64: 256, 64>}, {pipeline_mode = #tpu.pipeline_mode<synchronous>, transform_indices = @transform_2, window_bounds = array<i64: 1, 64>}, {pipeline_mode = #tpu.pipeline_mode<synchronous>, transform_indices = @transform_3, window_bounds = array<i64: 64, 2048>}, {pipeline_mode = #tpu.pipeline_mode<synchronous>, transform_indices = @transform_4, window_bounds = array<i64: 1, 2048>}, {transform_indices = @transform_5, window_bounds = array<i64: 1, 1, 2048>}]} {
    %c0_i32 = arith.constant 0 : i32
    %0 = arith.cmpi eq, %arg1, %c0_i32 : i32
    %1 = arith.extui %0 : i1 to i32
    %c0_i32_0 = arith.constant 0 : i32
    %2 = arith.cmpi ne, %1, %c0_i32_0 : i32
    scf.if %2 {
      %cst_25 = arith.constant 0.000000e+00 : f32
      %39 = vector.broadcast %cst_25 : f32 to vector<1x1x2048xf32>
      %c0_26 = arith.constant 0 : index
      %c0_27 = arith.constant 0 : index
      %c0_28 = arith.constant 0 : index
      %40 = vector.load %arg7[%c0_26, %c0_27, %c0_28] : memref<1x1x2048xf32, #tpu.memory_space<vmem>>, vector<1x1x2048xf32>
      tpu.vector_store %arg7[%c0_26, %c0_27, %c0_28], %39 {strides = array<i32>} : memref<1x1x2048xf32, #tpu.memory_space<vmem>>, vector<1x1x2048xf32>,
    } else {
    }
    %c0 = arith.constant 0 : index
    %c0_1 = arith.constant 0 : index
    %c0_2 = arith.constant 0 : index
    %3 = vector.load %arg2[%c0, %c0_1, %c0_2] : memref<1x64x256xbf16, #tpu.memory_space<vmem>>, vector<1x64x256xbf16>
    %4 = vector.shape_cast %3 : vector<1x64x256xbf16> to vector<64x256xbf16>
    %c0_3 = arith.constant 0 : index
    %c0_4 = arith.constant 0 : index
    %5 = vector.load %arg3[%c0_3, %c0_4] : memref<256x64xbf16, #tpu.memory_space<vmem>>, vector<256x64xbf16>
    %cst = arith.constant dense<0.000000e+00> : vector<64x64xf32>
    %6 = tpu.matmul %4, %5, %cst {dimension_numbers = #tpu.dot_dimension_numbers<[1], [0], [0], [1], [0, 0, 1, 1], [], []>} : vector<64x256xbf16>, vector<256x64xbf16>, vector<64x64xf32> -> vector<64x64xf32>
    %c0_5 = arith.constant 0 : index
    %c0_6 = arith.constant 0 : index
    %7 = vector.load %arg4[%c0_5, %c0_6] : memref<1x64xf32, #tpu.memory_space<vmem>>, vector<1x64xf32>
    %8 = vector.broadcast %7 : vector<1x64xf32> to vector<64x64xf32>
    %9 = arith.addf %6, %8 : vector<64x64xf32>
    %cst_7 = arith.constant 0.000000e+00 : f32
    %10 = vector.broadcast %cst_7 : f32 to vector<64x64xf32>
    %11 = arith.maximumf %9, %10 : vector<64x64xf32>
    %12 = arith.truncf %11 : vector<64x64xf32> to vector<64x64xbf16>
    %c0_8 = arith.constant 0 : index
    %c0_9 = arith.constant 0 : index
    %13 = vector.load %arg5[%c0_8, %c0_9] : memref<64x2048xbf16, #tpu.memory_space<vmem>>, vector<64x2048xbf16>
    %cst_10 = arith.constant dense<0.000000e+00> : vector<64x2048xf32>
    %14 = tpu.matmul %12, %13, %cst_10 {dimension_numbers = #tpu.dot_dimension_numbers<[1], [0], [0], [1], [0, 0, 1, 1], [], []>} : vector<64x64xbf16>, vector<64x2048xbf16>, vector<64x2048xf32> -> vector<64x2048xf32>
    %c0_11 = arith.constant 0 : index
    %c0_12 = arith.constant 0 : index
    %15 = vector.load %arg6[%c0_11, %c0_12] : memref<1x2048xf32, #tpu.memory_space<vmem>>, vector<1x2048xf32>
    %16 = vector.broadcast %15 : vector<1x2048xf32> to vector<64x2048xf32>
    %17 = arith.addf %14, %16 : vector<64x2048xf32>
    %cst_13 = arith.constant 0.000000e+00 : f32
    %18 = vector.broadcast %cst_13 : f32 to vector<64x2048xf32>
    %19 = arith.maximumf %17, %18 : vector<64x2048xf32>
    %c64_i32 = arith.constant 64 : i32
    %20 = arith.muli %arg1, %c64_i32 : i32
    %21 = tpu.iota {dimensions = array<i32: 0>} : vector<64x1xi32>
    %22 = vector.broadcast %20 : i32 to vector<64x1xi32>
    %23 = arith.addi %22, %21 : vector<64x1xi32>
    %c64_i32_14 = arith.constant 64 : i32
    %24 = vector.broadcast %c64_i32_14 : i32 to vector<64x1xi32>
    %25 = arith.cmpi slt, %23, %24 : vector<64x1xi32>
    %cst_15 = arith.constant 0.000000e+00 : f32
    %26 = vector.shape_cast %25 : vector<64x1xi1> to vector<64x1xi1>
    %27 = vector.broadcast %26 : vector<64x1xi1> to vector<64x2048xi1>
    %28 = vector.broadcast %cst_15 : f32 to vector<64x2048xf32>
    %29 = arith.select %27, %19, %28 : vector<64x2048xi1>, vector<64x2048xf32>
    %c0_16 = arith.constant 0 : index
    %c0_17 = arith.constant 0 : index
    %c0_18 = arith.constant 0 : index
    %30 = vector.load %arg7[%c0_16, %c0_17, %c0_18] : memref<1x1x2048xf32, #tpu.memory_space<vmem>>, vector<1x1x2048xf32>
    %cst_19 = arith.constant dense<0.000000e+00> : vector<2048xf32>
    %31 = vector.multi_reduction <add>, %29, %cst_19 [0] : vector<64x2048xf32> to vector<2048xf32>
    %32 = vector.shape_cast %31 : vector<2048xf32> to vector<1x2048xf32>
    %33 = vector.shape_cast %32 : vector<1x2048xf32> to vector<1x1x2048xf32>
    %34 = arith.addf %30, %33 : vector<1x1x2048xf32>
    %c0_20 = arith.constant 0 : index
    %c0_21 = arith.constant 0 : index
    %c0_22 = arith.constant 0 : index
    %35 = vector.load %arg7[%c0_20, %c0_21, %c0_22] : memref<1x1x2048xf32, #tpu.memory_space<vmem>>, vector<1x1x2048xf32>
    tpu.vector_store %arg7[%c0_20, %c0_21, %c0_22], %34 {strides = array<i32>} : memref<1x1x2048xf32, #tpu.memory_space<vmem>>, vector<1x1x2048xf32>,
    %c0_i32_23 = arith.constant 0 : i32
    %36 = arith.cmpi eq, %arg1, %c0_i32_23 : i32
    %37 = arith.extui %36 : i1 to i32
    %c0_i32_24 = arith.constant 0 : i32
    %38 = arith.cmpi ne, %37, %c0_i32_24 : i32
    scf.if %38 {
      %c0_25 = arith.constant 0 : index
      %c0_26 = arith.constant 0 : index
      %c0_27 = arith.constant 0 : index
      %39 = vector.load %arg7[%c0_25, %c0_26, %c0_27] : memref<1x1x2048xf32, #tpu.memory_space<vmem>>, vector<1x1x2048xf32>
      %cst_28 = arith.constant 1.562500e-02 : f32
      %40 = vector.broadcast %cst_28 : f32 to vector<1x1x2048xf32>
      %41 = arith.mulf %39, %40 : vector<1x1x2048xf32>
      %c0_29 = arith.constant 0 : index
      %c0_30 = arith.constant 0 : index
      %c0_31 = arith.constant 0 : index
      %42 = vector.load %arg7[%c0_29, %c0_30, %c0_31] : memref<1x1x2048xf32, #tpu.memory_space<vmem>>, vector<1x1x2048xf32>
      tpu.vector_store %arg7[%c0_29, %c0_30, %c0_31], %41 {strides = array<i32>} : memref<1x1x2048xf32, #tpu.memory_space<vmem>>, vector<1x1x2048xf32>,
    } else {
    }
    return
  }
  func.func @transform_0(%arg0: i32, %arg1: i32) -> (i32, i32, i32) {
    %c0_i32 = arith.constant 0 : i32
    %c0_i32_0 = arith.constant 0 : i32
    return %arg0, %arg1, %c0_i32 : i32, i32, i32
  }
  func.func @transform_1(%arg0: i32, %arg1: i32) -> (i32, i32) {
    %c0_i32 = arith.constant 0 : i32
    %c0_i32_0 = arith.constant 0 : i32
    %c0_i32_1 = arith.constant 0 : i32
    return %c0_i32, %c0_i32_0 : i32, i32
  }
  func.func @transform_2(%arg0: i32, %arg1: i32) -> (i32, i32) {
    %c0_i32 = arith.constant 0 : i32
    %c0_i32_0 = arith.constant 0 : i32
    %c0_i32_1 = arith.constant 0 : i32
    return %c0_i32, %c0_i32_0 : i32, i32
  }
  func.func @transform_3(%arg0: i32, %arg1: i32) -> (i32, i32) {
    %c0_i32 = arith.constant 0 : i32
    %c0_i32_0 = arith.constant 0 : i32
    %c0_i32_1 = arith.constant 0 : i32
    return %c0_i32, %c0_i32_0 : i32, i32
  }
  func.func @transform_4(%arg0: i32, %arg1: i32) -> (i32, i32) {
    %c0_i32 = arith.constant 0 : i32
    %c0_i32_0 = arith.constant 0 : i32
    %c0_i32_1 = arith.constant 0 : i32
    return %c0_i32, %c0_i32_0 : i32, i32
  }
  func.func @transform_5(%arg0: i32, %arg1: i32) -> (i32, i32, i32) {
    %c0_i32 = arith.constant 0 : i32
    %c0_i32_0 = arith.constant 0 : i32
    %c0_i32_1 = arith.constant 0 : i32
    return %arg0, %c0_i32, %c0_i32_0 : i32, i32, i32
  }
}

module attributes {stable_mosaic.version = 11 : i64} {
  func.func @_head_kernel(%arg0: memref<2x1408xf32, #tpu.memory_space<vmem>>, %arg1: memref<2x2048xf32, #tpu.memory_space<vmem>>, %arg2: memref<1408x128xf32, #tpu.memory_space<vmem>>, %arg3: memref<1x128xf32, #tpu.memory_space<vmem>>, %arg4: memref<2048x128xf32, #tpu.memory_space<vmem>>, %arg5: memref<1x128xf32, #tpu.memory_space<vmem>>, %arg6: memref<2x128xf32, #tpu.memory_space<vmem>>) attributes {dimension_semantics = [], scalar_prefetch = 0 : i64, scratch_operands = 0 : i64, tpu.core_type = #tpu.core_type<tc>} {
    %c0 = arith.constant 0 : index
    %c0_0 = arith.constant 0 : index
    %0 = vector.load %arg0[%c0, %c0_0] : memref<2x1408xf32, #tpu.memory_space<vmem>>, vector<2x1408xf32>
    %c0_1 = arith.constant 0 : index
    %c0_2 = arith.constant 0 : index
    %1 = vector.load %arg2[%c0_1, %c0_2] : memref<1408x128xf32, #tpu.memory_space<vmem>>, vector<1408x128xf32>
    %cst = arith.constant dense<0.000000e+00> : vector<2x128xf32>
    %2 = tpu.matmul %0, %1, %cst {dimension_numbers = #tpu.dot_dimension_numbers<[1], [0], [0], [1], [0, 0, 1, 1], [], []>} : vector<2x1408xf32>, vector<1408x128xf32>, vector<2x128xf32> -> vector<2x128xf32>
    %c0_3 = arith.constant 0 : index
    %c0_4 = arith.constant 0 : index
    %3 = vector.load %arg3[%c0_3, %c0_4] : memref<1x128xf32, #tpu.memory_space<vmem>>, vector<1x128xf32>
    %4 = vector.broadcast %3 : vector<1x128xf32> to vector<2x128xf32>
    %5 = arith.addf %2, %4 : vector<2x128xf32>
    %c0_5 = arith.constant 0 : index
    %c0_6 = arith.constant 0 : index
    %6 = vector.load %arg1[%c0_5, %c0_6] : memref<2x2048xf32, #tpu.memory_space<vmem>>, vector<2x2048xf32>
    %c0_7 = arith.constant 0 : index
    %c0_8 = arith.constant 0 : index
    %7 = vector.load %arg4[%c0_7, %c0_8] : memref<2048x128xf32, #tpu.memory_space<vmem>>, vector<2048x128xf32>
    %cst_9 = arith.constant dense<0.000000e+00> : vector<2x128xf32>
    %8 = tpu.matmul %6, %7, %cst_9 {dimension_numbers = #tpu.dot_dimension_numbers<[1], [0], [0], [1], [0, 0, 1, 1], [], []>} : vector<2x2048xf32>, vector<2048x128xf32>, vector<2x128xf32> -> vector<2x128xf32>
    %9 = arith.addf %5, %8 : vector<2x128xf32>
    %c0_10 = arith.constant 0 : index
    %c0_11 = arith.constant 0 : index
    %10 = vector.load %arg5[%c0_10, %c0_11] : memref<1x128xf32, #tpu.memory_space<vmem>>, vector<1x128xf32>
    %11 = vector.broadcast %10 : vector<1x128xf32> to vector<2x128xf32>
    %12 = arith.addf %9, %11 : vector<2x128xf32>
    %c0_12 = arith.constant 0 : index
    %c0_13 = arith.constant 0 : index
    %13 = vector.load %arg6[%c0_12, %c0_13] : memref<2x128xf32, #tpu.memory_space<vmem>>, vector<2x128xf32>
    tpu.vector_store %arg6[%c0_12, %c0_13], %12 {strides = array<i32>} : memref<2x128xf32, #tpu.memory_space<vmem>>, vector<2x128xf32>,
    return
  }
}

</mosaic_0001>

<bundles_post_ra>
// kernel: efficient_resnet_forward.3
= control target key start
LH: loop header
LB: loop body
LE: loop exit
PB: predicated region body
PF: predicated region fallthrough
CT: control target
= control target key end

     0   :  { %s2855_s18 = smov 0   ;;  %s2857_s19 = smov 0   ;;  %s3848_s0 = inlined_call_operand.vmem [shape: bf16[2,64,32], index: 0, kind: input, shape index: {}]   ;;  %s3849_s1 = inlined_call_operand.vmem [shape: bf16[32,32], index: 1, kind: input, shape index: {}]   ;;  %s3850_s2 = inlined_call_operand.vmem [shape: f32[1,32], index: 2, kind: input, shape index: {}]   ;;  %s3851_s3 = inlined_call_operand.vmem [shape: bf16[32,1408], index: 3, kind: input, shape index: {}]   ;;  %s3852_s4 = inlined_call_operand.vmem [shape: f32[1,1408], index: 4, kind: input, shape index: {}]   ;;  %s3853_s5 = inlined_call_operand.vmem [shape: f32[2,1,1408], index: 5, kind: output, shape index: {}]  }
   0x1   :  { %s2859_s20 = smov 0  }
   0x2 LB: > { %s27_s21 = sadd.s32 1, %s2816_s19  ;;  %p2153_p0 = scmp.ge.s32.totalorder %s2820_s20, 1  ;;  %s2820_s20 = sphi %s2859_s20, %s15_s20   ;;  %s2816_s19 = sphi %s2857_s19, %s3936_s19   ;;  %s2812_s18 = sphi %s2855_s18, %s3935_s18  }
   0x3   : > { %p29_p1 = scmp.ge.s32.totalorder %s27_s21, 2  ;;  %p206_p2 = scmp.lt.s32.totalorder %s2820_s20, 3 }
   0x5   : > { %s3938_s21 = smov (%p29_p1, %s27_s21), 0  ;;  %p207_p3 = pnand %p2153_p0, %p206_p2 }
   0x7   : > { %210 = sbr.rel (%p207_p3) target bundleno = 716 (0x2cc), region = 40 }
   0xe   : > { %v2376_v0 = vld [vmem:[%s3849_s1] sm:$0xff]   ;;  %p238_p4 = scmp.lt.s32.totalorder %s2812_s18, 1  ;;  %v2377_v1 = vld [vmem:[%s3849_s1 + $0x8] sm:$0xff]   ;;  %vm313_vm0 = vcmask 261120   ;;  %v2822_v14 = vmov 0  }
   0xf   : > { %2324 = vmatprep.subr.bf16.mxu0 %v2376_v0  ;;  %v2382_v6 = vld [vmem:[%s3851_s3 + $0x4] ss:$44 sps:$4 sm:$0xff]   ;;  %v2387_v7 = vld [vmem:[%s3851_s3 + $0xc] ss:$44 sps:$4 sm:$0xff]   ;;  %v2385_v9 = vld [vmem:[%s3851_s3 + $0x8] ss:$44 sps:$4 sm:$0xff]   ;;  %690 = vmatprep.mubr.bf16.mxu1 %v2822_v14 }
  0x10   : > { %s3940_s18 = smov (!%p238_p4, %s2812_s18), 1  ;;  %2325 = vmatpush3.bf16.msra.mxu0 %v2376_v0  ;;  %v2384_v8 = vld [vmem:[%s3851_s3] ss:$44 sps:$4 sm:$0xff]   ;;  %658 = vmatprep.subr.bf16.mxu1 %v2382_v6  ;;  %v2388_v10 = vld [vmem:[%s3851_s3 + $0x5c] ss:$44 sps:$4 sm:$0xff]  }
  0x11   : > { %2326 = vmatprep.subr.bf16.mxu0 %v2377_v1  ;;  %s2311_s26 = sshll.u32 %s3940_s18, 5  ;;  %659 = vmatpush1.bf16.msra.mxu1 %v2384_v8  ;;  %v2393_v11 = vld [vmem:[%s3851_s3 + $0x64] ss:$44 sps:$4 sm:$0xff]   ;;  %v2391_v13 = vld [vmem:[%s3851_s3 + $0x60] ss:$44 sps:$4 sm:$0xff]   ;;  %s2348_s11 = smul.u32 11, %s3940_s18 }
  0x12   : > { %s245_s29 = scalar_lea.vmem %s3848_s0, %s2311_s26  ;;  %v2390_v12 = vld [vmem:[%s3851_s3 + $0x58] ss:$44 sps:$4 sm:$0xff]   ;;  %660 = vmatprep.subr.bf16.mxu1 %v2388_v10  ;;  %v2396_v15 = vld [vmem:[%s3851_s3 + $0x14] ss:$44 sps:$4 sm:$0xff]   ;;  %v2399_v16 = vld [vmem:[%s3851_s3 + $0x1c] ss:$44 sps:$4 sm:$0xff]  }
  0x13   : > { %v2378_v2 = vld [vmem:[%s245_s29] sm:$0xff]   ;;  %v2379_v3 = vld [vmem:[%s245_s29 + $0x8] sm:$0xff]   ;;  %v2380_v4 = vld [vmem:[%s245_s29 + $0x10] sm:$0xff]   ;;  %s3421_s13 = scalar_lea.vmem %s3853_s5, %s2348_s11 }
  0x14   : > { %2327 = vmatpush3.bf16.msra.mxu0 %v2377_v1  ;;  %2328 = vmatprep.mubr.msk.bf16.mxu0 %vm313_vm0, %v2378_v2  ;;  %v2381_v5 = vld [vmem:[%s245_s29 + $0x18] sm:$0xff]   ;;  %v2156_v17 = vld [vmem:[%s3850_s2] ss:$0 sm:$0xff]  ;;  %v2400_v10 = vld [vmem:[%s3851_s3 + $0x68] ss:$44 sps:$4 sm:$0xff]  }
  0x15   : > { %731 = vmatprep.subr.bf16.mxu0 %v2387_v7  ;;  %661 = vmatpush1.bf16.msra.mxu1 %v2390_v12  ;;  %v2402_v6 = vld [vmem:[%s3851_s3 + $0x6c] ss:$44 sps:$4 sm:$0xff]   ;;  %v2405_v7 = vld [vmem:[%s3851_s3 + $0x74] ss:$44 sps:$4 sm:$0xff]   ;;  %v2403_v12 = vld [vmem:[%s3851_s3 + $0x70] ss:$44 sps:$4 sm:$0xff]  }
  0x16   : > { %804 = vmatprep.subr.bf16.mxu1 %v2396_v15 }
  0x17   : > { %2329 = vmatmul.mubr.msk.bf16.vlgmr.msra.gmra.mrb[0].mxu0 %vm313_vm0, %v2379_v3  ;;  %v2394_v3 = vld [vmem:[%s3851_s3 + $0x10] ss:$44 sps:$4 sm:$0xff]  }
  0x18   : > { %2332 = vmatprep.mubr.msk.bf16.mxu0 %vm313_vm0, %v2380_v4  ;;  %732 = vmatpush1.bf16.msra.mxu0 %v2385_v9 }
  0x19   : > { %733 = vmatprep.subr.bf16.mxu0 %v2393_v11 }
  0x1c   : > { %734 = vmatpush1.bf16.msra.mxu0 %v2391_v13  ;;  %v2408_v13 = vld [vmem:[%s3851_s3 + $0x24] ss:$44 sps:$4 sm:$0xff]  }
  0x1d   : > { %877 = vmatprep.subr.bf16.mxu0 %v2399_v16 }
  0x1f   : > { %2333 = vmatmul.mubr.msk.bf16.gmra.mrb[4].mxu0 %vm313_vm0, %v2381_v5  ;;  %v2397_v5 = vld [vmem:[%s3851_s3 + $0x18] ss:$44 sps:$4 sm:$0xff]  }
  0x20   : > { %763 = vmatprep.mubr.bf16.mxu0 %v2822_v14 }
  0xea   : > { %v2330_v18 = vpop.f32.mrb[0].mxu0 }
  0xeb   : > { %v369_v19 = vadd.f32 %v2330_v18, %v2156_v17  ;;  %v360_v20 = vpop.f32.mrb[1].mxu0  ;;  %v2409_v18 = vld [vmem:[%s3851_s3 + $0x28] ss:$44 sps:$4 sm:$0xff]  }
  0xec   : > { %v361_v21 = vadd.f32 %v2156_v17, %v360_v20  ;;  %v2331_v22 = vpop.f32.mrb[2].mxu0 }
  0xed   : > { %v2169_v23 = vmul.f32 -1.442695, %v369_v19  ;;  %v372_v24 = vadd.f32 %v2331_v22, %v2156_v17  ;;  %v363_v25 = vpop.f32.mrb[3].mxu0 }
  0xee   : > { %v2167_v26 = vmul.f32 -1.442695, %v361_v21  ;;  %v364_v27 = vadd.f32 %v2156_v17, %v363_v25  ;;  %v2413_v25 = vld [vmem:[%s3851_s3 + $0x80] ss:$44 sps:$4 sm:$0xff]  }
  0xef   : > { %2414 = vpow2.f32 %v2169_v23  ;;  %v2170_v28 = vmul.f32 -1.442695, %v372_v24  ;;  %v2406_v23 = vld [vmem:[%s3851_s3 + $0x20] ss:$44 sps:$4 sm:$0xff]  }
  0xf0   : > { %2416 = vpow2.f32 %v2167_v26  ;;  %v2168_v29 = vmul.f32 -1.442695, %v364_v27  ;;  %v2410_v26 = vld [vmem:[%s3851_s3 + $0x78] ss:$44 sps:$4 sm:$0xff]  }
  0xf1   : > { %2418 = vpow2.f32 %v2170_v28 }
  0xf2   : > { %2420 = vpow2.f32 %v2168_v29  ;;  %v2334_v30 = vpop.f32.mrb[4].mxu0 }
  0xf3   : > { %v2924_v31 = vadd.f32 %v2334_v30, %v2156_v17  ;;  %v376_v32 = vpop.f32.mrb[5].mxu0 }
  0xf4   : > { %v2926_v33 = vadd.f32 %v2156_v17, %v376_v32  ;;  %v2335_v34 = vpop.f32.mrb[6].mxu0 }
  0xf5   : > { %v2173_v35 = vmul.f32 -1.442695, %v2924_v31  ;;  %v388_v36 = vadd.f32 %v2335_v34, %v2156_v17  ;;  %v379_v37 = vpop.f32.mrb[7].mxu0 }
  0xf6   : > { %v2171_v38 = vmul.f32 -1.442695, %v2926_v33  ;;  %v2930_v39 = vadd.f32 %v2156_v17, %v379_v37 }
  0xf7   : > { %2422 = vpow2.f32 %v2173_v35  ;;  %v2174_v40 = vmul.f32 -1.442695, %v388_v36 }
  0xf8   : > { %2424 = vpow2.f32 %v2171_v38  ;;  %v2172_v41 = vmul.f32 -1.442695, %v2930_v39 }
  0xf9   : > { %v2415_v42 = vpop.eup %2414  ;;  %2426 = vpow2.f32 %v2174_v40 }
  0xfa   : > { %v2417_v43 = vpop.eup %2416  ;;  %v417_v44 = vadd.f32 1.0, %v2415_v42  ;;  %2428 = vpow2.f32 %v2172_v41 }
  0xfb   : > { %v2419_v45 = vpop.eup %2418  ;;  %v415_v46 = vadd.f32 1.0, %v2417_v43 }
  0xfc   : > { %v2421_v47 = vpop.eup %2420  ;;  %2430 = vrcp.f32 %v417_v44  ;;  %v418_v48 = vadd.f32 1.0, %v2419_v45 }
  0xfd   : > { %2432 = vrcp.f32 %v415_v46  ;;  %v416_v49 = vadd.f32 1.0, %v2421_v47 }
  0xfe   : > { %2434 = vrcp.f32 %v418_v48 }
  0xff   : > { %2436 = vrcp.f32 %v416_v49 }
 0x101   : > { %v2423_v50 = vpop.eup %2422 }
 0x102   : > { %v2425_v51 = vpop.eup %2424  ;;  %v421_v52 = vadd.f32 1.0, %v2423_v50 }
 0x103   : > { %v2427_v53 = vpop.eup %2426  ;;  %v419_v54 = vadd.f32 1.0, %v2425_v51 }
 0x104   : > { %v2429_v55 = vpop.eup %2428  ;;  %2438 = vrcp.f32 %v421_v52  ;;  %v422_v56 = vadd.f32 1.0, %v2427_v53 }
 0x105   : > { %2440 = vrcp.f32 %v419_v54  ;;  %v420_v57 = vadd.f32 1.0, %v2429_v55 }
 0x106   : > { %v2431_v58 = vpop.eup %2430  ;;  %2442 = vrcp.f32 %v422_v56 }
 0x107   : > { %v2433_v59 = vpop.eup %2432  ;;  %2444 = vrcp.f32 %v420_v57  ;;  %v441_v62 = vmul.f32 %v2431_v58, %v369_v19 }
 0x108   : > { %v2435_v60 = vpop.eup %2434  ;;  %v439_v0 = vmul.f32 %v2433_v59, %v361_v21 }
 0x109   : > { %v2437_v61 = vpop.eup %2436  ;;  %v442_v63 = vmul.f32 %v2435_v60, %v372_v24  ;;  %v2412_v24 = vld [vmem:[%s3851_s3 + $0x7c] ss:$44 sps:$4 sm:$0xff]  }
 0x10a   : > { %v440_v1 = vmul.f32 %v2437_v61, %v364_v27  ;;  %v3857_v27 = vlaneseq }
 0x10b   : > { %v2933_v2 = vpack.c.bf16 %v442_v63, %v441_v62 }
 0x10c   : > { %v2938_v4 = vpack.c.bf16 %v440_v1, %v439_v0  ;;  %v3031_v28 = vshrl.u32 %v3857_v27, 7 }
 0x10e   : > { %v2439_v8 = vpop.eup %2438  ;;  %2197 = vmatmul.mubr.msk.bf16.vlgmr.msra.gmra.mrb[0].mxu1 %vm313_vm0, %v2938_v4  ;;  %2201 = vmatmul.mubr.msk.bf16.vlgmr.msra.gmra.mrb[8].mxu0 %vm313_vm0, %v2938_v4  ;;  %v3856_v29 = vsub.s32 0, %v3031_v28  ;;  %v3855_v30 = vsub.s32 2, %v3031_v28  ;;  %v3854_v32 = vsub.s32 1, %v3031_v28 }
 0x10f   : > { %v2441_v9 = vpop.eup %2440  ;;  %805 = vmatpush1.bf16.msra.mxu1 %v2394_v3  ;;  %700 = vmatprep.mubr.bf16.mxu1 %v2822_v14  ;;  %v445_v16 = vmul.f32 %v2439_v8, %v2924_v31  ;;  %v3038_v31 = vld [vmem:[%s3852_s4] sm:$0xff] }
 0x110   : > { %v2443_v11 = vpop.eup %2442  ;;  %773 = vmatprep.mubr.bf16.mxu0 %v2822_v14  ;;  %878 = vmatpush1.bf16.msra.mxu0 %v2397_v5  ;;  %v443_v19 = vmul.f32 %v2441_v9, %v2926_v33  ;;  %v493_v33 = vsub.s32 3, %v3031_v28  ;;  %v3050_v34 = vrot.slane %v3038_v31, %v3855_v30  ;;  %v3055_v35 = vrot.slane %v3038_v31, %v3854_v32 }
 0x111   : > { %v2445_v15 = vpop.eup %2444  ;;  %v446_v17 = vmul.f32 %v2443_v11, %v388_v36  ;;  %806 = vmatprep.subr.bf16.mxu1 %v2402_v6  ;;  %879 = vmatprep.subr.bf16.mxu0 %v2405_v7 }
 0x112   : > { %v444_v20 = vmul.f32 %v2445_v15, %v2930_v39  ;;  %v3058_v36 = vrot.slane %v3038_v31, %v493_v33 }
 0x113   : > { %v450_v21 = vpack.c.bf16 %v446_v17, %v445_v16  ;;  %807 = vmatpush1.bf16.msra.mxu1 %v2400_v10 }
 0x114   : > { %v449_v22 = vpack.c.bf16 %v444_v20, %v443_v19  ;;  %880 = vmatpush1.bf16.msra.mxu0 %v2403_v12  ;;  %950 = vmatprep.subr.bf16.mxu1 %v2408_v13 }
 0x115   : > { %2336 = vmatprep.subr.bf16.mxu0 %v2409_v18 }
 0x116   : > { %2198 = vmatmul.mubr.msk.bf16.gmra.mrb[4].mxu1 %vm313_vm0, %v2933_v2  ;;  %2202 = vmatmul.mubr.msk.bf16.gmra.mrb[12].mxu0 %vm313_vm0, %v2933_v2 }
 0x117   : > { %710 = vmatprep.mubr.bf16.mxu1 %v2822_v14  ;;  %783 = vmatprep.mubr.bf16.mxu0 %v2822_v14 }
 0x11e   : > { %2199 = vmatmul.mubr.msk.bf16.gmra.mrb[8].mxu1 %vm313_vm0, %v449_v22  ;;  %2203 = vmatmul.mubr.msk.bf16.gmra.mrb[16].mxu0 %vm313_vm0, %v449_v22 }
 0x11f   : > { %720 = vmatprep.mubr.bf16.mxu1 %v2822_v14  ;;  %793 = vmatprep.mubr.bf16.mxu0 %v2822_v14 }
 0x126   : > { %2200 = vmatmul.mubr.msk.bf16.gmra.mrb[12].mxu1 %vm313_vm0, %v450_v21  ;;  %2204 = vmatmul.mubr.msk.bf16.gmra.mrb[20].mxu0 %vm313_vm0, %v450_v21 }
 0x127   : > { %836 = vmatprep.mubr.bf16.mxu1 %v2822_v14  ;;  %909 = vmatprep.mubr.bf16.mxu0 %v2822_v14 }
 0x12e   : > { %2205 = vmatmul.mubr.msk.bf16.vlgmr.msra.gmra.mrb[16].mxu1 %vm313_vm0, %v2938_v4  ;;  %2209 = vmatmul.mubr.msk.bf16.vlgmr.msra.gmra.mrb[24].mxu0 %vm313_vm0, %v2938_v4 }
 0x12f   : > { %951 = vmatpush1.bf16.msra.mxu1 %v2406_v23  ;;  %846 = vmatprep.mubr.bf16.mxu1 %v2822_v14 }
 0x130   : > { %919 = vmatprep.mubr.bf16.mxu0 %v2822_v14  ;;  %2337 = vmatpush3.bf16.msra.mxu0 %v2409_v18 }
 0x131   : > { %952 = vmatprep.subr.bf16.mxu1 %v2412_v24  ;;  %2338 = vmatprep.subr.bf16.mxu0 %v2413_v25 }
 0x133   : > { %953 = vmatpush1.bf16.msra.mxu1 %v2410_v26 }
 0x134   : > { %2339 = vmatpush3.bf16.msra.mxu0 %v2413_v25 }
 0x136   : > { %2206 = vmatmul.mubr.msk.bf16.gmra.mrb[20].mxu1 %vm313_vm0, %v2933_v2  ;;  %2210 = vmatmul.mubr.msk.bf16.gmra.mrb[28].mxu0 %vm313_vm0, %v2933_v2 }
 0x137   : > { %856 = vmatprep.mubr.bf16.mxu1 %v2822_v14  ;;  %929 = vmatprep.mubr.bf16.mxu0 %v2822_v14 }
 0x13e   : > { %2207 = vmatmul.mubr.msk.bf16.gmra.mrb[24].mxu1 %vm313_vm0, %v449_v22  ;;  %2211 = vmatmul.mubr.msk.bf16.gmra.mrb[32].mxu0 %vm313_vm0, %v449_v22 }
 0x13f   : > { %866 = vmatprep.mubr.bf16.mxu1 %v2822_v14  ;;  %939 = vmatprep.mubr.bf16.mxu0 %v2822_v14 }
 0x146   : > { %2208 = vmatmul.mubr.msk.bf16.gmra.mrb[28].mxu1 %vm313_vm0, %v450_v21  ;;  %2212 = vmatmul.mubr.msk.bf16.gmra.mrb[36].mxu0 %vm313_vm0, %v450_v21 }
 0x147   : > { %2340 = vmatprep.mubr.msk.bf16.mxu0 %vm313_vm0, %v2938_v4  ;;  %982 = vmatprep.mubr.bf16.mxu1 %v2822_v14 }
 0x14e   : > { %2213 = vmatmul.mubr.msk.bf16.vlgmr.msra.gmra.mrb[32].mxu1 %vm313_vm0, %v2938_v4  ;;  %2341 = vmatmul.mubr.msk.bf16.vlgmr.msra.gmra.mrb[40].mxu0 %vm313_vm0, %v2933_v2 }
 0x14f   : > { %2344 = vmatprep.mubr.msk.bf16.mxu0 %vm313_vm0, %v449_v22  ;;  %992 = vmatprep.mubr.bf16.mxu1 %v2822_v14 }
 0x156   : > { %2214 = vmatmul.mubr.msk.bf16.gmra.mrb[36].mxu1 %vm313_vm0, %v2933_v2  ;;  %2345 = vmatmul.mubr.msk.bf16.gmra.mrb[44].mxu0 %vm313_vm0, %v450_v21 }
 0x157   : > { %1002 = vmatprep.mubr.bf16.mxu1 %v2822_v14 }
 0x15e   : > { %2215 = vmatmul.mubr.msk.bf16.gmra.mrb[40].mxu1 %vm313_vm0, %v449_v22 }
 0x15f   : > { %1012 = vmatprep.mubr.bf16.mxu1 %v2822_v14  ;;  %v3045_v14 = vrot.slane %v3038_v31, %v3856_v29 }
 0x166   : > { %2216 = vmatmul.mubr.msk.bf16.gmra.mrb[44].mxu1 %vm313_vm0, %v450_v21 }
 0x1e1   : > { %v692_v37 = vpop.f32.mrb[0].mxu1  ;;  %v765_v38 = vpop.f32.mrb[8].mxu0 }
 0x1e2   : > { %v3061_v39 = vadd.f32 %v692_v37, %v3045_v14  ;;  %v3064_v40 = vadd.f32 %v765_v38, %v3050_v34  ;;  %v694_v41 = vpop.f32.mrb[1].mxu1  ;;  %v767_v42 = vpop.f32.mrb[9].mxu0 }
 0x1e3   : > { %v3067_v43 = vadd.f32 %v694_v41, %v3055_v35  ;;  %v3070_v44 = vadd.f32 %v767_v42, %v3058_v36  ;;  %v696_v45 = vpop.f32.mrb[2].mxu1  ;;  %v769_v46 = vpop.f32.mrb[10].mxu0 }
 0x1e4   : > { %v2221_v47 = vmul.f32 -1.442695, %v3061_v39  ;;  %v2223_v48 = vmul.f32 -1.442695, %v3064_v40  ;;  %v3075_v49 = vadd.f32 %v696_v45, %v3045_v14  ;;  %v3078_v50 = vadd.f32 %v769_v46, %v3050_v34  ;;  %v698_v51 = vpop.f32.mrb[3].mxu1  ;;  %v771_v52 = vpop.f32.mrb[11].mxu0 }
 0x1e5   : > { %v2222_v53 = vmul.f32 -1.442695, %v3067_v43  ;;  %v2224_v54 = vmul.f32 -1.442695, %v3070_v44  ;;  %v3083_v55 = vadd.f32 %v698_v51, %v3055_v35  ;;  %v3086_v56 = vadd.f32 %v771_v52, %v3058_v36 }
 0x1e6   : > { %2446 = vpow2.f32 %v2221_v47  ;;  %v2232_v57 = vmul.f32 -1.442695, %v3075_v49  ;;  %v2234_v58 = vmul.f32 -1.442695, %v3078_v50 }
 0x1e7   : > { %2448 = vpow2.f32 %v2223_v48  ;;  %v2233_v59 = vmul.f32 -1.442695, %v3083_v55  ;;  %v2235_v60 = vmul.f32 -1.442695, %v3086_v56 }
 0x1e8   : > { %2450 = vpow2.f32 %v2222_v53 }
 0x1e9   : > { %2452 = vpow2.f32 %v2224_v54  ;;  %v702_v61 = vpop.f32.mrb[4].mxu1  ;;  %v775_v62 = vpop.f32.mrb[12].mxu0 }
 0x1ea   : > { %2454 = vpow2.f32 %v2232_v57  ;;  %v3093_v63 = vadd.f32 %v702_v61, %v3045_v14  ;;  %v3096_v0 = vadd.f32 %v775_v62, %v3050_v34  ;;  %v704_v1 = vpop.f32.mrb[5].mxu1  ;;  %v777_v2 = vpop.f32.mrb[13].mxu0 }
 0x1eb   : > { %2456 = vpow2.f32 %v2234_v58  ;;  %v3099_v3 = vadd.f32 %v704_v1, %v3055_v35  ;;  %v3102_v4 = vadd.f32 %v777_v2, %v3058_v36  ;;  %v706_v5 = vpop.f32.mrb[6].mxu1  ;;  %v779_v6 = vpop.f32.mrb[14].mxu0 }
 0x1ec   : > { %2458 = vpow2.f32 %v2233_v59  ;;  %v2243_v7 = vmul.f32 -1.442695, %v3093_v63  ;;  %v2245_v8 = vmul.f32 -1.442695, %v3096_v0  ;;  %v3107_v9 = vadd.f32 %v706_v5, %v3045_v14  ;;  %v708_v10 = vpop.f32.mrb[7].mxu1  ;;  %v781_v11 = vpop.f32.mrb[15].mxu0 }
 0x1ed   : > { %2460 = vpow2.f32 %v2235_v60  ;;  %v2244_v12 = vmul.f32 -1.442695, %v3099_v3  ;;  %v2246_v13 = vmul.f32 -1.442695, %v3102_v4  ;;  %v3113_v47 = vadd.f32 %v779_v6, %v3050_v34 }
 0x1ee   : > { %2462 = vpow2.f32 %v2243_v7  ;;  %v2254_v15 = vmul.f32 -1.442695, %v3107_v9  ;;  %v3116_v53 = vadd.f32 %v708_v10, %v3055_v35  ;;  %v3120_v1 = vadd.f32 %v781_v11, %v3058_v36 }
 0x1ef   : > { %2464 = vpow2.f32 %v2245_v8  ;;  %v2256_v62 = vmul.f32 -1.442695, %v3113_v47 }
 0x1f0   : > { %v2447_v16 = vpop.eup %2446  ;;  %2466 = vpow2.f32 %v2244_v12  ;;  %v2255_v7 = vmul.f32 -1.442695, %v3116_v53 }
 0x1f1   : > { %v2449_v17 = vpop.eup %2448  ;;  %v1352_v18 = vadd.f32 1.0, %v2447_v16  ;;  %2468 = vpow2.f32 %v2246_v13  ;;  %v712_v19 = vpop.f32.mrb[8].mxu1 }
 0x1f2   : > { %v785_v20 = vpop.f32.mrb[16].mxu0  ;;  %v2451_v21 = vpop.eup %2450  ;;  %v1354_v22 = vadd.f32 1.0, %v2449_v17  ;;  %2470 = vpow2.f32 %v2254_v15  ;;  %v3124_v8 = vadd.f32 %v712_v19, %v3045_v14 }
 0x1f3   : > { %v714_v23 = vpop.f32.mrb[9].mxu1  ;;  %v787_v24 = vpop.f32.mrb[17].mxu0  ;;  %2472 = vrcp.f32 %v1352_v18  ;;  %v1353_v26 = vadd.f32 1.0, %v2451_v21  ;;  %v3129_v16 = vadd.f32 %v785_v20, %v3050_v34 }
 0x1f4   : > { %v2453_v25 = vpop.eup %2452  ;;  %v716_v33 = vpop.f32.mrb[10].mxu1  ;;  %2474 = vrcp.f32 %v1354_v22  ;;  %v3132_v11 = vadd.f32 %v714_v23, %v3055_v35  ;;  %v3139_v22 = vadd.f32 %v787_v24, %v3058_v36 }
 0x1f5   : > { %v789_v37 = vpop.f32.mrb[18].mxu0  ;;  %v2455_v38 = vpop.eup %2454  ;;  %v1355_v41 = vadd.f32 1.0, %v2453_v25  ;;  %2476 = vrcp.f32 %v1353_v26  ;;  %v3142_v25 = vadd.f32 %v716_v33, %v3045_v14  ;;  %v2257_v33 = vmul.f32 -1.442695, %v3120_v1 }
 0x1f6   : > { %v718_v42 = vpop.f32.mrb[11].mxu1  ;;  %v2457_v45 = vpop.eup %2456  ;;  %v1363_v46 = vadd.f32 1.0, %v2455_v38 }
 0x1f7   : > { %v791_v48 = vpop.f32.mrb[19].mxu0  ;;  %v2459_v51 = vpop.eup %2458  ;;  %2478 = vrcp.f32 %v1355_v41  ;;  %v1365_v52 = vadd.f32 1.0, %v2457_v45  ;;  %v3149_v41 = vadd.f32 %v789_v37, %v3050_v34  ;;  %v3152_v45 = vadd.f32 %v718_v42, %v3055_v35 }
 0x1f8   : > { %v2461_v54 = vpop.eup %2460  ;;  %2480 = vrcp.f32 %v1363_v46  ;;  %v1364_v57 = vadd.f32 1.0, %v2459_v51  ;;  %v2266_v37 = vmul.f32 -1.442695, %v3132_v11  ;;  %v2276_v42 = vmul.f32 -1.442695, %v3142_v25 }
 0x1f9   : > { %v2463_v58 = vpop.eup %2462  ;;  %2482 = vrcp.f32 %v1365_v52  ;;  %v1366_v59 = vadd.f32 1.0, %v2461_v54  ;;  %v722_v2 = vpop.f32.mrb[12].mxu1  ;;  %3865 = vst [vmem:[#allocation2_spill] sm:$0xff] %v3149_v41  ;;  %3866 = vst [vmem:[#allocation3_spill] sm:$0xff] %v3152_v45  ;;  %v2265_v52 = vmul.f32 -1.442695, %v3124_v8 }
 0x1fa   : > { %v2465_v60 = vpop.eup %2464  ;;  %2484 = vrcp.f32 %v1364_v57  ;;  %v1374_v61 = vadd.f32 1.0, %v2463_v58  ;;  %v795_v10 = vpop.f32.mrb[20].mxu0  ;;  %v2267_v54 = vmul.f32 -1.442695, %v3129_v16  ;;  %v2268_v58 = vmul.f32 -1.442695, %v3139_v22 }
 0x1fb   : > { %v2467_v5 = vpop.eup %2466  ;;  %2486 = vrcp.f32 %v1366_v59  ;;  %v1376_v6 = vadd.f32 1.0, %v2465_v60  ;;  %v3126_v12 = vpop.f32.mrb[13].mxu1  ;;  %v2278_v60 = vmul.f32 -1.442695, %v3149_v41  ;;  %v3183_v29 = vadd.f32 %v795_v10, %v3050_v34 }
 0x1fc   : > { %v2469_v13 = vpop.eup %2468  ;;  %2488 = vrcp.f32 %v1374_v61  ;;  %v1375_v15 = vadd.f32 1.0, %v2467_v5  ;;  %v3134_v17 = vpop.f32.mrb[21].mxu0  ;;  %v2277_v61 = vmul.f32 -1.442695, %v3152_v45  ;;  %v3165_v5 = vadd.f32 %v791_v48, %v3058_v36 }
 0x1fd   : > { %v3136_v18 = vpop.f32.mrb[14].mxu1  ;;  %v2471_v21 = vpop.eup %2470  ;;  %2490 = vrcp.f32 %v1376_v6  ;;  %v1377_v19 = vadd.f32 1.0, %v2469_v13 }
 0x1fe   : > { %v3144_v26 = vpop.f32.mrb[22].mxu0  ;;  %v3146_v20 = vpop.f32.mrb[15].mxu1  ;;  %2492 = vrcp.f32 %v1375_v15  ;;  %v1385_v23 = vadd.f32 1.0, %v2471_v21 }
 0x1ff   : > { %v2473_v38 = vpop.eup %2472  ;;  %v3154_v46 = vpop.f32.mrb[23].mxu0  ;;  %2494 = vrcp.f32 %v1377_v19  ;;  %v3174_v19 = vadd.f32 %v722_v2, %v3045_v14 }
 0x200   : > { %v2475_v24 = vpop.eup %2474  ;;  %2496 = vrcp.f32 %v1385_v23  ;;  %v1616_v15 = vmul.f32 %v2473_v38, %v3061_v39 }
 0x201   : > { %v2477_v51 = vpop.eup %2476  ;;  %2498 = vpow2.f32 %v2256_v62  ;;  %v3167_v6 = vpop.f32.mrb[16].mxu1  ;;  %v1618_v48 = vmul.f32 %v2475_v24, %v3064_v40 }
 0x202   : > { %v2479_v57 = vpop.eup %2478  ;;  %2500 = vpow2.f32 %v2255_v7  ;;  %v3169_v13 = vpop.f32.mrb[24].mxu0  ;;  %v1617_v2 = vmul.f32 %v2477_v51, %v3067_v43  ;;  %v2279_v43 = vmul.f32 -1.442695, %v3165_v5 }
 0x203   : > { %v2481_v59 = vpop.eup %2480  ;;  %2502 = vpow2.f32 %v2257_v33  ;;  %v3176_v7 = vpop.f32.mrb[17].mxu1  ;;  %v1619_v24 = vmul.f32 %v2479_v57, %v3070_v44 }
 0x204   : > { %v2483_v62 = vpop.eup %2482  ;;  %v1627_v21 = vmul.f32 %v2481_v59, %v3075_v49  ;;  %v3178_v23 = vpop.f32.mrb[25].mxu0  ;;  %2504 = vpow2.f32 %v2265_v52 }
 0x205   : > { %v2485_v32 = vpop.eup %2484  ;;  %v1629_v30 = vmul.f32 %v2483_v62, %v3078_v50  ;;  %v3185_v39 = vpop.f32.mrb[18].mxu1  ;;  %2506 = vpow2.f32 %v2267_v54  ;;  %v2287_v54 = vmul.f32 -1.442695, %v3174_v19 }
 0x206   : > { %v3187_v49 = vpop.f32.mrb[26].mxu0  ;;  %v2487_v38 = vpop.eup %2486  ;;  %v1837_v33 = vadd.f32 %v1627_v21, %v1616_v15  ;;  %v1628_v59 = vmul.f32 %v2485_v32, %v3083_v55  ;;  %2508 = vpow2.f32 %v2266_v37 }
 0x207   : > { %v3191_v27 = vpop.f32.mrb[19].mxu1  ;;  %v3193_v40 = vpop.f32.mrb[27].mxu0  ;;  %v1863_v10 = vadd.f32 %v1629_v30, %v1618_v48  ;;  %v1630_v52 = vmul.f32 %v2487_v38, %v3086_v56  ;;  %2510 = vpow2.f32 %v2268_v58  ;;  %v2289_v56 = vmul.f32 -1.442695, %v3183_v29 }
 0x208   : > { %v2489_v50 = vpop.eup %2488  ;;  %v1850_v45 = vadd.f32 %v1628_v59, %v1617_v2  ;;  %2512 = vpow2.f32 %v2276_v42 }
 0x209   : > { %v2491_v62 = vpop.eup %2490  ;;  %v1638_v41 = vmul.f32 %v2489_v50, %v3093_v63  ;;  %v1876_v55 = vadd.f32 %v1630_v52, %v1619_v24  ;;  %2514 = vpow2.f32 %v2278_v60  ;;  %v3206_v58 = vpop.f32.mrb[20].mxu1  ;;  %v501_v24 = vsub.s32 5, %v3031_v28 }
 0x20a   : > { %v2493_v32 = vpop.eup %2492  ;;  %v1640_v51 = vmul.f32 %v2491_v62, %v3096_v0  ;;  %2516 = vpow2.f32 %v2277_v61  ;;  %v3208_v21 = vpop.f32.mrb[28].mxu0  ;;  %v505_v61 = vsub.s32 6, %v3031_v28 }
 0x20b   : > { %v2495_v15 = vpop.eup %2494  ;;  %v1838_v44 = vadd.f32 %v1837_v33, %v1638_v41  ;;  %v1639_v30 = vmul.f32 %v2493_v32, %v3099_v3  ;;  %2518 = vpow2.f32 %v2279_v43  ;;  %v497_v3 = vsub.s32 4, %v3031_v28  ;;  %v3214_v60 = vpop.f32.mrb[21].mxu1 }
 0x20c   : > { %v2497_v57 = vpop.eup %2496  ;;  %v3203_v37 = vadd.f32 %v1863_v10, %v1640_v51  ;;  %v1641_v63 = vmul.f32 %v2495_v15, %v3102_v4  ;;  %v3216_v48 = vpop.f32.mrb[29].mxu0  ;;  %2520 = vpow2.f32 %v2287_v54  ;;  %v509_v32 = vsub.s32 7, %v3031_v28 }
 0x20d   : > { %v2499_v0 = vpop.eup %2498  ;;  %v3210_v42 = vadd.f32 %v1850_v45, %v1639_v30  ;;  %v1649_v41 = vmul.f32 %v2497_v57, %v3107_v9  ;;  %v3221_v33 = vpop.f32.mrb[22].mxu1  ;;  %2522 = vpow2.f32 %v2289_v56  ;;  %v3235_v54 = vadd.f32 %v3126_v12, %v3055_v35 }
 0x20e   : > { %v2501_v38 = vpop.eup %2500  ;;  %v3218_v2 = vadd.f32 %v1876_v55, %v1641_v63  ;;  %v1387_v4 = vadd.f32 1.0, %v2499_v0  ;;  %v3223_v45 = vpop.f32.mrb[30].mxu0  ;;  %v3238_v30 = vrot.slane %v3038_v31, %v497_v3  ;;  %v3241_v63 = vrot.slane %v3038_v31, %v505_v61 }
 0x20f   : > { %v2503_v59 = vpop.eup %2502  ;;  %v3225_v9 = vadd.f32 %v1838_v44, %v1649_v41  ;;  %v1386_v50 = vadd.f32 1.0, %v2501_v38  ;;  %v3228_v10 = vpop.f32.mrb[23].mxu1  ;;  %v3244_v0 = vrot.slane %v3038_v31, %v501_v24  ;;  %v2823_v12 = vmov 1966171168  }
 0x210   : > { %v3230_v52 = vpop.f32.mrb[31].mxu0  ;;  %v2505_v62 = vpop.eup %2504  ;;  %2524 = vrcp.f32 %v1387_v4  ;;  %v1388_v43 = vadd.f32 1.0, %v2503_v59  ;;  %v3246_v4 = vunpack.c.l.s4 %v2823_v12  ;;  %v3249_v59 = vrot.slane %v3038_v31, %v509_v32 }
 0x211   : > { %v2507_v55 = vpop.eup %2506  ;;  %2526 = vrcp.f32 %v1386_v50  ;;  %v1396_v51 = vadd.f32 1.0, %v2505_v62  ;;  %v3251_v3 = vpop.f32.mrb[24].mxu1  ;;  %v3258_v24 = vadd.f32 %v3134_v17, %v3058_v36  ;;  %v3266_v32 = vadd.f32 %v3136_v18, %v3045_v14 }
 0x212   : > { %v2509_v15 = vpop.eup %2508  ;;  %2528 = vrcp.f32 %v1388_v43  ;;  %v1398_v44 = vadd.f32 1.0, %v2507_v55  ;;  %v3253_v50 = vpop.f32.mrb[32].mxu0  ;;  %v2288_v43 = vmul.f32 -1.442695, %v3235_v54  ;;  %v3278_v12 = vadd.f32 %v3146_v20, %v3055_v35 }
 0x213   : > { %v2511_v56 = vpop.eup %2510  ;;  %2530 = vrcp.f32 %v1396_v51  ;;  %v1397_v57 = vadd.f32 1.0, %v2509_v15  ;;  %v3260_v55 = vpop.f32.mrb[25].mxu1 }
 0x214   : > { %v2513_v41 = vpop.eup %2512  ;;  %2532 = vrcp.f32 %v1398_v44  ;;  %v1399_v38 = vadd.f32 1.0, %v2511_v56  ;;  %v3262_v51 = vpop.f32.mrb[33].mxu0  ;;  %v3270_v44 = vadd.f32 %v3144_v26, %v3050_v34 }
 0x215   : > { %v2515_v62 = vpop.eup %2514  ;;  %2534 = vrcp.f32 %v1397_v57  ;;  %v1407_v61 = vadd.f32 1.0, %v2513_v41  ;;  %3867 = vst [vmem:[#allocation4_spill] sm:$0xff] %v3262_v51  ;;  %v3272_v56 = vpop.f32.mrb[26].mxu1 }
 0x216   : > { %v2517_v15 = vpop.eup %2516  ;;  %2536 = vrcp.f32 %v1399_v38  ;;  %v1409_v31 = vadd.f32 1.0, %v2515_v62  ;;  %3868 = vst [vmem:[#allocation5_spill] sm:$0xff] %v3272_v56  ;;  %v3274_v57 = vpop.f32.mrb[34].mxu0  ;;  %v3282_v38 = vadd.f32 %v3154_v46, %v3058_v36  ;;  %v3290_v62 = vadd.f32 %v3167_v6, %v3238_v30 }
 0x217   : > { %3869 = vst [vmem:[#allocation6_spill] sm:$0xff] %v3274_v57  ;;  %v2519_v17 = vpop.eup %2518  ;;  %2538 = vrcp.f32 %v1407_v61  ;;  %v1408_v41 = vadd.f32 1.0, %v2517_v15  ;;  %v3284_v14 = vpop.f32.mrb[27].mxu1  ;;  %v3294_v61 = vadd.f32 %v3169_v13, %v3241_v63  ;;  %v2290_v36 = vmul.f32 -1.442695, %v3258_v24 }
 0x218   : > { %3870 = vst [vmem:[#allocation7_spill] sm:$0xff] %v3282_v38  ;;  %3871 = vst [vmem:[#allocation8_spill] sm:$0xff] %v3284_v14  ;;  %v3286_v18 = vpop.f32.mrb[35].mxu0  ;;  %v2521_v34 = vpop.eup %2520  ;;  %2540 = vrcp.f32 %v1409_v31  ;;  %v1410_v26 = vadd.f32 1.0, %v2519_v17  ;;  %v3299_v46 = vadd.f32 %v3176_v7, %v3244_v0  ;;  %v2298_v17 = vmul.f32 -1.442695, %v3266_v32 }
 0x219   : > { %3872 = vst [vmem:[#allocation9_spill] sm:$0xff] %v3286_v18  ;;  %3873 = vst [vmem:[#allocation10_spill] sm:$0xff] %v3294_v61  ;;  %v2523_v35 = vpop.eup %2522  ;;  %2542 = vrcp.f32 %v1408_v41  ;;  %v1418_v20 = vadd.f32 1.0, %v2521_v34  ;;  %v2300_v6 = vmul.f32 -1.442695, %v3270_v44  ;;  %v3311_v56 = vpop.f32.mrb[36].mxu0 }
 0x21a   : > { %v2525_v15 = vpop.eup %2524  ;;  %2544 = vrcp.f32 %v1410_v26  ;;  %v1420_v31 = vadd.f32 1.0, %v2523_v35  ;;  %v2299_v41 = vmul.f32 -1.442695, %v3278_v12  ;;  %v2301_v34 = vmul.f32 -1.442695, %v3282_v38  ;;  %v3309_v35 = vpop.f32.mrb[28].mxu1 }
 0x21b   : > { %v2527_v18 = vpop.eup %2526  ;;  %v1651_v13 = vmul.f32 %v2525_v15, %v3113_v47  ;;  %2546 = vrcp.f32 %v1418_v20  ;;  %v2225_v7 = vmul.f32 -1.442695, %v3290_v62  ;;  %v2227_v26 = vmul.f32 -1.442695, %v3294_v61  ;;  %3874 = vst [vmem:[#allocation11_spill] sm:$0xff] %v3311_v56  ;;  %v3316_v38 = vpop.f32.mrb[29].mxu1 }
 0x21c   : > { %v2529_v14 = vpop.eup %2528  ;;  %v1650_v57 = vmul.f32 %v2527_v18, %v3116_v53  ;;  %2548 = vrcp.f32 %v1420_v31  ;;  %v2226_v15 = vmul.f32 -1.442695, %v3299_v46  ;;  %v3318_v53 = vpop.f32.mrb[37].mxu0  ;;  %v3324_v56 = vadd.f32 %v3178_v23, %v3249_v59 }
 0x21d   : > { %v2531_v51 = vpop.eup %2530  ;;  %v1865_v47 = vadd.f32 %v3203_v37, %v1651_v13  ;;  %v1652_v20 = vmul.f32 %v2529_v14, %v3120_v1  ;;  %2550 = vpow2.f32 %v2288_v43  ;;  %v3326_v37 = vpop.f32.mrb[30].mxu1 }
 0x21e   : > { %v2533_v18 = vpop.eup %2532  ;;  %v1852_v31 = vadd.f32 %v3210_v42, %v1650_v57  ;;  %v1660_v61 = vmul.f32 %v2531_v51, %v3124_v8  ;;  %2552 = vpow2.f32 %v2290_v36  ;;  %v3328_v1 = vpop.f32.mrb[38].mxu0  ;;  %v3334_v42 = vadd.f32 %v3185_v39, %v3238_v30 }
 0x21f   : > { %v2535_v43 = vpop.eup %2534  ;;  %v1878_v14 = vadd.f32 %v3218_v2, %v1652_v20  ;;  %v1662_v13 = vmul.f32 %v2533_v18, %v3129_v16  ;;  %2554 = vpow2.f32 %v2298_v17  ;;  %v3336_v8 = vpop.f32.mrb[31].mxu1  ;;  %v3344_v2 = vadd.f32 %v3187_v49, %v3241_v63  ;;  %v3876_v49 = vld [vmem:[#allocation2_spill] sm:$0xff] }
 0x220   : > { %v3338_v51 = vpop.f32.mrb[39].mxu0  ;;  %v2537_v23 = vpop.eup %2536  ;;  %v1840_v57 = vadd.f32 %v3225_v9, %v1660_v61  ;;  %v1661_v36 = vmul.f32 %v2535_v43, %v3132_v11  ;;  %2556 = vpow2.f32 %v2300_v6  ;;  %v3349_v39 = vadd.f32 %v3191_v27, %v3244_v0 }
 0x221   : > { %3875 = vst [vmem:[#allocation12_spill] sm:$0xff] %v3338_v51  ;;  %v2539_v16 = vpop.eup %2538  ;;  %v1866_v17 = vadd.f32 %v1865_v47, %v1662_v13  ;;  %v1663_v20 = vmul.f32 %v2537_v23, %v3139_v22  ;;  %2558 = vpow2.f32 %v2299_v41  ;;  %v2228_v11 = vmul.f32 -1.442695, %v3324_v56  ;;  %v3877_v13 = vld [vmem:[#allocation3_spill] sm:$0xff] }
 0x222   : > { %v2541_v18 = vpop.eup %2540  ;;  %v1853_v51 = vadd.f32 %v1852_v31, %v1661_v36  ;;  %v1671_v9 = vmul.f32 %v2539_v16, %v3142_v25  ;;  %2560 = vpow2.f32 %v2301_v34  ;;  %v2236_v47 = vmul.f32 -1.442695, %v3334_v42  ;;  %v3357_v31 = vpop.f32.mrb[32].mxu1 }
 0x223   : > { %v2543_v61 = vpop.eup %2542  ;;  %v1879_v6 = vadd.f32 %v1878_v14, %v1663_v20  ;;  %v1673_v43 = vmul.f32 %v2541_v18, %v3876_v49  ;;  %2562 = vpow2.f32 %v2225_v7  ;;  %v2238_v27 = vmul.f32 -1.442695, %v3344_v2  ;;  %v3359_v25 = vpop.f32.mrb[40].mxu0 }
 0x224   : > { %v2545_v22 = vpop.eup %2544  ;;  %v1841_v41 = vadd.f32 %v1840_v57, %v1671_v9  ;;  %v1672_v23 = vmul.f32 %v2543_v61, %v3877_v13  ;;  %2564 = vpow2.f32 %v2227_v26  ;;  %v2237_v7 = vmul.f32 -1.442695, %v3349_v39  ;;  %v3363_v16 = vpop.f32.mrb[33].mxu1 }
 0x225   : > { %v2547_v34 = vpop.eup %2546  ;;  %v1867_v36 = vadd.f32 %v1866_v17, %v1673_v43  ;;  %v1674_v14 = vmul.f32 %v2545_v22, %v3165_v5  ;;  %2566 = vpow2.f32 %v2226_v15  ;;  %v3365_v20 = vpop.f32.mrb[41].mxu0 }
 0x226   : > { %v2549_v57 = vpop.eup %2548  ;;  %v3367_v18 = vadd.f32 %v1853_v51, %v1672_v23  ;;  %v1682_v26 = vmul.f32 %v2547_v34, %v3174_v19  ;;  %2568 = vpow2.f32 %v2228_v11  ;;  %v3370_v9 = vpop.f32.mrb[34].mxu1  ;;  %v1997_v11 = vunpack.c.0.s8 %v3246_v4 }
 0x227   : > { %3878 = vst [vmem:[#allocation2_spill] sm:$0xff] %v3370_v9  ;;  %v3372_v61 = vpop.f32.mrb[42].mxu0  ;;  %v2551_v17 = vpop.eup %2550  ;;  %v3374_v49 = vadd.f32 %v1879_v6, %v1674_v14  ;;  %v1684_v5 = vmul.f32 %v2549_v57, %v3183_v29  ;;  %2570 = vpow2.f32 %v2236_v47  ;;  %v3388_v29 = vadd.f32 %v3193_v40, %v3249_v59 }
 0x228   : > { %3879 = vst [vmem:[#allocation3_spill] sm:$0xff] %v3372_v61  ;;  %v3377_v15 = vpop.f32.mrb[35].mxu1  ;;  %v3379_v43 = vpop.f32.mrb[43].mxu0  ;;  %v3381_v22 = vadd.f32 %v1841_v41, %v1682_v26  ;;  %v1419_v19 = vadd.f32 1.0, %v2551_v17  ;;  %2572 = vpow2.f32 %v2238_v27  ;;  %v3392_v41 = vadd.f32 %v3206_v58, %v3238_v30 }
 0x229   : > { %3880 = vst [vmem:[#allocation13_spill] sm:$0xff] %v3377_v15  ;;  %3881 = vst [vmem:[#allocation14_spill] sm:$0xff] %v3379_v43  ;;  %v2553_v51 = vpop.eup %2552  ;;  %v3384_v23 = vadd.f32 %v1867_v36, %v1684_v5  ;;  %2574 = vpow2.f32 %v2237_v7  ;;  %v3396_v7 = vsub.s32 %v1997_v11, %v3031_v28  ;;  %v3398_v57 = vpop.f32.mrb[36].mxu1  ;;  %v2239_v58 = vmul.f32 -1.442695, %v3388_v29 }
 0x22a   : > { %v2555_v13 = vpop.eup %2554  ;;  %v1421_v6 = vadd.f32 1.0, %v2553_v51  ;;  %2576 = vrcp.f32 %v1419_v19  ;;  %3882 = vst [vmem:[#allocation15_spill] sm:$0xff] %v3398_v57  ;;  %v3400_v40 = vpop.f32.mrb[44].mxu0  ;;  %v3405_v5 = vadd.f32 %v3208_v21, %v3241_v63  ;;  %v2247_v11 = vmul.f32 -1.442695, %v3392_v41 }
 0x22b   : > { %v2557_v47 = vpop.eup %2556  ;;  %v1429_v34 = vadd.f32 1.0, %v2555_v13  ;;  %3883 = vst [vmem:[#allocation16_spill] sm:$0xff] %v3400_v40  ;;  %v3407_v51 = vpop.f32.mrb[37].mxu1 }
 0x22c   : > { %v2559_v14 = vpop.eup %2558  ;;  %2578 = vrcp.f32 %v1421_v6  ;;  %v1431_v4 = vadd.f32 1.0, %v2557_v47  ;;  %3884 = vst [vmem:[#allocation17_spill] sm:$0xff] %v3407_v51  ;;  %v3412_v6 = vadd.f32 %v3214_v60, %v3244_v0  ;;  %v3414_v47 = vpop.f32.mrb[45].mxu0 }
 0x22d   : > { %v2561_v27 = vpop.eup %2560  ;;  %2580 = vrcp.f32 %v1429_v34  ;;  %v1430_v36 = vadd.f32 1.0, %v2559_v14  ;;  %3885 = vst [vmem:[#allocation18_spill] sm:$0xff] %v3414_v47  ;;  %v3416_v34 = vpop.f32.mrb[38].mxu1  ;;  %v3434_v47 = vadd.f32 %v3216_v48, %v3249_v59 }
 0x22e   : > { %v2563_v26 = vpop.eup %2562  ;;  %2582 = vrcp.f32 %v1431_v4  ;;  %v1432_v17 = vadd.f32 1.0, %v2561_v27  ;;  %3886 = vst [vmem:[#allocation19_spill] sm:$0xff] %v3416_v34  ;;  %v3887_v4 = vlaneseq  ;;  %v3888_v27 = vmov 0  ;;  %v3428_v60 = vpop.f32.mrb[46].mxu0 }
 0x22f   : > { %v2565_v19 = vpop.eup %2564  ;;  %2584 = vrcp.f32 %v1430_v36  ;;  %v1356_v13 = vadd.f32 1.0, %v2563_v26  ;;  %3891 = vst [vmem:[#allocation21_spill] sm:$0xff] %v3428_v60  ;;  %v3430_v36 = vpop.f32.mrb[39].mxu1 }
 0x230   : > { %v2567_v14 = vpop.eup %2566  ;;  %2586 = vrcp.f32 %v1432_v17  ;;  %v1358_v21 = vadd.f32 1.0, %v2565_v19  ;;  %vm3424_vm1 = vcmp.lt.s32.totalorder %v3887_v4, 384  ;;  %3892 = vst [vmem:[#allocation22_spill] sm:$0xff] %v3430_v36  ;;  %v3438_v17 = vadd.f32 %v3221_v33, %v3238_v30  ;;  %v3443_v4 = vpop.f32.mrb[47].mxu0 }
 0x231   : > { %v3889_v27 = vsel %vm3424_vm1, 4294967295, %v3888_v27  ;;  %v2569_v26 = vpop.eup %2568  ;;  %2588 = vrcp.f32 %v1356_v13  ;;  %v1357_v34 = vadd.f32 1.0, %v2567_v14  ;;  %v2824_v19 = vmov 0.0   ;;  %3893 = vst [vmem:[#allocation23_spill] sm:$0xff] %v3443_v4  ;;  %v3465_v40 = vpop.f32.mrb[40].mxu1 }
 0x232   : > { %3890 = vst [vmem:[#allocation20_spill] sm:$0xff] %v3889_v27  ;;  %261 = vst.msk [vmem:[%s3421_s13 + $0x8] sm:$0x7] %vm3424_vm1, %v2824_v19  ;;  %v2571_v60 = vpop.eup %2570  ;;  %2590 = vrcp.f32 %v1358_v21  ;;  %v1359_v36 = vadd.f32 1.0, %v2569_v26  ;;  %v2249_v13 = vmul.f32 -1.442695, %v3405_v5  ;;  %v3448_v14 = vadd.f32 %v3223_v45, %v3241_v63 }
 0x233   : > { %v2573_v48 = vpop.eup %2572  ;;  %2592 = vrcp.f32 %v1357_v34  ;;  %v1367_v51 = vadd.f32 1.0, %v2571_v60  ;;  %v3452_v33 = vadd.f32 %v3228_v10, %v3244_v0  ;;  %v3456_v19 = vadd.f32 %v3230_v52, %v3249_v59  ;;  %3894 = vst [vmem:[#allocation24_spill] sm:$0xff] %v3465_v40 }
 0x234   : > { %v2575_v27 = vpop.eup %2574  ;;  %2594 = vrcp.f32 %v1359_v36  ;;  %v1369_v21 = vadd.f32 1.0, %v2573_v48  ;;  %v2248_v26 = vmul.f32 -1.442695, %v3412_v6  ;;  %v3461_v45 = vadd.f32 %v3251_v3, %v3238_v30  ;;  %v3473_v3 = vpop.f32.mrb[41].mxu1 }
 0x235   : > { %v2577_v4 = vpop.eup %2576  ;;  %2596 = vrcp.f32 %v1367_v51  ;;  %v1368_v34 = vadd.f32 1.0, %v2575_v27  ;;  %v2250_v60 = vmul.f32 -1.442695, %v3434_v47  ;;  %v2258_v10 = vmul.f32 -1.442695, %v3438_v17  ;;  %3896 = vst [vmem:[#allocation26_spill] sm:$0xff] %v3473_v3 }
 0x236   : > { %v2579_v52 = vpop.eup %2578  ;;  %v1683_v57 = vmul.f32 %v2577_v4, %v3235_v54  ;;  %2598 = vrcp.f32 %v1369_v21  ;;  %v2260_v36 = vmul.f32 -1.442695, %v3448_v14  ;;  %v3471_v48 = vadd.f32 %v3253_v50, %v3241_v63  ;;  %v3478_v15 = vpop.f32.mrb[42].mxu1 }
 0x237   : > { %v2581_v51 = vpop.eup %2580  ;;  %v1685_v27 = vmul.f32 %v2579_v52, %v3258_v24  ;;  %2600 = vrcp.f32 %v1368_v34  ;;  %v2259_v43 = vmul.f32 -1.442695, %v3452_v33  ;;  %v2261_v40 = vmul.f32 -1.442695, %v3456_v19  ;;  %3897 = vst [vmem:[#allocation27_spill] sm:$0xff] %v3478_v15  ;;  %v3483_v61 = vpop.f32.mrb[43].mxu1 }
 0x238   : > { %3895 = vst [vmem:[#allocation25_spill] sm:$0xff] %v3471_v48  ;;  %v2583_v54 = vpop.eup %2582  ;;  %v1855_v4 = vadd.f32 %v3367_v18, %v1683_v57  ;;  %v1693_v21 = vmul.f32 %v2581_v51, %v3266_v32  ;;  %2602 = vpow2.f32 %v2239_v58  ;;  %v2269_v50 = vmul.f32 -1.442695, %v3461_v45  ;;  %3898 = vst [vmem:[#allocation28_spill] sm:$0xff] %v3483_v61 }
 0x239   : > { %v2585_v3 = vpop.eup %2584  ;;  %v1881_v24 = vadd.f32 %v3374_v49, %v1685_v27  ;;  %v1695_v34 = vmul.f32 %v2583_v54, %v3270_v44  ;;  %2604 = vpow2.f32 %v2247_v11  ;;  %v3489_v52 = vadd.f32 %v3260_v55, %v3244_v0  ;;  %v3899_v49 = vld [vmem:[#allocation7_spill] sm:$0xff]  ;;  %v3900_v44 = vld [vmem:[#allocation4_spill] sm:$0xff] }
 0x23a   : > { %v2587_v15 = vpop.eup %2586  ;;  %v1843_v18 = vadd.f32 %v3381_v22, %v1693_v21  ;;  %v1694_v32 = vmul.f32 %v2585_v3, %v3278_v12  ;;  %2606 = vpow2.f32 %v2249_v13  ;;  %v3494_v57 = vmul.f32 -1.442695, %v3471_v48  ;;  %v3901_v12 = vld [vmem:[#allocation5_spill] sm:$0xff] }
 0x23b   : > { %v2589_v58 = vpop.eup %2588  ;;  %v1869_v51 = vadd.f32 %v3384_v23, %v1695_v34  ;;  %v1696_v27 = vmul.f32 %v2587_v15, %v3899_v49  ;;  %2608 = vpow2.f32 %v2248_v26  ;;  %v3500_v11 = vadd.f32 %v3900_v44, %v3249_v59  ;;  %v3507_v15 = vpop.f32.mrb[44].mxu1  ;;  %v3902_v44 = vld [vmem:[#allocation10_spill] sm:$0xff] }
 0x23c   : > { %v2591_v55 = vpop.eup %2590  ;;  %v1844_v54 = vrot.slane %v1843_v18, 4  ;;  %v1856_v61 = vadd.f32 %v1855_v4, %v1694_v32  ;;  %2610 = vpow2.f32 %v2250_v60  ;;  %v3504_v22 = vadd.f32 %v3901_v12, %v3238_v30  ;;  %v3512_v60 = vpop.f32.mrb[45].mxu1 }
 0x23d   : > { %v2593_v13 = vpop.eup %2592  ;;  %v1870_v3 = vrot.slane %v1869_v51, 4  ;;  %v1882_v21 = vadd.f32 %v1881_v24, %v1696_v27  ;;  %v1620_v23 = vmul.f32 %v2589_v58, %v3290_v62  ;;  %2612 = vpow2.f32 %v2258_v10  ;;  %3903 = vst [vmem:[#allocation7_spill] sm:$0xff] %v3512_v60  ;;  %v3515_v24 = vpop.f32.mrb[46].mxu1 }
 0x23e   : > { %v3509_v26 = vpop.eup %2594  ;;  %v1845_v34 = vadd.f32 %v1844_v54, %v1843_v18  ;;  %v1857_v49 = vrot.slane %v1856_v61, 4  ;;  %v1622_v48 = vmul.f32 %v2591_v55, %v3902_v44  ;;  %2614 = vpow2.f32 %v2260_v36  ;;  %3904 = vst [vmem:[#allocation4_spill] sm:$0xff] %v3515_v24  ;;  %v3518_v18 = vpop.f32.mrb[47].mxu1 }
 0x23f   : > { %v2597_v4 = vpop.eup %2596  ;;  %v1871_v32 = vadd.f32 %v1870_v3, %v1869_v51  ;;  %v1883_v12 = vrot.slane %v1882_v21, 4  ;;  %v1621_v9 = vmul.f32 %v2593_v13, %v3299_v46  ;;  %2616 = vpow2.f32 %v2259_v43  ;;  %3905 = vst [vmem:[#allocation5_spill] sm:$0xff] %v3518_v18 }
 0x240   : > { %v2599_v62 = vpop.eup %2598  ;;  %v1846_v10 = vrot.slane %v1845_v34, 2  ;;  %v1858_v58 = vadd.f32 %v1857_v49, %v1856_v61  ;;  %v1631_v27 = vmul.f32 %v2597_v4, %v3334_v42  ;;  %2618 = vpow2.f32 %v2261_v40 }
 0x241   : > { %v2601_v55 = vpop.eup %2600  ;;  %v1872_v36 = vrot.slane %v1871_v32, 2  ;;  %v1884_v54 = vadd.f32 %v1883_v12, %v1882_v21  ;;  %v1633_v44 = vmul.f32 %v2599_v62, %v3344_v2  ;;  %2620 = vpow2.f32 %v2269_v50 }
 0x242   : > { %v2603_v51 = vpop.eup %2602  ;;  %v1847_v3 = vadd.f32 %v1846_v10, %v1845_v34  ;;  %v1859_v46 = vrot.slane %v1858_v58, 2  ;;  %v3521_v43 = vadd.f32 %v1631_v27, %v1620_v23  ;;  %v1632_v13 = vmul.f32 %v2601_v55, %v3349_v39 }
 0x243   : > { %v2605_v24 = vpop.eup %2604  ;;  %v1873_v61 = vadd.f32 %v1872_v36, %v1871_v32  ;;  %v1885_v49 = vrot.slane %v1884_v54, 2  ;;  %v3524_v42 = vadd.f32 %v1633_v44, %v1622_v48  ;;  %v1370_v40 = vadd.f32 1.0, %v2603_v51 }
 0x244   : > { %v2607_v4 = vpop.eup %2606  ;;  %v1848_v18 = vrot.slane %v1847_v3, 1  ;;  %v1860_v60 = vadd.f32 %v1859_v46, %v1858_v58  ;;  %v3526_v21 = vadd.f32 %v1632_v13, %v1621_v9  ;;  %v1378_v2 = vadd.f32 1.0, %v2605_v24  ;;  %v3906_v24 = vld [vmem:[#allocation6_spill] sm:$0xff] }
 0x245   : > { %v2609_v50 = vpop.eup %2608  ;;  %v1874_v12 = vrot.slane %v1873_v61, 1  ;;  %v1886_v34 = vadd.f32 %v1885_v49, %v1884_v54  ;;  %2622 = vrcp.f32 %v1370_v40  ;;  %v1380_v23 = vadd.f32 1.0, %v2607_v4 }
 0x246   : > { %v2611_v62 = vpop.eup %2610  ;;  %v1849_v10 = vadd.f32 %v1848_v18, %v1847_v3  ;;  %v1861_v39 = vrot.slane %v1860_v60, 1  ;;  %2624 = vrcp.f32 %v1378_v2  ;;  %v1379_v32 = vadd.f32 1.0, %v2609_v50  ;;  %v3907_v3 = vld [vmem:[#allocation8_spill] sm:$0xff] }
 0x247   : > { %v2613_v27 = vpop.eup %2612  ;;  %v1875_v48 = vadd.f32 %v1874_v12, %v1873_v61  ;;  %v1887_v55 = vrot.slane %v1886_v34, 1  ;;  %2626 = vrcp.f32 %v1380_v23  ;;  %v1381_v36 = vadd.f32 1.0, %v2611_v62 }
 0x248   : > { %v2615_v44 = vpop.eup %2614  ;;  %v1862_v58 = vadd.f32 %v1861_v39, %v1860_v60  ;;  %2628 = vrcp.f32 %v1379_v32  ;;  %v1389_v9 = vadd.f32 1.0, %v2613_v27  ;;  %v3530_v51 = vadd.f32 %v3906_v24, %v3241_v63  ;;  %v3908_v60 = vld [vmem:[#allocation9_spill] sm:$0xff]  ;;  %v3909_v27 = vld [vmem:[#allocation11_spill] sm:$0xff] }
 0x249   : > { %v2617_v54 = vpop.eup %2616  ;;  %v1888_v46 = vadd.f32 %v1887_v55, %v1886_v34  ;;  %2630 = vrcp.f32 %v1381_v36  ;;  %v1391_v18 = vadd.f32 1.0, %v2615_v44  ;;  %v3534_v13 = vadd.f32 %v3907_v3, %v3244_v0 }
 0x24a   : > { %v2619_v61 = vpop.eup %2618  ;;  %v1991_v49 = vcombine.low %v1849_v10, %v1862_v58  ;;  %2632 = vrcp.f32 %v1389_v9  ;;  %v1390_v40 = vadd.f32 1.0, %v2617_v54  ;;  %v3538_v4 = vadd.f32 %v3908_v60, %v3249_v59 }
 0x24b   : > { %v2621_v2 = vpop.eup %2620  ;;  %v1992_v50 = vcombine.low %v1875_v48, %v1888_v46  ;;  %2634 = vrcp.f32 %v1391_v18  ;;  %v1392_v12 = vadd.f32 1.0, %v2619_v61  ;;  %v3542_v34 = vadd.f32 %v3309_v35, %v3238_v30 }
 0x24c   : > { %v3545_v23 = vrot.slane %v1991_v49, %v3396_v7  ;;  %2636 = vrcp.f32 %v1390_v40  ;;  %v1400_v62 = vadd.f32 1.0, %v2621_v2  ;;  %v2270_v10 = vmul.f32 -1.442695, %v3489_v52 }
 0x24d   : > { %v3549_v39 = vrot.slane %v1992_v50, %v3396_v7  ;;  %2638 = vrcp.f32 %v1392_v12  ;;  %v2272_v32 = vmul.f32 -1.442695, %v3500_v11  ;;  %v3554_v48 = vadd.f32 %v3909_v27, %v3241_v63 }
 0x24e   : > { %2640 = vrcp.f32 %v1400_v62  ;;  %v2280_v35 = vmul.f32 -1.442695, %v3504_v22  ;;  %v2282_v55 = vmul.f32 -1.442695, %v3530_v51  ;;  %v2281_v36 = vmul.f32 -1.442695, %v3534_v13 }
 0x24f   : > { %v2623_v44 = vpop.eup %2622  ;;  %v2023_v58 = vcombine.low %v3545_v23, %v3549_v39  ;;  %2642 = vpow2.f32 %v3494_v57  ;;  %v2283_v9 = vmul.f32 -1.442695, %v3538_v4  ;;  %v2291_v24 = vmul.f32 -1.442695, %v3542_v34 }
 0x250   : > { %v2625_v54 = vpop.eup %2624  ;;  %v1623_v46 = vmul.f32 %v3509_v26, %v3324_v56  ;;  %v1634_v18 = vmul.f32 %v2623_v44, %v3388_v29  ;;  %2644 = vpow2.f32 %v2270_v10  ;;  %v3569_v3 = vadd.f32 %v3316_v38, %v3244_v0 }
 0x251   : > { %v2627_v61 = vpop.eup %2626  ;;  %v1642_v49 = vmul.f32 %v2625_v54, %v3392_v41  ;;  %2646 = vpow2.f32 %v2272_v32  ;;  %v2293_v57 = vmul.f32 -1.442695, %v3554_v48  ;;  %v3575_v40 = vadd.f32 %v3318_v53, %v3249_v59 }
 0x252   : > { %v2629_v60 = vpop.eup %2628  ;;  %v1928_v2 = vadd.f32 %v1634_v18, %v1623_v46  ;;  %v1644_v56 = vmul.f32 %v2627_v61, %v3405_v5  ;;  %2648 = vpow2.f32 %v2280_v35  ;;  %v3580_v29 = vadd.f32 %v3326_v37, %v3238_v30 }
 0x253   : > { %v2631_v38 = vpop.eup %2630  ;;  %v1890_v26 = vadd.f32 %v3521_v43, %v1642_v49  ;;  %v1643_v41 = vmul.f32 %v2629_v60, %v3412_v6  ;;  %2650 = vpow2.f32 %v2282_v55  ;;  %v3586_v50 = vadd.f32 %v3328_v1, %v3241_v63 }
 0x254   : > { %v2633_v53 = vpop.eup %2632  ;;  %v1916_v12 = vadd.f32 %v3524_v42, %v1644_v56  ;;  %v1645_v5 = vmul.f32 %v2631_v38, %v3434_v47  ;;  %2652 = vpow2.f32 %v2281_v36  ;;  %v2292_v62 = vmul.f32 -1.442695, %v3569_v3 }
 0x255   : > { %v2635_v30 = vpop.eup %2634  ;;  %v1903_v37 = vadd.f32 %v3526_v21, %v1643_v41  ;;  %v1653_v43 = vmul.f32 %v2633_v53, %v3438_v17  ;;  %2654 = vpow2.f32 %v2283_v9  ;;  %v2294_v6 = vmul.f32 -1.442695, %v3575_v40 }
 0x256   : > { %v2637_v10 = vpop.eup %2636  ;;  %v1929_v32 = vadd.f32 %v1928_v2, %v1645_v5  ;;  %v1655_v63 = vmul.f32 %v2635_v30, %v3448_v14  ;;  %2656 = vpow2.f32 %v2291_v24  ;;  %v2302_v1 = vmul.f32 -1.442695, %v3580_v29 }
 0x257   : > { %v2639_v42 = vpop.eup %2638  ;;  %v1891_v47 = vadd.f32 %v1890_v26, %v1653_v43  ;;  %v1654_v27 = vmul.f32 %v2637_v10, %v3452_v33  ;;  %2658 = vpow2.f32 %v2293_v57  ;;  %v2304_v35 = vmul.f32 -1.442695, %v3586_v50  ;;  %v3913_v10 = vld [vmem:[#allocation12_spill] sm:$0xff] }
 0x258   : > { %v2641_v21 = vpop.eup %2640  ;;  %v3598_v55 = vadd.f32 %v1916_v12, %v1655_v63  ;;  %v1656_v17 = vmul.f32 %v2639_v42, %v3456_v19  ;;  %2660 = vpow2.f32 %v2292_v62  ;;  %v476_v19 = vld [vmem:[%s3852_s4 + $0x8] sm:$0x7]  ;;  %v3613_v60 = vadd.f32 %v3336_v8, %v3244_v0 }
 0x259   : > { %v2643_v36 = vpop.eup %2642  ;;  %v3601_v44 = vadd.f32 %v1903_v37, %v1654_v27  ;;  %v1664_v14 = vmul.f32 %v2641_v21, %v3461_v45  ;;  %2662 = vpow2.f32 %v2294_v6  ;;  %v3910_v38 = vsub.s32 0, %v3031_v28 }
 0x25a   : > { %v2645_v9 = vpop.eup %2644  ;;  %v3604_v24 = vadd.f32 %v1929_v32, %v1656_v17  ;;  %v1402_v54 = vadd.f32 1.0, %v2643_v36  ;;  %2664 = vpow2.f32 %v2302_v1  ;;  %v3911_v41 = vsub.s32 2, %v3031_v28 }
 0x25b   : > { %v2647_v33 = vpop.eup %2646  ;;  %v3606_v46 = vadd.f32 %v1891_v47, %v1664_v14  ;;  %v1401_v18 = vadd.f32 1.0, %v2645_v9  ;;  %2666 = vpow2.f32 %v2304_v35  ;;  %v3617_v26 = vrot.slane %v476_v19, %v3910_v38 }
 0x25c   : > { %v2649_v61 = vpop.eup %2648  ;;  %2668 = vrcp.f32 %v1402_v54  ;;  %v1403_v49 = vadd.f32 1.0, %v2647_v33  ;;  %v3621_v53 = vrot.slane %v476_v19, %v3911_v41  ;;  %v3912_v62 = vsub.s32 1, %v3031_v28  ;;  %v3916_v33 = vld [vmem:[#allocation13_spill] sm:$0xff] }
 0x25d   : > { %v2651_v57 = vpop.eup %2650  ;;  %2670 = vrcp.f32 %v1401_v18  ;;  %v1411_v45 = vadd.f32 1.0, %v2649_v61  ;;  %v2303_v6 = vmul.f32 -1.442695, %v3613_v60  ;;  %v3630_v32 = vadd.f32 %v3913_v10, %v3249_v59 }
 0x25e   : > { %v2653_v2 = vpop.eup %2652  ;;  %2672 = vrcp.f32 %v1403_v49  ;;  %v1413_v56 = vadd.f32 1.0, %v2651_v57  ;;  %v3625_v30 = vrot.slane %v476_v19, %v3912_v62  ;;  %v3634_v28 = vadd.f32 %v3357_v31, %v3617_v26  ;;  %v3914_v31 = vld [vmem:[#allocation2_spill] sm:$0xff] }
 0x25f   : > { %v2655_v12 = vpop.eup %2654  ;;  %2674 = vrcp.f32 %v1411_v45  ;;  %v1412_v5 = vadd.f32 1.0, %v2653_v2  ;;  %v3638_v42 = vadd.f32 %v3359_v25, %v3621_v53  ;;  %v3646_v59 = vadd.f32 %v3365_v20, %v3621_v53  ;;  %v3915_v25 = vld [vmem:[#allocation3_spill] sm:$0xff]  ;;  %v3917_v45 = vld [vmem:[#allocation25_spill] sm:$0xff] }
 0x260   : > { %v2657_v0 = vpop.eup %2656  ;;  %2676 = vrcp.f32 %v1413_v56  ;;  %v1414_v8 = vadd.f32 1.0, %v2655_v12  ;;  %v3642_v35 = vadd.f32 %v3363_v16, %v3625_v30  ;;  %v3650_v36 = vadd.f32 %v3914_v31, %v3617_v26  ;;  %v3920_v31 = vld [vmem:[#allocation16_spill] sm:$0xff] }
 0x261   : > { %v2659_v37 = vpop.eup %2658  ;;  %2678 = vrcp.f32 %v1412_v5  ;;  %v1422_v43 = vadd.f32 1.0, %v2657_v0  ;;  %v3654_v14 = vadd.f32 %v3915_v25, %v3621_v53  ;;  %v2305_v16 = vmul.f32 -1.442695, %v3630_v32 }
 0x262   : > { %v2661_v63 = vpop.eup %2660  ;;  %2680 = vrcp.f32 %v1414_v8  ;;  %v1424_v1 = vadd.f32 1.0, %v2659_v37  ;;  %v3659_v20 = vadd.f32 %v3916_v33, %v3625_v30  ;;  %v2229_v61 = vmul.f32 -1.442695, %v3634_v28 }
 0x263   : > { %v2663_v47 = vpop.eup %2662  ;;  %2682 = vrcp.f32 %v1422_v43  ;;  %v1423_v27 = vadd.f32 1.0, %v2661_v63  ;;  %v2253_v49 = vmul.f32 -1.442695, %v3638_v42  ;;  %v2230_v56 = vmul.f32 -1.442695, %v3642_v35 }
 0x264   : > { %v2665_v21 = vpop.eup %2664  ;;  %2684 = vrcp.f32 %v1424_v1  ;;  %v1425_v17 = vadd.f32 1.0, %v2663_v47  ;;  %v2231_v38 = vmul.f32 -1.442695, %v3646_v59  ;;  %v2240_v5 = vmul.f32 -1.442695, %v3650_v36 }
 0x265   : > { %v2667_v9 = vpop.eup %2666  ;;  %2686 = vrcp.f32 %v1423_v27  ;;  %v1433_v54 = vadd.f32 1.0, %v2665_v21  ;;  %v2264_v62 = vmul.f32 -1.442695, %v3654_v14  ;;  %v2241_v43 = vmul.f32 -1.442695, %v3659_v20 }
 0x266   : > { %v2669_v18 = vpop.eup %2668  ;;  %2688 = vrcp.f32 %v1425_v17  ;;  %v1435_v19 = vadd.f32 1.0, %v2667_v9  ;;  %v3688_v25 = vadd.f32 %v3920_v31, %v3621_v53 }
 0x267   : > { %v2671_v57 = vpop.eup %2670  ;;  %v1666_v2 = vmul.f32 %v2669_v18, %v3917_v45  ;;  %2690 = vrcp.f32 %v1433_v54 }
 0x268   : > { %v2673_v41 = vpop.eup %2672  ;;  %v1665_v12 = vmul.f32 %v2671_v57, %v3489_v52  ;;  %2692 = vrcp.f32 %v1435_v19  ;;  %v3918_v52 = vld [vmem:[#allocation14_spill] sm:$0xff] }
 0x269   : > { %v2675_v0 = vpop.eup %2674  ;;  %v1918_v8 = vadd.f32 %v3598_v55, %v1666_v2  ;;  %v1667_v37 = vmul.f32 %v2673_v41, %v3500_v11  ;;  %2694 = vpow2.f32 %v2303_v6  ;;  %v3676_v47 = vadd.f32 %v3918_v52, %v3621_v53  ;;  %v3919_v11 = vld [vmem:[#allocation15_spill] sm:$0xff] }
 0x26a   : > { %v2677_v10 = vpop.eup %2676  ;;  %v1905_v63 = vadd.f32 %v3601_v44, %v1665_v12  ;;  %v1675_v1 = vmul.f32 %v2675_v0, %v3504_v22  ;;  %2696 = vpow2.f32 %v2305_v16  ;;  %v3682_v6 = vadd.f32 %v3919_v11, %v3617_v26 }
 0x26b   : > { %v2679_v27 = vpop.eup %2678  ;;  %v1931_v21 = vadd.f32 %v3604_v24, %v1667_v37  ;;  %v1677_v55 = vmul.f32 %v2677_v10, %v3530_v51  ;;  %2698 = vpow2.f32 %v2229_v61  ;;  %v3921_v51 = vld [vmem:[#allocation17_spill] sm:$0xff] }
 0x26c   : > { %v2681_v17 = vpop.eup %2680  ;;  %v1893_v44 = vadd.f32 %v3606_v46, %v1675_v1  ;;  %v1676_v22 = vmul.f32 %v2679_v27, %v3534_v13  ;;  %2700 = vpow2.f32 %v2253_v49  ;;  %v3693_v16 = vadd.f32 %v3921_v51, %v3625_v30 }
 0x26d   : > { %v2683_v9 = vpop.eup %2682  ;;  %v1919_v54 = vadd.f32 %v1918_v8, %v1677_v55  ;;  %v1678_v24 = vmul.f32 %v2681_v17, %v3538_v4  ;;  %2702 = vpow2.f32 %v2230_v56  ;;  %v2242_v13 = vmul.f32 -1.442695, %v3676_v47  ;;  %v3925_v17 = vld [vmem:[#allocation22_spill] sm:$0xff] }
 0x26e   : > { %v2685_v33 = vpop.eup %2684  ;;  %v1906_v18 = vadd.f32 %v1905_v63, %v1676_v22  ;;  %v1686_v46 = vmul.f32 %v2683_v9, %v3542_v34  ;;  %2704 = vpow2.f32 %v2231_v38  ;;  %v2251_v57 = vmul.f32 -1.442695, %v3682_v6 }
 0x26f   : > { %v2687_v19 = vpop.eup %2686  ;;  %v1932_v61 = vadd.f32 %v1931_v21, %v1678_v24  ;;  %v1688_v49 = vmul.f32 %v2685_v33, %v3554_v48  ;;  %2706 = vpow2.f32 %v2240_v5  ;;  %v2297_v56 = vmul.f32 -1.442695, %v3688_v25  ;;  %v3922_v5 = vld [vmem:[#allocation18_spill] sm:$0xff] }
 0x270   : > { %v2689_v4 = vpop.eup %2688  ;;  %v1894_v45 = vadd.f32 %v1893_v44, %v1686_v46  ;;  %v1687_v2 = vmul.f32 %v2687_v19, %v3569_v3  ;;  %2708 = vpow2.f32 %v2264_v62  ;;  %v2252_v38 = vmul.f32 -1.442695, %v3693_v16  ;;  %v3926_v19 = vld [vmem:[#allocation23_spill] sm:$0xff] }
 0x271   : > { %v2691_v41 = vpop.eup %2690  ;;  %v1920_v12 = vadd.f32 %v1919_v54, %v1688_v49  ;;  %v1689_v34 = vmul.f32 %v2689_v4, %v3575_v40  ;;  %2710 = vpow2.f32 %v2241_v43  ;;  %v3708_v37 = vadd.f32 %v3922_v5, %v3621_v53  ;;  %v3923_v40 = vld [vmem:[#allocation19_spill] sm:$0xff] }
 0x272   : > { %v2693_v0 = vpop.eup %2692  ;;  %v3703_v8 = vadd.f32 %v1906_v18, %v1687_v2  ;;  %v1697_v48 = vmul.f32 %v2691_v41, %v3580_v29  ;;  %2712 = vpow2.f32 %v2242_v13  ;;  %v3715_v43 = vadd.f32 %v3923_v40, %v3617_v26  ;;  %v3924_v29 = vld [vmem:[#allocation21_spill] sm:$0xff] }
 0x273   : > { %v2695_v3 = vpop.eup %2694  ;;  %v3710_v62 = vadd.f32 %v1932_v61, %v1689_v34  ;;  %v1699_v10 = vmul.f32 %v2693_v0, %v3586_v50  ;;  %2714 = vpow2.f32 %v2251_v57  ;;  %v3719_v27 = vadd.f32 %v3924_v29, %v3621_v53 }
 0x274   : > { %v2697_v63 = vpop.eup %2696  ;;  %v1895_v1 = vadd.f32 %v1894_v45, %v1697_v48  ;;  %v1434_v52 = vadd.f32 1.0, %v2695_v3  ;;  %2716 = vpow2.f32 %v2297_v56  ;;  %v3723_v50 = vadd.f32 %v3925_v17, %v3625_v30  ;;  %v3927_v45 = vld [vmem:[#allocation24_spill] sm:$0xff] }
 0x275   : > { %v2699_v21 = vpop.eup %2698  ;;  %v1921_v55 = vadd.f32 %v1920_v12, %v1699_v10  ;;  %v1436_v11 = vadd.f32 1.0, %v2697_v63  ;;  %2718 = vpow2.f32 %v2252_v38  ;;  %v3726_v9 = vmul.f32 -1.442695, %v3708_v37 }
 0x276   : > { %v2701_v44 = vpop.eup %2700  ;;  %v1896_v22 = vrot.slane %v1895_v1, 4  ;;  %2720 = vrcp.f32 %v1434_v52  ;;  %v1360_v31 = vadd.f32 1.0, %v2699_v21  ;;  %v3729_v33 = vmul.f32 -1.442695, %v3715_v43  ;;  %v3929_v21 = vld [vmem:[#allocation27_spill] sm:$0xff] }
 0x277   : > { %v2703_v54 = vpop.eup %2702  ;;  %v1922_v24 = vrot.slane %v1921_v55, 4  ;;  %2722 = vrcp.f32 %v1436_v11  ;;  %v1384_v51 = vadd.f32 1.0, %v2701_v44  ;;  %v3733_v61 = vadd.f32 %v3926_v19, %v3621_v53  ;;  %v3928_v53 = vld [vmem:[#allocation26_spill] sm:$0xff] }
 0x278   : > { %v2705_v18 = vpop.eup %2704  ;;  %v1897_v46 = vadd.f32 %v1896_v22, %v1895_v1  ;;  %2724 = vrcp.f32 %v1360_v31  ;;  %v1361_v13 = vadd.f32 1.0, %v2703_v54  ;;  %v3737_v2 = vadd.f32 %v3927_v45, %v3617_v26 }
 0x279   : > { %v2707_v49 = vpop.eup %2706  ;;  %v1923_v57 = vadd.f32 %v1922_v24, %v1921_v55  ;;  %2726 = vrcp.f32 %v1384_v51  ;;  %v1362_v4 = vadd.f32 1.0, %v2705_v18  ;;  %v2308_v34 = vmul.f32 -1.442695, %v3719_v27  ;;  %v3930_v51 = vld [vmem:[#allocation28_spill] sm:$0xff] }
 0x27a   : > { %v2709_v56 = vpop.eup %2708  ;;  %v1898_v41 = vrot.slane %v1897_v46, 2  ;;  %2728 = vrcp.f32 %v1361_v13  ;;  %v1371_v12 = vadd.f32 1.0, %v2707_v49  ;;  %v3742_v5 = vadd.f32 %v3928_v53, %v3625_v30 }
 0x27b   : > { %v2711_v38 = vpop.eup %2710  ;;  %v1924_v0 = vrot.slane %v1923_v57, 2  ;;  %2730 = vrcp.f32 %v1362_v4  ;;  %v1395_v48 = vadd.f32 1.0, %v2709_v56  ;;  %v2263_v40 = vmul.f32 -1.442695, %v3723_v50  ;;  %v3932_v56 = vld [vmem:[#allocation4_spill] sm:$0xff] }
 0x27c   : > { %v2713_v3 = vpop.eup %2712  ;;  %2732 = vrcp.f32 %v1371_v12  ;;  %v1372_v10 = vadd.f32 1.0, %v2711_v38  ;;  %v2286_v63 = vmul.f32 -1.442695, %v3733_v61  ;;  %v2273_v29 = vmul.f32 -1.442695, %v3737_v2  ;;  %v3933_v12 = vld [vmem:[#allocation5_spill] sm:$0xff] }
 0x27d   : > { %v2715_v1 = vpop.eup %2714  ;;  %2734 = vrcp.f32 %v1395_v48  ;;  %v1373_v52 = vadd.f32 1.0, %v2713_v3  ;;  %v3749_v55 = vadd.f32 %v3929_v21, %v3617_v26  ;;  %v1899_v17 = vadd.f32 %v1898_v41, %v1897_v46  ;;  %v3931_v46 = vld [vmem:[#allocation7_spill] sm:$0xff] }
 0x27e   : > { %v2717_v11 = vpop.eup %2716  ;;  %v1925_v44 = vadd.f32 %v1924_v0, %v1923_v57  ;;  %2736 = vrcp.f32 %v1372_v10  ;;  %v1382_v22 = vadd.f32 1.0, %v2715_v1  ;;  %v2274_v24 = vmul.f32 -1.442695, %v3742_v5 }
 0x27f   : > { %v2719_v31 = vpop.eup %2718  ;;  %2738 = vrcp.f32 %v1373_v52  ;;  %v1428_v54 = vadd.f32 1.0, %v2717_v11  ;;  %v3754_v18 = vadd.f32 %v3930_v51, %v3625_v30  ;;  %v3758_v49 = vadd.f32 %v3507_v15, %v3617_v26 }
 0x280   : > { %v2721_v13 = vpop.eup %2720  ;;  %2740 = vrcp.f32 %v1382_v22  ;;  %v1383_v19 = vadd.f32 1.0, %v2719_v31  ;;  %v3762_v57 = vadd.f32 %v3931_v46, %v3625_v30  ;;  %v3767_v41 = vadd.f32 %v3932_v56, %v3617_v26 }
 0x281   : > { %v2723_v4 = vpop.eup %2722  ;;  %v1698_v45 = vmul.f32 %v2721_v13, %v3613_v60  ;;  %2742 = vrcp.f32 %v1428_v54  ;;  %v3771_v38 = vadd.f32 %v3933_v12, %v3625_v30  ;;  %v1900_v48 = vrot.slane %v1899_v17, 1 }
 0x282   : > { %v2725_v0 = vpop.eup %2724  ;;  %v1926_v15 = vrot.slane %v1925_v44, 1  ;;  %v1700_v53 = vmul.f32 %v2723_v4, %v3630_v32  ;;  %2744 = vrcp.f32 %v1383_v19  ;;  %v2284_v60 = vmul.f32 -1.442695, %v3749_v55 }
 0x283   : > { %v2727_v3 = vpop.eup %2726  ;;  %v1908_v10 = vadd.f32 %v3703_v8, %v1698_v45  ;;  %2746 = vpow2.f32 %v3726_v9  ;;  %v2285_v26 = vmul.f32 -1.442695, %v3754_v18  ;;  %v2295_v30 = vmul.f32 -1.442695, %v3758_v49 }
 0x284   : > { %v2729_v1 = vpop.eup %2728  ;;  %v1934_v52 = vadd.f32 %v3710_v62, %v1700_v53  ;;  %2748 = vpow2.f32 %v3729_v33  ;;  %v2296_v21 = vmul.f32 -1.442695, %v3762_v57  ;;  %v2306_v8 = vmul.f32 -1.442695, %v3767_v41 }
 0x285   : > { %v2731_v32 = vpop.eup %2730  ;;  %v1909_v11 = vrot.slane %v1908_v10, 4  ;;  %2750 = vpow2.f32 %v2308_v34  ;;  %v2307_v9 = vmul.f32 -1.442695, %v3771_v38  ;;  %v3784_v31 = vadd.f32 %v1900_v48, %v1899_v17 }
 0x286   : > { %v2733_v22 = vpop.eup %2732  ;;  %v3786_v54 = vadd.f32 %v1926_v15, %v1925_v44  ;;  %v1935_v51 = vrot.slane %v1934_v52, 4  ;;  %2752 = vpow2.f32 %v2263_v40  ;;  %v1624_v13 = vmul.f32 %v2725_v0, %v3634_v28 }
 0x287   : > { %v2735_v62 = vpop.eup %2734  ;;  %v1910_v33 = vadd.f32 %v1909_v11, %v1908_v10  ;;  %v1635_v19 = vmul.f32 %v2733_v22, %v3650_v36  ;;  %2754 = vpow2.f32 %v2286_v63  ;;  %v1648_v4 = vmul.f32 %v2727_v3, %v3638_v42 }
 0x288   : > { %v2737_v46 = vpop.eup %2736  ;;  %v1936_v34 = vadd.f32 %v1935_v51, %v1934_v52  ;;  %v1625_v45 = vmul.f32 %v2729_v1, %v3642_v35  ;;  %2756 = vpow2.f32 %v2273_v29  ;;  %v1626_v28 = vmul.f32 %v2731_v32, %v3646_v59 }
 0x289   : > { %v2739_v17 = vpop.eup %2738  ;;  %v1911_v56 = vrot.slane %v1910_v33, 2  ;;  %v1941_v44 = vadd.f32 %v1635_v19, %v1624_v13  ;;  %v1636_v12 = vmul.f32 %v2737_v46, %v3659_v20  ;;  %2758 = vpow2.f32 %v2274_v24 }
 0x28a   : > { %v2741_v40 = vpop.eup %2740  ;;  %v1937_v48 = vrot.slane %v1936_v34, 2  ;;  %v1637_v36 = vmul.f32 %v2739_v17, %v3676_v47  ;;  %2760 = vpow2.f32 %v2284_v60  ;;  %v1659_v53 = vmul.f32 %v2735_v62, %v3654_v14 }
 0x28b   : > { %v3795_v63 = vpop.eup %2742  ;;  %v1912_v0 = vadd.f32 %v1911_v56, %v1910_v33  ;;  %v1954_v42 = vadd.f32 %v1636_v12, %v1625_v45  ;;  %v1646_v35 = vmul.f32 %v2741_v40, %v3682_v6  ;;  %2762 = vpow2.f32 %v2285_v26 }
 0x28c   : > { %v2745_v29 = vpop.eup %2744  ;;  %v1938_v15 = vadd.f32 %v1937_v48, %v1936_v34  ;;  %v1967_v20 = vadd.f32 %v1637_v36, %v1626_v28  ;;  %2764 = vpow2.f32 %v2295_v30  ;;  %v2031_v28 = vrot.slane %v2023_v58, %v3396_v7 }
 0x28d   : > { %v2747_v24 = vpop.eup %2746  ;;  %v1913_v3 = vrot.slane %v1912_v0, 1  ;;  %v3799_v10 = vadd.f32 %v1941_v44, %v1646_v35  ;;  %v1647_v59 = vmul.f32 %v2745_v29, %v3693_v16  ;;  %2766 = vpow2.f32 %v2296_v21 }
 0x28e   : > { %v2749_v47 = vpop.eup %2748  ;;  %v1939_v60 = vrot.slane %v1938_v15, 1  ;;  %v1968_v1 = vadd.f32 %v1967_v20, %v1648_v4  ;;  %v1406_v52 = vadd.f32 1.0, %v2747_v24  ;;  %2768 = vpow2.f32 %v2306_v8 }
 0x28f   : > { %v2751_v6 = vpop.eup %2750  ;;  %v1914_v26 = vadd.f32 %v1913_v3, %v1912_v0  ;;  %v1955_v32 = vadd.f32 %v1954_v42, %v1647_v59  ;;  %v1393_v11 = vadd.f32 1.0, %v2749_v47  ;;  %2770 = vpow2.f32 %v2307_v9 }
 0x290   : > { %v2753_v14 = vpop.eup %2752  ;;  %v1940_v22 = vadd.f32 %v1939_v60, %v1938_v15  ;;  %2772 = vrcp.f32 %v1406_v52  ;;  %v1969_v30 = vadd.f32 %v1968_v1, %v1659_v53  ;;  %v1439_v51 = vadd.f32 1.0, %v2751_v6 }
 0x291   : > { %v2755_v62 = vpop.eup %2754  ;;  %v1993_v33 = vcombine.low %v3784_v31, %v1914_v26  ;;  %2774 = vrcp.f32 %v1393_v11  ;;  %v1394_v16 = vadd.f32 1.0, %v2753_v14 }
 0x292   : > { %v2757_v21 = vpop.eup %2756  ;;  %v1994_v13 = vcombine.low %v3786_v54, %v1940_v22  ;;  %2776 = vrcp.f32 %v1439_v51  ;;  %v1417_v8 = vadd.f32 1.0, %v2755_v62 }
 0x293   : > { %v2759_v19 = vpop.eup %2758  ;;  %v2015_v46 = vrot.slane %v1993_v33, %v3396_v7  ;;  %2778 = vrcp.f32 %v1394_v16  ;;  %v1404_v9 = vadd.f32 1.0, %v2757_v21 }
 0x294   : > { %v2761_v34 = vpop.eup %2760  ;;  %v2022_v4 = vrot.slane %v1994_v13, %v3396_v7  ;;  %2780 = vrcp.f32 %v1417_v8  ;;  %v1405_v45 = vadd.f32 1.0, %v2759_v19 }
 0x295   : > { %v2763_v17 = vpop.eup %2762  ;;  %2782 = vrcp.f32 %v1404_v9  ;;  %v1415_v31 = vadd.f32 1.0, %v2761_v34 }
 0x296   : > { %v2765_v56 = vpop.eup %2764  ;;  %v2024_v44 = vcombine.low %v2015_v46, %v2022_v4  ;;  %2784 = vrcp.f32 %v1405_v45  ;;  %v1416_v12 = vadd.f32 1.0, %v2763_v17 }
 0x297   : > { %v2767_v54 = vpop.eup %2766  ;;  %2786 = vrcp.f32 %v1415_v31  ;;  %v1426_v40 = vadd.f32 1.0, %v2765_v56 }
 0x298   : > { %v2769_v48 = vpop.eup %2768  ;;  %v2038_v36 = vrot.slane %v2024_v44, %v3396_v7  ;;  %2788 = vrcp.f32 %v1416_v12  ;;  %v1427_v0 = vadd.f32 1.0, %v2767_v54 }
 0x299   : > { %v2771_v42 = vpop.eup %2770  ;;  %2790 = vrcp.f32 %v1426_v40  ;;  %v1437_v35 = vadd.f32 1.0, %v2769_v48 }
 0x29a   : > { %v2773_v29 = vpop.eup %2772  ;;  %v2039_v15 = vcombine.low %v2031_v28, %v2038_v36  ;;  %2792 = vrcp.f32 %v1427_v0  ;;  %v1438_v53 = vadd.f32 1.0, %v2771_v42 }
 0x29b   : > { %v2775_v20 = vpop.eup %2774  ;;  %v1670_v24 = vmul.f32 %v2773_v29, %v3708_v37  ;;  %2794 = vrcp.f32 %v1437_v35 }
 0x29c   : > { %v2777_v3 = vpop.eup %2776  ;;  %v1657_v23 = vmul.f32 %v2775_v20, %v3715_v43  ;;  %2796 = vrcp.f32 %v1438_v53  ;;  %v2078_v47 = vmul.f32 0.015625, %v2039_v15  ;;  %v1692_v43 = vmul.f32 %v3795_v63, %v3688_v25  ;;  %v1836_v20 = vld [vmem:[%s3421_s13 + $0x8] sm:$0x7] }
 0x29d   : > { %v2779_v39 = vpop.eup %2778  ;;  %v1970_v58 = vadd.f32 %v1969_v30, %v1670_v24  ;;  %v1703_v33 = vmul.f32 %v2777_v3, %v3719_v27 }
 0x29e   : > { %v2781_v59 = vpop.eup %2780  ;;  %v1943_v60 = vadd.f32 %v3799_v10, %v1657_v23  ;;  %v1658_v1 = vmul.f32 %v2779_v39, %v3723_v50  ;;  %2080 = vst [vmem:[%s3421_s13] sm:$0xff] %v2078_v47 }
 0x29f   : > { %v2783_v52 = vpop.eup %2782  ;;  %v1681_v6 = vmul.f32 %v2781_v59, %v3733_v61 }
 0x2a0   : > { %v2785_v26 = vpop.eup %2784  ;;  %v1956_v11 = vadd.f32 %v1955_v32, %v1658_v1  ;;  %v1668_v37 = vmul.f32 %v2783_v52, %v3737_v2 }
 0x2a1   : > { %v2787_v14 = vpop.eup %2786  ;;  %v1971_v22 = vadd.f32 %v1970_v58, %v1681_v6  ;;  %v1669_v30 = vmul.f32 %v2785_v26, %v3742_v5 }
 0x2a2   : > { %v2789_v51 = vpop.eup %2788  ;;  %v1944_v62 = vadd.f32 %v1943_v60, %v1668_v37  ;;  %v1679_v10 = vmul.f32 %v2787_v14, %v3749_v55 }
 0x2a3   : > { %v2791_v50 = vpop.eup %2790  ;;  %v1972_v61 = vadd.f32 %v1971_v22, %v1692_v43  ;;  %v1957_v16 = vadd.f32 %v1956_v11, %v1669_v30  ;;  %v1680_v32 = vmul.f32 %v2789_v51, %v3754_v18 }
 0x2a4   : > { %v2793_v21 = vpop.eup %2792  ;;  %v1945_v2 = vadd.f32 %v1944_v62, %v1679_v10  ;;  %v1690_v13 = vmul.f32 %v2791_v50, %v3758_v49 }
 0x2a5   : > { %v2795_v8 = vpop.eup %2794  ;;  %v1973_v25 = vadd.f32 %v1972_v61, %v1703_v33  ;;  %v1958_v63 = vadd.f32 %v1957_v16, %v1680_v32  ;;  %v1691_v5 = vmul.f32 %v2793_v21, %v3762_v57 }
 0x2a6   : > { %v2797_v19 = vpop.eup %2796  ;;  %v1946_v46 = vadd.f32 %v1945_v2, %v1690_v13  ;;  %v1701_v55 = vmul.f32 %v2795_v8, %v3767_v41 }
 0x2a7   : > { %v1974_v9 = vrot.slane %v1973_v25, 4  ;;  %v1959_v34 = vadd.f32 %v1958_v63, %v1691_v5  ;;  %v1702_v27 = vmul.f32 %v2797_v19, %v3771_v38 }
 0x2a8   : > { %v1947_v4 = vadd.f32 %v1946_v46, %v1701_v55 }
 0x2a9   : > { %v1975_v45 = vadd.f32 %v1974_v9, %v1973_v25  ;;  %v1960_v18 = vadd.f32 %v1959_v34, %v1702_v27 }
 0x2aa   : > { %v1948_v17 = vrot.slane %v1947_v4, 4 }
 0x2ab   : > { %v1976_v31 = vrot.slane %v1975_v45, 2  ;;  %v1961_v56 = vrot.slane %v1960_v18, 4 }
 0x2ac   : > { %v1949_v49 = vadd.f32 %v1948_v17, %v1947_v4 }
 0x2ad   : > { %v1977_v44 = vadd.f32 %v1976_v31, %v1975_v45  ;;  %v1962_v12 = vadd.f32 %v1961_v56, %v1960_v18 }
 0x2ae   : > { %v1950_v54 = vrot.slane %v1949_v49, 2 }
 0x2af   : > { %v1963_v57 = vrot.slane %v1962_v12, 2  ;;  %v1978_v41 = vrot.slane %v1977_v44, 1 }
 0x2b0   : > { %v1951_v40 = vadd.f32 %v1950_v54, %v1949_v49 }
 0x2b1   : > { %v1964_v48 = vadd.f32 %v1963_v57, %v1962_v12  ;;  %v1979_v0 = vadd.f32 %v1978_v41, %v1977_v44 }
 0x2b2   : > { %v1952_v28 = vrot.slane %v1951_v40, 1 }
 0x2b3   : > { %v1965_v38 = vrot.slane %v1964_v48, 1  ;;  %v2054_v29 = vrot.slane %v1979_v0, %v3396_v7 }
 0x2b4   : > { %v1953_v36 = vadd.f32 %v1952_v28, %v1951_v40 }
 0x2b5   : > { %v1966_v42 = vadd.f32 %v1965_v38, %v1964_v48 }
 0x2b7   : > { %v2040_v35 = vcombine.low %v1953_v36, %v1966_v42 }
 0x2b9   : > { %v2047_v15 = vrot.slane %v2040_v35, %v3396_v7 }
 0x2bb   : > { %v2055_v53 = vcombine.low %v2047_v15, %v2054_v29 }
 0x2bd   : > { %v2062_v24 = vrot.slane %v2055_v53, %v3396_v7 }
 0x2bf   : > { %v2066_v3 = vadd.f32 %v2062_v24, %v1836_v20 }
 0x2c1   : > { %2072 = vst.msk [vmem:[%s3421_s13 + $0x8] sm:$0x7] %vm3424_vm1, %v2066_v3 }
 0x2c8   : > { %v2077_v39 = vld [vmem:[%s3421_s13 + $0x8] sm:$0x7] }
 0x2c9   : > { %v2079_v58 = vmul.f32 0.015625, %v2077_v39 }
 0x2cb   : > { %2081 = vst.msk [vmem:[%s3421_s13 + $0x8] sm:$0x7] %vm3424_vm1, %v2079_v58 }
 0x2cc PF: > { %s15_s20 = sadd.s32 1, %s2820_s20   ;;  %s3935_s18 = smov %s2816_s19 }
 0x2cd   : > { %p12_p5 = scmp.ge.s32.totalorder %s15_s20, 4   ;;  %s3936_s19 = smov %s3938_s21 }
 0x2cf   :  { %14 = sbr.rel (!%p12_p5) target bundleno = 2 (0x2), region = 78 }

// kernel: efficient_resnet_forward.5
= control target key start
LH: loop header
LB: loop body
LE: loop exit
PB: predicated region body
PF: predicated region fallthrough
CT: control target
= control target key end

     0   :  { %v2611_v47 = vmov 1983009808   ;;  %v217_v49 = vlaneseq  ;;  %vm2613_vm0 = vmmov 0   ;;  %s4070_s0 = inlined_call_operand.vmem [shape: f32[2,1408], index: 0, kind: input, shape index: {}]   ;;  %s4071_s1 = inlined_call_operand.vmem [shape: f32[2,2048], index: 1, kind: input, shape index: {}]   ;;  %s4072_s2 = inlined_call_operand.vmem [shape: f32[1408,128], index: 2, kind: input, shape index: {}]   ;;  %s4073_s3 = inlined_call_operand.vmem [shape: f32[1,128], index: 3, kind: input, shape index: {}]   ;;  %s4074_s4 = inlined_call_operand.vmem [shape: f32[2048,128], index: 4, kind: input, shape index: {}]   ;;  %s4075_s5 = inlined_call_operand.vmem [shape: f32[1,128], index: 5, kind: input, shape index: {}]   ;;  %s4076_s6 = inlined_call_operand.hbm [shape: f32[2,128], index: 6, kind: output, shape index: {}]  }
   0x1   :  { %v43_v0 = vld [vmem:[%s4072_s2 + $0x80] sm:$0xff]  ;;  %v44_v1 = vld [vmem:[%s4072_s2 + $0x88] sm:$0xff]  ;;  %v45_v11 = vld [vmem:[%s4072_s2 + $0x90] sm:$0xff]  ;;  %v215_v48 = vunpack.c.l.s4 %v2611_v47 }
   0x2   :  { %v75_v2 = vld [vmem:[%s4072_s2 + $0x180] sm:$0xff]  ;;  %v2135_v3 = vpack.c.bf16 %v44_v1, %v43_v0  ;;  %v76_v4 = vld [vmem:[%s4072_s2 + $0x188] sm:$0xff]  ;;  %v46_v13 = vld [vmem:[%s4072_s2 + $0x98] sm:$0xff]  ;;  %v218_v0 = vshrl.u32 %v217_v49, 7 }
   0x3   :  { %v27_v5 = vld [vmem:[%s4072_s2] sm:$0xff]  ;;  %v28_v6 = vld [vmem:[%s4072_s2 + $0x8] sm:$0xff]  ;;  %v2167_v7 = vpack.c.bf16 %v76_v4, %v75_v2  ;;  %v77_v14 = vld [vmem:[%s4072_s2 + $0x190] sm:$0xff]  ;;  %v2139_v16 = vpack.c.bf16 %v46_v13, %v45_v11  ;;  %v216_v63 = vunpack.c.0.s8 %v215_v48 }
   0x4   :  { %v2137_v8 = vpack.c.bf16 %v28_v6, %v27_v5  ;;  %v59_v9 = vld [vmem:[%s4072_s2 + $0x100] sm:$0xff]  ;;  %v60_v10 = vld [vmem:[%s4072_s2 + $0x108] sm:$0xff]  ;;  %2136 = vmatprep.subr.bf16.mxu0 %v2135_v3  ;;  %v78_v15 = vld [vmem:[%s4072_s2 + $0x198] sm:$0xff] }
   0x5   :  { %v2169_v12 = vpack.c.bf16 %v60_v10, %v59_v9  ;;  %2168 = vmatprep.subr.bf16.mxu1 %v2167_v7  ;;  %v2171_v17 = vpack.c.bf16 %v78_v15, %v77_v14  ;;  %v29_v18 = vld [vmem:[%s4072_s2 + $0x10] sm:$0xff]  ;;  %v30_v19 = vld [vmem:[%s4072_s2 + $0x18] sm:$0xff]  ;;  %v47_v23 = vld [vmem:[%s4072_s2 + $0xa0] sm:$0xff]  ;;  %v2801_v13 = vsub.s32 %v216_v63, %v218_v0 }
   0x6   :  { %2138 = vmatpush3.bf16.msra.mxu0 %v2137_v8  ;;  %v61_v20 = vld [vmem:[%s4072_s2 + $0x110] sm:$0xff]  ;;  %v2141_v21 = vpack.c.bf16 %v30_v19, %v29_v18  ;;  %v62_v22 = vld [vmem:[%s4072_s2 + $0x118] sm:$0xff]  ;;  %v48_v24 = vld [vmem:[%s4072_s2 + $0xa8] sm:$0xff] }
   0x7   :  { %2170 = vmatpush3.bf16.msra.mxu1 %v2169_v12  ;;  %2140 = vmatprep.subr.bf16.mxu0 %v2139_v16  ;;  %v2173_v25 = vpack.c.bf16 %v62_v22, %v61_v20  ;;  %v2143_v26 = vpack.c.bf16 %v48_v24, %v47_v23  ;;  %v79_v27 = vld [vmem:[%s4072_s2 + $0x1a0] sm:$0xff]  ;;  %v80_v28 = vld [vmem:[%s4072_s2 + $0x1a8] sm:$0xff]  ;;  %v49_v35 = vld [vmem:[%s4072_s2 + $0xb0] sm:$0xff] }
   0x8   :  { %2172 = vmatprep.subr.bf16.mxu1 %v2171_v17  ;;  %v31_v29 = vld [vmem:[%s4072_s2 + $0x20] sm:$0xff]  ;;  %v2175_v30 = vpack.c.bf16 %v80_v28, %v79_v27  ;;  %v32_v31 = vld [vmem:[%s4072_s2 + $0x28] sm:$0xff]  ;;  %v50_v36 = vld [vmem:[%s4072_s2 + $0xb8] sm:$0xff] }
   0x9   :  { %v63_v32 = vld [vmem:[%s4072_s2 + $0x120] sm:$0xff]  ;;  %v64_v33 = vld [vmem:[%s4072_s2 + $0x128] sm:$0xff]  ;;  %v2145_v34 = vpack.c.bf16 %v32_v31, %v31_v29  ;;  %v81_v37 = vld [vmem:[%s4072_s2 + $0x1b0] sm:$0xff]  ;;  %v2147_v39 = vpack.c.bf16 %v50_v36, %v49_v35 }
   0xa   :  { %2142 = vmatpush3.bf16.msra.mxu0 %v2141_v21  ;;  %v2177_v38 = vpack.c.bf16 %v64_v33, %v63_v32  ;;  %v82_v40 = vld [vmem:[%s4072_s2 + $0x1b8] sm:$0xff]  ;;  %v33_v41 = vld [vmem:[%s4072_s2 + $0x30] sm:$0xff]  ;;  %v51_v46 = vld [vmem:[%s4072_s2 + $0xc0] sm:$0xff] }
   0xb   :  { %2174 = vmatpush3.bf16.msra.mxu1 %v2173_v25  ;;  %2144 = vmatprep.subr.bf16.mxu0 %v2143_v26  ;;  %v34_v42 = vld [vmem:[%s4072_s2 + $0x38] sm:$0xff]  ;;  %v2179_v43 = vpack.c.bf16 %v82_v40, %v81_v37  ;;  %v65_v44 = vld [vmem:[%s4072_s2 + $0x130] sm:$0xff]  ;;  %v52_v50 = vld [vmem:[%s4072_s2 + $0xc8] sm:$0xff] }
   0xc   :  { %2176 = vmatprep.subr.bf16.mxu1 %v2175_v30  ;;  %v66_v45 = vld [vmem:[%s4072_s2 + $0x138] sm:$0xff]  ;;  %v83_v51 = vld [vmem:[%s4072_s2 + $0x1c0] sm:$0xff]  ;;  %v84_v52 = vld [vmem:[%s4072_s2 + $0x1c8] sm:$0xff]  ;;  %v2149_v53 = vpack.c.bf16 %v34_v42, %v33_v41  ;;  %v2151_v55 = vpack.c.bf16 %v52_v50, %v51_v46 }
   0xd   :  { %v2181_v54 = vpack.c.bf16 %v66_v45, %v65_v44  ;;  %v35_v56 = vld [vmem:[%s4072_s2 + $0x40] sm:$0xff]  ;;  %v36_v57 = vld [vmem:[%s4072_s2 + $0x48] sm:$0xff]  ;;  %v2183_v59 = vpack.c.bf16 %v84_v52, %v83_v51  ;;  %v53_v61 = vld [vmem:[%s4072_s2 + $0xd0] sm:$0xff] }
   0xe   :  { %2146 = vmatpush3.bf16.msra.mxu0 %v2145_v34  ;;  %v67_v58 = vld [vmem:[%s4072_s2 + $0x140] sm:$0xff]  ;;  %v68_v60 = vld [vmem:[%s4072_s2 + $0x148] sm:$0xff]  ;;  %v54_v62 = vld [vmem:[%s4072_s2 + $0xd8] sm:$0xff]  ;;  %v2153_v3 = vpack.c.bf16 %v36_v57, %v35_v56 }
   0xf   :  { %2178 = vmatpush3.bf16.msra.mxu1 %v2177_v38  ;;  %2148 = vmatprep.subr.bf16.mxu0 %v2147_v39  ;;  %v85_v1 = vld [vmem:[%s4072_s2 + $0x1d0] sm:$0xff]  ;;  %v86_v2 = vld [vmem:[%s4072_s2 + $0x1d8] sm:$0xff]  ;;  %v2185_v4 = vpack.c.bf16 %v68_v60, %v67_v58  ;;  %v2155_v5 = vpack.c.bf16 %v54_v62, %v53_v61  ;;  %v55_v11 = vld [vmem:[%s4072_s2 + $0xe0] sm:$0xff] }
  0x10   :  { %2180 = vmatprep.subr.bf16.mxu1 %v2179_v43  ;;  %v37_v6 = vld [vmem:[%s4072_s2 + $0x50] sm:$0xff]  ;;  %v38_v7 = vld [vmem:[%s4072_s2 + $0x58] sm:$0xff]  ;;  %v2187_v9 = vpack.c.bf16 %v86_v2, %v85_v1  ;;  %v56_v12 = vld [vmem:[%s4072_s2 + $0xe8] sm:$0xff] }
  0x11   :  { %v69_v8 = vld [vmem:[%s4072_s2 + $0x150] sm:$0xff]  ;;  %v70_v10 = vld [vmem:[%s4072_s2 + $0x158] sm:$0xff]  ;;  %v87_v14 = vld [vmem:[%s4072_s2 + $0x1e0] sm:$0xff]  ;;  %v2157_v16 = vpack.c.bf16 %v38_v7, %v37_v6  ;;  %v2159_v19 = vpack.c.bf16 %v56_v12, %v55_v11 }
  0x12   :  { %2150 = vmatpush3.bf16.msra.mxu0 %v2149_v53  ;;  %v88_v15 = vld [vmem:[%s4072_s2 + $0x1e8] sm:$0xff]  ;;  %v39_v17 = vld [vmem:[%s4072_s2 + $0x60] sm:$0xff]  ;;  %v2189_v18 = vpack.c.bf16 %v70_v10, %v69_v8  ;;  %v57_v25 = vld [vmem:[%s4072_s2 + $0xf0] sm:$0xff] }
  0x13   :  { %2182 = vmatpush3.bf16.msra.mxu1 %v2181_v54  ;;  %2152 = vmatprep.subr.bf16.mxu0 %v2151_v55  ;;  %v40_v20 = vld [vmem:[%s4072_s2 + $0x68] sm:$0xff]  ;;  %v71_v21 = vld [vmem:[%s4072_s2 + $0x160] sm:$0xff]  ;;  %v2191_v23 = vpack.c.bf16 %v88_v15, %v87_v14  ;;  %v58_v26 = vld [vmem:[%s4072_s2 + $0xf8] sm:$0xff] }
  0x14   :  { %2184 = vmatprep.subr.bf16.mxu1 %v2183_v59  ;;  %v24_v22 = vld [vmem:[%s4070_s0] sm:$0xff]  ;;  %v72_v24 = vld [vmem:[%s4072_s2 + $0x168] sm:$0xff]  ;;  %v89_v29 = vld [vmem:[%s4072_s2 + $0x1f0] sm:$0xff]  ;;  %v2161_v31 = vpack.c.bf16 %v40_v20, %v39_v17  ;;  %v2163_v35 = vpack.c.bf16 %v58_v26, %v57_v25 }
  0x15   :  { %v220_v27 = vrot.slane %v24_v22, %v2801_v13  ;;  %v213_v28 = vcombine.high %v24_v22, %v24_v22  ;;  %v90_v30 = vld [vmem:[%s4072_s2 + $0x1f8] sm:$0xff]  ;;  %v2193_v34 = vpack.c.bf16 %v72_v24, %v71_v21  ;;  %v41_v36 = vld [vmem:[%s4072_s2 + $0x70] sm:$0xff]  ;;  %v107_v42 = vld [vmem:[%s4072_s2 + $0x280] sm:$0xff] }
  0x16   :  { %2154 = vmatpush3.bf16.msra.mxu0 %v2153_v3  ;;  %v42_v37 = vld [vmem:[%s4072_s2 + $0x78] sm:$0xff]  ;;  %v73_v38 = vld [vmem:[%s4072_s2 + $0x170] sm:$0xff]  ;;  %v2195_v39 = vpack.c.bf16 %v90_v30, %v89_v29  ;;  %v108_v43 = vld [vmem:[%s4072_s2 + $0x288] sm:$0xff] }
  0x17   :  { %2186 = vmatpush3.bf16.msra.mxu1 %v2185_v4  ;;  %2156 = vmatprep.subr.bf16.mxu0 %v2155_v5  ;;  %v228_v32 = vcombine.high %v220_v27, %v220_v27  ;;  %v227_v33 = vrot.slane %v213_v28, %v2801_v13  ;;  %v74_v40 = vld [vmem:[%s4072_s2 + $0x178] sm:$0xff]  ;;  %v139_v44 = vld [vmem:[%s4072_s2 + $0x380] sm:$0xff]  ;;  %v140_v45 = vld [vmem:[%s4072_s2 + $0x388] sm:$0xff]  ;;  %v2165_v46 = vpack.c.bf16 %v42_v37, %v41_v36 }
  0x18   :  { %2188 = vmatprep.subr.bf16.mxu1 %v2187_v9  ;;  %v2197_v47 = vpack.c.bf16 %v74_v40, %v73_v38  ;;  %v2199_v48 = vpack.c.bf16 %v108_v43, %v107_v42  ;;  %v91_v49 = vld [vmem:[%s4072_s2 + $0x200] sm:$0xff]  ;;  %v92_v50 = vld [vmem:[%s4072_s2 + $0x208] sm:$0xff]  ;;  %v2231_v52 = vpack.c.bf16 %v140_v45, %v139_v44  ;;  %v109_v54 = vld [vmem:[%s4072_s2 + $0x290] sm:$0xff] }
  0x19   :  { %338 = vmatprep.mubr.f32.mxu0 %v228_v32  ;;  %v229_v41 = vcombine.high %v227_v33, %v227_v33  ;;  %v123_v51 = vld [vmem:[%s4072_s2 + $0x300] sm:$0xff]  ;;  %v124_v53 = vld [vmem:[%s4072_s2 + $0x308] sm:$0xff]  ;;  %v110_v55 = vld [vmem:[%s4072_s2 + $0x298] sm:$0xff]  ;;  %v2201_v58 = vpack.c.bf16 %v92_v50, %v91_v49 }
  0x1a   :  { %2158 = vmatpush3.bf16.msra.mxu0 %v2157_v16  ;;  %v141_v56 = vld [vmem:[%s4072_s2 + $0x390] sm:$0xff]  ;;  %v142_v57 = vld [vmem:[%s4072_s2 + $0x398] sm:$0xff]  ;;  %v2233_v59 = vpack.c.bf16 %v124_v53, %v123_v51  ;;  %v2203_v60 = vpack.c.bf16 %v110_v55, %v109_v54  ;;  %v111_v2 = vld [vmem:[%s4072_s2 + $0x2a0] sm:$0xff] }
  0x1b   :  { %2190 = vmatpush3.bf16.msra.mxu1 %v2189_v18  ;;  %2160 = vmatprep.subr.bf16.mxu0 %v2159_v19  ;;  %v93_v61 = vld [vmem:[%s4072_s2 + $0x210] sm:$0xff]  ;;  %v94_v62 = vld [vmem:[%s4072_s2 + $0x218] sm:$0xff]  ;;  %v2235_v0 = vpack.c.bf16 %v142_v57, %v141_v56  ;;  %v112_v3 = vld [vmem:[%s4072_s2 + $0x2a8] sm:$0xff] }
  0x1c   :  { %2192 = vmatprep.subr.bf16.mxu1 %v2191_v23  ;;  %408 = vmatprep.mubr.f32.mxu1 %v229_v41  ;;  %v125_v63 = vld [vmem:[%s4072_s2 + $0x310] sm:$0xff]  ;;  %v126_v1 = vld [vmem:[%s4072_s2 + $0x318] sm:$0xff]  ;;  %v143_v4 = vld [vmem:[%s4072_s2 + $0x3a0] sm:$0xff]  ;;  %v2205_v6 = vpack.c.bf16 %v94_v62, %v93_v61  ;;  %v2207_v8 = vpack.c.bf16 %v112_v3, %v111_v2 }
  0x1d   :  { %v144_v5 = vld [vmem:[%s4072_s2 + $0x3a8] sm:$0xff]  ;;  %v2237_v7 = vpack.c.bf16 %v126_v1, %v125_v63  ;;  %v95_v9 = vld [vmem:[%s4072_s2 + $0x220] sm:$0xff]  ;;  %v113_v15 = vld [vmem:[%s4072_s2 + $0x2b0] sm:$0xff] }
  0x1e   :  { %2162 = vmatpush3.bf16.msra.mxu0 %v2161_v31  ;;  %v96_v10 = vld [vmem:[%s4072_s2 + $0x228] sm:$0xff]  ;;  %v127_v11 = vld [vmem:[%s4072_s2 + $0x320] sm:$0xff]  ;;  %v2239_v12 = vpack.c.bf16 %v144_v5, %v143_v4  ;;  %v114_v16 = vld [vmem:[%s4072_s2 + $0x2b8] sm:$0xff] }
  0x1f   :  { %2194 = vmatpush3.bf16.msra.mxu1 %v2193_v34  ;;  %2164 = vmatprep.subr.bf16.mxu0 %v2163_v35  ;;  %v128_v14 = vld [vmem:[%s4072_s2 + $0x328] sm:$0xff]  ;;  %v145_v17 = vld [vmem:[%s4072_s2 + $0x3b0] sm:$0xff]  ;;  %v146_v18 = vld [vmem:[%s4072_s2 + $0x3b8] sm:$0xff]  ;;  %v2209_v19 = vpack.c.bf16 %v96_v10, %v95_v9  ;;  %v2211_v21 = vpack.c.bf16 %v114_v16, %v113_v15 }
  0x20   :  { %2196 = vmatprep.subr.bf16.mxu1 %v2195_v39  ;;  %v2241_v20 = vpack.c.bf16 %v128_v14, %v127_v11  ;;  %v97_v22 = vld [vmem:[%s4072_s2 + $0x230] sm:$0xff]  ;;  %v98_v23 = vld [vmem:[%s4072_s2 + $0x238] sm:$0xff]  ;;  %v2243_v25 = vpack.c.bf16 %v146_v18, %v145_v17  ;;  %v116_v28 = vld [vmem:[%s4072_s2 + $0x2c8] sm:$0xff] }
  0x21   :  { %v129_v24 = vld [vmem:[%s4072_s2 + $0x330] sm:$0xff]  ;;  %v130_v26 = vld [vmem:[%s4072_s2 + $0x338] sm:$0xff]  ;;  %v147_v29 = vld [vmem:[%s4072_s2 + $0x3c0] sm:$0xff]  ;;  %v2213_v32 = vpack.c.bf16 %v98_v23, %v97_v22 }
  0x22   :  { %2166 = vmatpush3.bf16.msra.mxu0 %v2165_v46  ;;  %v148_v30 = vld [vmem:[%s4072_s2 + $0x3c8] sm:$0xff]  ;;  %v2245_v35 = vpack.c.bf16 %v130_v26, %v129_v24  ;;  %v99_v37 = vld [vmem:[%s4072_s2 + $0x240] sm:$0xff]  ;;  %v117_v42 = vld [vmem:[%s4072_s2 + $0x2d0] sm:$0xff] }
  0x23   :  { %2198 = vmatpush3.bf16.msra.mxu1 %v2197_v47  ;;  %2200 = vmatprep.subr.bf16.mxu0 %v2199_v48  ;;  %v25_v31 = vld [vmem:[%s4070_s0 + $0x8] sm:$0xff]  ;;  %v131_v39 = vld [vmem:[%s4072_s2 + $0x340] sm:$0xff]  ;;  %v2247_v40 = vpack.c.bf16 %v148_v30, %v147_v29  ;;  %v118_v43 = vld [vmem:[%s4072_s2 + $0x2d8] sm:$0xff] }
  0x24   :  { %2232 = vmatprep.subr.bf16.mxu1 %v2231_v52  ;;  %v230_v34 = vcombine.high %v25_v31, %v25_v31  ;;  %v100_v38 = vld [vmem:[%s4072_s2 + $0x248] sm:$0xff]  ;;  %v149_v46 = vld [vmem:[%s4072_s2 + $0x3d0] sm:$0xff]  ;;  %v150_v47 = vld [vmem:[%s4072_s2 + $0x3d8] sm:$0xff]  ;;  %v2219_v51 = vpack.c.bf16 %v118_v43, %v117_v42 }
  0x25   :  { %339 = vmatmul.mubr.f32.vlgmr.msra.gmra.mrb[0].mxu0 %v220_v27  ;;  %v115_v27 = vld [vmem:[%s4072_s2 + $0x2c0] sm:$0xff]  ;;  %v132_v41 = vld [vmem:[%s4072_s2 + $0x348] sm:$0xff]  ;;  %v2217_v48 = vpack.c.bf16 %v100_v38, %v99_v37  ;;  %v101_v52 = vld [vmem:[%s4072_s2 + $0x250] sm:$0xff]  ;;  %v2251_v55 = vpack.c.bf16 %v150_v47, %v149_v46  ;;  %v2612_v38 = vmov 0.0|0.0  }
  0x26   :  { %409 = vmatmul.mubr.f32.vlgmr.msra.gmra.mrb[0].mxu1 %v227_v33  ;;  %2202 = vmatpush3.bf16.msra.mxu0 %v2201_v58  ;;  %v2962_v33 = vrot.slane %v25_v31, %v2801_v13  ;;  %v2215_v36 = vpack.c.bf16 %v116_v28, %v115_v27  ;;  %v2985_v45 = vrot.slane %v230_v34, %v2801_v13  ;;  %v102_v53 = vld [vmem:[%s4072_s2 + $0x258] sm:$0xff]  ;;  %v133_v54 = vld [vmem:[%s4072_s2 + $0x350] sm:$0xff]  ;;  %v119_v57 = vld [vmem:[%s4072_s2 + $0x2e0] sm:$0xff] }
  0x27   :  { %2234 = vmatpush3.bf16.msra.mxu1 %v2233_v59  ;;  %2204 = vmatprep.subr.bf16.mxu0 %v2203_v60  ;;  %v2249_v50 = vpack.c.bf16 %v132_v41, %v131_v39  ;;  %v134_v56 = vld [vmem:[%s4072_s2 + $0x358] sm:$0xff]  ;;  %v120_v58 = vld [vmem:[%s4072_s2 + $0x2e8] sm:$0xff]  ;;  %v151_v59 = vld [vmem:[%s4072_s2 + $0x3e0] sm:$0xff]  ;;  %v2221_v61 = vpack.c.bf16 %v102_v53, %v101_v52 }
  0x28   :  { %2236 = vmatprep.subr.bf16.mxu1 %v2235_v0  ;;  %v245_v44 = vcombine.high %v2962_v33, %v2962_v33  ;;  %v246_v49 = vcombine.high %v2985_v45, %v2985_v45  ;;  %v152_v60 = vld [vmem:[%s4072_s2 + $0x3e8] sm:$0xff]  ;;  %v2253_v62 = vpack.c.bf16 %v134_v56, %v133_v54  ;;  %v2223_v63 = vpack.c.bf16 %v120_v58, %v119_v57  ;;  %v103_v0 = vld [vmem:[%s4072_s2 + $0x260] sm:$0xff]  ;;  %v121_v5 = vld [vmem:[%s4072_s2 + $0x2f0] sm:$0xff] }
  0x29   :  { %v104_v1 = vld [vmem:[%s4072_s2 + $0x268] sm:$0xff]  ;;  %v135_v2 = vld [vmem:[%s4072_s2 + $0x360] sm:$0xff]  ;;  %v2255_v3 = vpack.c.bf16 %v152_v60, %v151_v59  ;;  %v106_v14 = vld [vmem:[%s4072_s2 + $0x278] sm:$0xff] }
  0x2a   :  { %2206 = vmatpush3.bf16.msra.mxu0 %v2205_v6  ;;  %478 = vmatprep.mubr.f32.mxu0 %v245_v44  ;;  %v136_v4 = vld [vmem:[%s4072_s2 + $0x368] sm:$0xff]  ;;  %v122_v6 = vld [vmem:[%s4072_s2 + $0x2f8] sm:$0xff]  ;;  %v2225_v9 = vpack.c.bf16 %v104_v1, %v103_v0  ;;  %v137_v15 = vld [vmem:[%s4072_s2 + $0x370] sm:$0xff] }
  0x2b   :  { %2238 = vmatpush3.bf16.msra.mxu1 %v2237_v7  ;;  %2208 = vmatprep.subr.bf16.mxu0 %v2207_v8  ;;  %v153_v7 = vld [vmem:[%s4072_s2 + $0x3f0] sm:$0xff]  ;;  %v154_v8 = vld [vmem:[%s4072_s2 + $0x3f8] sm:$0xff]  ;;  %v2257_v10 = vpack.c.bf16 %v136_v4, %v135_v2  ;;  %v2227_v11 = vpack.c.bf16 %v122_v6, %v121_v5  ;;  %v171_v18 = vld [vmem:[%s4072_s2 + $0x480] sm:$0xff] }
  0x2c   :  { %2240 = vmatprep.subr.bf16.mxu1 %v2239_v12  ;;  %548 = vmatprep.mubr.f32.mxu1 %v246_v49  ;;  %v105_v12 = vld [vmem:[%s4072_s2 + $0x270] sm:$0xff]  ;;  %v2259_v16 = vpack.c.bf16 %v154_v8, %v153_v7  ;;  %v138_v17 = vld [vmem:[%s4072_s2 + $0x378] sm:$0xff]  ;;  %v155_v24 = vld [vmem:[%s4072_s2 + $0x400] sm:$0xff] }
  0x2d   :  { %v2261_v22 = vpack.c.bf16 %v138_v17, %v137_v15  ;;  %v187_v26 = vld [vmem:[%s4072_s2 + $0x500] sm:$0xff]  ;;  %v188_v27 = vld [vmem:[%s4072_s2 + $0x508] sm:$0xff]  ;;  %v173_v28 = vld [vmem:[%s4072_s2 + $0x490] sm:$0xff] }
  0x2e   :  { %2210 = vmatpush3.bf16.msra.mxu0 %v2209_v19  ;;  %v172_v19 = vld [vmem:[%s4072_s2 + $0x488] sm:$0xff]  ;;  %v174_v29 = vld [vmem:[%s4072_s2 + $0x498] sm:$0xff]  ;;  %v189_v37 = vld [vmem:[%s4072_s2 + $0x510] sm:$0xff] }
  0x2f   :  { %2242 = vmatpush3.bf16.msra.mxu1 %v2241_v20  ;;  %2212 = vmatprep.subr.bf16.mxu0 %v2211_v21  ;;  %v3064_v20 = vld [vmem:[%s4070_s0 + $0x10] sm:$0x3f]  ;;  %v2229_v21 = vpack.c.bf16 %v106_v14, %v105_v12  ;;  %v2263_v23 = vpack.c.bf16 %v172_v19, %v171_v18  ;;  %v2267_v34 = vpack.c.bf16 %v174_v29, %v173_v28  ;;  %v190_v39 = vld [vmem:[%s4072_s2 + $0x518] sm:$0xff]  ;;  %v176_v41 = vld [vmem:[%s4072_s2 + $0x4a8] sm:$0xff] }
  0x30   :  { %2244 = vmatprep.subr.bf16.mxu1 %v2243_v25  ;;  %v156_v25 = vld [vmem:[%s4072_s2 + $0x408] sm:$0xff]  ;;  %v3086_v30 = vrot.slane %v3064_v20, %v2801_v13  ;;  %v2299_v44 = vpack.c.bf16 %v190_v39, %v189_v37  ;;  %v159_v47 = vld [vmem:[%s4072_s2 + $0x420] sm:$0xff]  ;;  %v177_v49 = vld [vmem:[%s4072_s2 + $0x4b0] sm:$0xff] }
  0x31   :  { %v2265_v31 = vpack.c.bf16 %v156_v25, %v155_v24  ;;  %v162_v56 = vld [vmem:[%s4072_s2 + $0x438] sm:$0xff]  ;;  %v193_v57 = vld [vmem:[%s4072_s2 + $0x530] sm:$0xff]  ;;  %v179_v59 = vld [vmem:[%s4072_s2 + $0x4c0] sm:$0xff] }
  0x32   :  { %2214 = vmatpush3.bf16.msra.mxu0 %v2213_v32  ;;  %v2296_v32 = vpack.c.bf16 %v188_v27, %v187_v26  ;;  %v262_v42 = vcombine.high %v3086_v30, %v3086_v30  ;;  %v194_v58 = vld [vmem:[%s4072_s2 + $0x538] sm:$0xff]  ;;  %v180_v60 = vld [vmem:[%s4072_s2 + $0x4c8] sm:$0xff]  ;;  %v163_v0 = vld [vmem:[%s4072_s2 + $0x440] sm:$0xff] }
  0x33   :  { %2246 = vmatpush3.bf16.msra.mxu1 %v2245_v35  ;;  %2216 = vmatprep.subr.bf16.mxu0 %v2215_v36  ;;  %v157_v35 = vld [vmem:[%s4072_s2 + $0x410] sm:$0xff]  ;;  %v158_v36 = vld [vmem:[%s4072_s2 + $0x418] sm:$0xff]  ;;  %v164_v1 = vld [vmem:[%s4072_s2 + $0x448] sm:$0xff] }
  0x34   :  { %2248 = vmatprep.subr.bf16.mxu1 %v2247_v40  ;;  %v175_v40 = vld [vmem:[%s4072_s2 + $0x4a0] sm:$0xff]  ;;  %v2269_v43 = vpack.c.bf16 %v158_v36, %v157_v35  ;;  %v181_v4 = vld [vmem:[%s4072_s2 + $0x4d0] sm:$0xff]  ;;  %v182_v5 = vld [vmem:[%s4072_s2 + $0x4d8] sm:$0xff]  ;;  %v2281_v6 = vpack.c.bf16 %v164_v1, %v163_v0 }
  0x35   :  { %v2271_v46 = vpack.c.bf16 %v176_v41, %v175_v40  ;;  %v195_v2 = vld [vmem:[%s4072_s2 + $0x540] sm:$0xff]  ;;  %v2283_v8 = vpack.c.bf16 %v182_v5, %v181_v4  ;;  %v198_v12 = vld [vmem:[%s4072_s2 + $0x558] sm:$0xff]  ;;  %v184_v15 = vld [vmem:[%s4072_s2 + $0x4e8] sm:$0xff] }
  0x36   :  { %2218 = vmatpush3.bf16.msra.mxu0 %v2217_v48  ;;  %v160_v48 = vld [vmem:[%s4072_s2 + $0x428] sm:$0xff]  ;;  %v183_v14 = vld [vmem:[%s4072_s2 + $0x4e0] sm:$0xff]  ;;  %v185_v24 = vld [vmem:[%s4072_s2 + $0x4f0] sm:$0xff] }
  0x37   :  { %2250 = vmatpush3.bf16.msra.mxu1 %v2249_v50  ;;  %2220 = vmatprep.subr.bf16.mxu0 %v2219_v51  ;;  %v178_v50 = vld [vmem:[%s4072_s2 + $0x4b8] sm:$0xff]  ;;  %v2614_v51 = vmov 0.0   ;;  %v2273_v52 = vpack.c.bf16 %v160_v48, %v159_v47  ;;  %v2287_v18 = vpack.c.bf16 %v184_v15, %v183_v14  ;;  %v167_v19 = vld [vmem:[%s4072_s2 + $0x460] sm:$0xff]  ;;  %v715_v37 = vld [vmem:[%s4074_s4 + $0x88] sm:$0xff] }
  0x38   :  { %2252 = vmatprep.subr.bf16.mxu1 %v2251_v55  ;;  %v2275_v54 = vpack.c.bf16 %v178_v50, %v177_v49  ;;  %v161_v55 = vld [vmem:[%s4072_s2 + $0x430] sm:$0xff]  ;;  %v186_v25 = vld [vmem:[%s4072_s2 + $0x4f8] sm:$0xff]  ;;  %v694_v27 = vld [vmem:[%s4071_s1] sm:$0xff] }
  0x39   :  { %v2291_v29 = vpack.c.bf16 %v186_v25, %v185_v24  ;;  %v202_v35 = vld [vmem:[%s4072_s2 + $0x578] sm:$0xff]  ;;  %v714_v36 = vld [vmem:[%s4074_s4 + $0x80] sm:$0xff]  ;;  %v747_v40 = vld [vmem:[%s4074_s4 + $0x188] sm:$0xff]  ;;  %v958_v41 = vcombine.high %v694_v27, %v694_v27 }
  0x3a   :  { %2222 = vmatpush3.bf16.msra.mxu0 %v2221_v61  ;;  %v2277_v61 = vpack.c.bf16 %v162_v56, %v161_v55  ;;  %v746_v39 = vld [vmem:[%s4074_s4 + $0x180] sm:$0xff]  ;;  %v699_v48 = vld [vmem:[%s4074_s4 + $0x8] sm:$0xff]  ;;  %v716_v49 = vld [vmem:[%s4074_s4 + $0x90] sm:$0xff] }
  0x3b   :  { %2254 = vmatpush3.bf16.msra.mxu1 %v2253_v62  ;;  %2224 = vmatprep.subr.bf16.mxu0 %v2223_v63  ;;  %v2305_v62 = vpack.c.bf16 %v194_v58, %v193_v57  ;;  %v2279_v63 = vpack.c.bf16 %v180_v60, %v179_v59  ;;  %v698_v47 = vld [vmem:[%s4074_s4] sm:$0xff]  ;;  %v717_v50 = vld [vmem:[%s4074_s4 + $0x98] sm:$0xff]  ;;  %v700_v58 = vld [vmem:[%s4074_s4 + $0x10] sm:$0xff] }
  0x3c   :  { %2256 = vmatprep.subr.bf16.mxu1 %v2255_v3  ;;  %v196_v3 = vld [vmem:[%s4072_s2 + $0x548] sm:$0xff]  ;;  %v2321_v55 = vpack.c.bf16 %v699_v48, %v698_v47  ;;  %v2323_v57 = vpack.c.bf16 %v717_v50, %v716_v49  ;;  %v701_v59 = vld [vmem:[%s4074_s4 + $0x18] sm:$0xff]  ;;  %v732_v60 = vld [vmem:[%s4074_s4 + $0x110] sm:$0xff] }
  0x3d   :  { %v2308_v7 = vpack.c.bf16 %v196_v3, %v195_v2  ;;  %v719_v0 = vld [vmem:[%s4074_s4 + $0xa8] sm:$0xff]  ;;  %v750_v2 = vld [vmem:[%s4074_s4 + $0x1a0] sm:$0xff]  ;;  %v2325_v5 = vpack.c.bf16 %v701_v59, %v700_v58  ;;  %v721_v14 = vld [vmem:[%s4074_s4 + $0xb8] sm:$0xff] }
  0x3e   :  { %2226 = vmatpush3.bf16.msra.mxu0 %v2225_v9  ;;  %v165_v9 = vld [vmem:[%s4072_s2 + $0x450] sm:$0xff]  ;;  %v751_v3 = vld [vmem:[%s4074_s4 + $0x1a8] sm:$0xff]  ;;  %v737_v25 = vld [vmem:[%s4074_s4 + $0x138] sm:$0xff] }
  0x3f   :  { %2258 = vmatpush3.bf16.msra.mxu1 %v2257_v10  ;;  %2228 = vmatprep.subr.bf16.mxu0 %v2227_v11  ;;  %v166_v10 = vld [vmem:[%s4072_s2 + $0x458] sm:$0xff]  ;;  %v197_v11 = vld [vmem:[%s4072_s2 + $0x550] sm:$0xff]  ;;  %v710_v59 = vld [vmem:[%s4074_s4 + $0x60] sm:$0xff] }
  0x40   :  { %2260 = vmatprep.subr.bf16.mxu1 %v2259_v16  ;;  %v2285_v16 = vpack.c.bf16 %v166_v10, %v165_v9  ;;  %v2311_v17 = vpack.c.bf16 %v198_v12, %v197_v11  ;;  %v734_v9 = vld [vmem:[%s4074_s4 + $0x120] sm:$0xff]  ;;  %v2359_v10 = vpack.c.bf16 %v751_v3, %v750_v2  ;;  %v735_v11 = vld [vmem:[%s4074_s4 + $0x128] sm:$0xff]  ;;  %v720_v12 = vld [vmem:[%s4074_s4 + $0xb0] sm:$0xff] }
  0x41   :  { %v752_v15 = vld [vmem:[%s4074_s4 + $0x1b0] sm:$0xff]  ;;  %v741_v50 = vld [vmem:[%s4074_s4 + $0x158] sm:$0xff] }
  0x42   :  { %2230 = vmatpush3.bf16.msra.mxu0 %v2229_v21  ;;  %v168_v21 = vld [vmem:[%s4072_s2 + $0x468] sm:$0xff]  ;;  %v760_v2 = vld [vmem:[%s4074_s4 + $0x1f0] sm:$0xff]  ;;  %v761_v3 = vld [vmem:[%s4074_s4 + $0x1f8] sm:$0xff] }
  0x43   :  { %2262 = vmatpush3.bf16.msra.mxu1 %v2261_v22  ;;  %2264 = vmatprep.subr.bf16.mxu0 %v2263_v23  ;;  %v199_v22 = vld [vmem:[%s4072_s2 + $0x560] sm:$0xff]  ;;  %v200_v23 = vld [vmem:[%s4072_s2 + $0x568] sm:$0xff]  ;;  %v2289_v26 = vpack.c.bf16 %v168_v21, %v167_v19  ;;  %v2331_v19 = vpack.c.bf16 %v721_v14, %v720_v12  ;;  %v704_v21 = vld [vmem:[%s4074_s4 + $0x30] sm:$0xff] }
  0x44   :  { %2295 = vmatprep.subr.bf16.mxu1 %v2612_v38  ;;  %v2314_v28 = vpack.c.bf16 %v200_v23, %v199_v22  ;;  %v705_v22 = vld [vmem:[%s4074_s4 + $0x38] sm:$0xff]  ;;  %v736_v23 = vld [vmem:[%s4074_s4 + $0x130] sm:$0xff]  ;;  %v778_v12 = vld [vmem:[%s4074_s4 + $0x280] sm:$0xff] }
  0x45   :  { %479 = vmatmul.mubr.f32.vlgmr.msra.gmra.mrb[2].mxu0 %v2962_v33  ;;  %v191_v33 = vld [vmem:[%s4072_s2 + $0x520] sm:$0xff]  ;;  %v779_v14 = vld [vmem:[%s4074_s4 + $0x288] sm:$0xff] }
  0x46   :  { %549 = vmatmul.mubr.f32.vlgmr.msra.gmra.mrb[2].mxu1 %v2985_v45  ;;  %2266 = vmatpush3.bf16.msra.mxu0 %v2265_v31  ;;  %v192_v45 = vld [vmem:[%s4072_s2 + $0x528] sm:$0xff]  ;;  %v169_v31 = vld [vmem:[%s4072_s2 + $0x470] sm:$0xff] }
  0x47   :  { %2297 = vmatpush3.bf16.msra.mxu1 %v2296_v32  ;;  %2268 = vmatprep.subr.bf16.mxu0 %v2267_v34  ;;  %v2302_v53 = vpack.c.bf16 %v192_v45, %v191_v33  ;;  %v170_v32 = vld [vmem:[%s4072_s2 + $0x478] sm:$0xff]  ;;  %v201_v34 = vld [vmem:[%s4072_s2 + $0x570] sm:$0xff]  ;;  %v730_v33 = vld [vmem:[%s4074_s4 + $0x100] sm:$0xff]  ;;  %v2351_v45 = vpack.c.bf16 %v747_v40, %v746_v39 }
  0x48   :  { %2298 = vmatprep.subr.bf16.mxu1 %v2612_v38  ;;  %618 = vmatprep.mubr.f32.mxu0 %v262_v42  ;;  %v2293_v42 = vpack.c.bf16 %v170_v32, %v169_v31  ;;  %v2333_v31 = vpack.c.bf16 %v705_v22, %v704_v21  ;;  %v2365_v32 = vpack.c.bf16 %v737_v25, %v736_v23  ;;  %v739_v40 = vld [vmem:[%s4074_s4 + $0x148] sm:$0xff]  ;;  %v762_v22 = vld [vmem:[%s4074_s4 + $0x200] sm:$0xff] }
  0x49   :  { %2132 = vmatprep.mubr.msk.f32.mxu1 %vm2613_vm0, %v2614_v51  ;;  %v3256_v51 = vrot.slane %v694_v27, %v2801_v13  ;;  %v723_v27 = vld [vmem:[%s4074_s4 + $0xc8] sm:$0xff]  ;;  %v2383_v21 = vpack.c.bf16 %v779_v14, %v778_v12 }
  0x4a   :  { %2270 = vmatpush3.bf16.msra.mxu0 %v2269_v43  ;;  %v247_v43 = vcombine.high %v3064_v20, %v3064_v20  ;;  %v731_v20 = vld [vmem:[%s4074_s4 + $0x108] sm:$0xff] }
  0x4b   :  { %2300 = vmatpush3.bf16.msra.mxu1 %v2299_v44  ;;  %2272 = vmatprep.subr.bf16.mxu0 %v2271_v46  ;;  %v2317_v44 = vpack.c.bf16 %v202_v35, %v201_v34  ;;  %v2319_v46 = vpack.c.bf16 %v715_v37, %v714_v36  ;;  %v2353_v56 = vpack.c.bf16 %v731_v20, %v730_v33  ;;  %v706_v35 = vld [vmem:[%s4074_s4 + $0x40] sm:$0xff]  ;;  %v707_v36 = vld [vmem:[%s4074_s4 + $0x48] sm:$0xff]  ;;  %v708_v33 = vld [vmem:[%s4074_s4 + $0x50] sm:$0xff] }
  0x4c   :  { %2301 = vmatprep.subr.bf16.mxu1 %v2612_v38  ;;  %v973_v1 = vcombine.high %v3256_v51, %v3256_v51  ;;  %v738_v37 = vld [vmem:[%s4074_s4 + $0x140] sm:$0xff]  ;;  %v740_v20 = vld [vmem:[%s4074_s4 + $0x150] sm:$0xff]  ;;  %v763_v23 = vld [vmem:[%s4074_s4 + $0x208] sm:$0xff] }
  0x4d   :  { %v2369_v47 = vpack.c.bf16 %v739_v40, %v738_v37  ;;  %v765_v40 = vld [vmem:[%s4074_s4 + $0x218] sm:$0xff]  ;;  %v803_v14 = vld [vmem:[%s4074_s4 + $0x348] sm:$0xff] }
  0x4e   :  { %2274 = vmatpush3.bf16.msra.mxu0 %v2273_v52  ;;  %v749_v52 = vld [vmem:[%s4074_s4 + $0x198] sm:$0xff] }
  0x4f   :  { %2303 = vmatpush3.bf16.msra.mxu1 %v2302_v53  ;;  %2276 = vmatprep.subr.bf16.mxu0 %v2275_v54  ;;  %v3265_v53 = vrot.slane %v958_v41, %v2801_v13  ;;  %v261_v54 = vrot.slane %v247_v43, %v2801_v13  ;;  %v724_v41 = vld [vmem:[%s4074_s4 + $0xd0] sm:$0xff] }
  0x50   :  { %2304 = vmatprep.subr.bf16.mxu1 %v2612_v38  ;;  %v756_v43 = vld [vmem:[%s4074_s4 + $0x1d0] sm:$0xff] }
  0x51   :  { %v974_v4 = vcombine.high %v3265_v53, %v3265_v53 }
  0x52   :  { %2278 = vmatpush3.bf16.msra.mxu0 %v2277_v61 }
  0x53   :  { %2306 = vmatpush3.bf16.msra.mxu1 %v2305_v62  ;;  %2280 = vmatprep.subr.bf16.mxu0 %v2279_v63  ;;  %v733_v62 = vld [vmem:[%s4074_s4 + $0x118] sm:$0xff]  ;;  %v718_v63 = vld [vmem:[%s4074_s4 + $0xa0] sm:$0xff] }
  0x54   :  { %2307 = vmatprep.subr.bf16.mxu1 %v2612_v38 }
  0x56   :  { %2282 = vmatpush3.bf16.msra.mxu0 %v2281_v6  ;;  %v2357_v6 = vpack.c.bf16 %v733_v62, %v732_v60  ;;  %v711_v60 = vld [vmem:[%s4074_s4 + $0x68] sm:$0xff] }
  0x57   :  { %2309 = vmatpush3.bf16.msra.mxu1 %v2308_v7  ;;  %2284 = vmatprep.subr.bf16.mxu0 %v2283_v8  ;;  %v2327_v7 = vpack.c.bf16 %v719_v0, %v718_v63  ;;  %v703_v8 = vld [vmem:[%s4074_s4 + $0x28] sm:$0xff]  ;;  %v728_v0 = vld [vmem:[%s4074_s4 + $0xf0] sm:$0xff] }
  0x58   :  { %2310 = vmatprep.subr.bf16.mxu1 %v2612_v38  ;;  %v743_v63 = vld [vmem:[%s4074_s4 + $0x168] sm:$0xff] }
  0x5a   :  { %2286 = vmatpush3.bf16.msra.mxu0 %v2285_v16  ;;  %v753_v16 = vld [vmem:[%s4074_s4 + $0x1b8] sm:$0xff] }
  0x5b   :  { %2312 = vmatpush3.bf16.msra.mxu1 %v2311_v17  ;;  %2288 = vmatprep.subr.bf16.mxu0 %v2287_v18  ;;  %v2361_v18 = vpack.c.bf16 %v735_v11, %v734_v9  ;;  %v2363_v24 = vpack.c.bf16 %v753_v16, %v752_v15  ;;  %v744_v9 = vld [vmem:[%s4074_s4 + $0x170] sm:$0xff]  ;;  %v745_v11 = vld [vmem:[%s4074_s4 + $0x178] sm:$0xff]  ;;  %v810_v15 = vld [vmem:[%s4074_s4 + $0x380] sm:$0xff] }
  0x5c   :  { %2313 = vmatprep.subr.bf16.mxu1 %v2612_v38  ;;  %v811_v16 = vld [vmem:[%s4074_s4 + $0x388] sm:$0xff] }
  0x5d   :  { %v2415_v25 = vpack.c.bf16 %v811_v16, %v810_v15  ;;  %v788_v15 = vld [vmem:[%s4074_s4 + $0x2d0] sm:$0xff]  ;;  %v789_v16 = vld [vmem:[%s4074_s4 + $0x2d8] sm:$0xff] }
  0x5e   :  { %2290 = vmatpush3.bf16.msra.mxu0 %v2289_v26  ;;  %v722_v26 = vld [vmem:[%s4074_s4 + $0xc0] sm:$0xff] }
  0x5f   :  { %2315 = vmatpush3.bf16.msra.mxu1 %v2314_v28  ;;  %2292 = vmatprep.subr.bf16.mxu0 %v2291_v29  ;;  %v754_v28 = vld [vmem:[%s4074_s4 + $0x1c0] sm:$0xff]  ;;  %v755_v29 = vld [vmem:[%s4074_s4 + $0x1c8] sm:$0xff]  ;;  %v2335_v34 = vpack.c.bf16 %v723_v27, %v722_v26  ;;  %v780_v27 = vld [vmem:[%s4074_s4 + $0x290] sm:$0xff] }
  0x60   :  { %2316 = vmatprep.subr.bf16.mxu1 %v2612_v38  ;;  %v748_v38 = vld [vmem:[%s4074_s4 + $0x190] sm:$0xff]  ;;  %v2367_v39 = vpack.c.bf16 %v755_v29, %v754_v28  ;;  %v795_v26 = vld [vmem:[%s4074_s4 + $0x308] sm:$0xff]  ;;  %v781_v28 = vld [vmem:[%s4074_s4 + $0x298] sm:$0xff] }
  0x61   :  { %v2355_v61 = vpack.c.bf16 %v749_v52, %v748_v38  ;;  %v726_v38 = vld [vmem:[%s4074_s4 + $0xe0] sm:$0xff]  ;;  %v727_v52 = vld [vmem:[%s4074_s4 + $0xe8] sm:$0xff]  ;;  %v2387_v37 = vpack.c.bf16 %v781_v28, %v780_v27 }
  0x62   :  { %2294 = vmatpush3.bf16.msra.mxu0 %v2293_v42  ;;  %v725_v42 = vld [vmem:[%s4074_s4 + $0xd8] sm:$0xff]  ;;  %v2343_v58 = vpack.c.bf16 %v727_v52, %v726_v38  ;;  %v767_v38 = vld [vmem:[%s4074_s4 + $0x228] sm:$0xff]  ;;  %v798_v52 = vld [vmem:[%s4074_s4 + $0x320] sm:$0xff] }
  0x63   :  { %2318 = vmatpush3.bf16.msra.mxu1 %v2317_v44  ;;  %2320 = vmatprep.subr.bf16.mxu0 %v2319_v46  ;;  %v757_v44 = vld [vmem:[%s4074_s4 + $0x1d8] sm:$0xff]  ;;  %v2337_v46 = vpack.c.bf16 %v707_v36, %v706_v35  ;;  %v2339_v48 = vpack.c.bf16 %v725_v42, %v724_v41  ;;  %v2385_v35 = vpack.c.bf16 %v763_v23, %v762_v22  ;;  %v796_v41 = vld [vmem:[%s4074_s4 + $0x310] sm:$0xff]  ;;  %v790_v28 = vld [vmem:[%s4074_s4 + $0x2e0] sm:$0xff] }
  0x64   :  { %2352 = vmatprep.subr.bf16.mxu1 %v2351_v45  ;;  %v709_v45 = vld [vmem:[%s4074_s4 + $0x58] sm:$0xff]  ;;  %v2371_v49 = vpack.c.bf16 %v757_v44, %v756_v43  ;;  %v782_v44 = vld [vmem:[%s4074_s4 + $0x2a0] sm:$0xff]  ;;  %v2403_v23 = vpack.c.bf16 %v789_v16, %v788_v15 }
  0x65   :  { %619 = vmatmul.mubr.f32.vlgmr.msra.gmra.mrb[4].mxu0 %v3086_v30  ;;  %v702_v30 = vld [vmem:[%s4074_s4 + $0x20] sm:$0xff]  ;;  %v797_v43 = vld [vmem:[%s4074_s4 + $0x318] sm:$0xff] }
  0x66   :  { %2133 = vmatmul.mubr.f32.vlgmr.msra.gmra.mrb[4].mxu1 %v261_v54  ;;  %2322 = vmatpush3.bf16.msra.mxu0 %v2321_v55  ;;  %v2329_v17 = vpack.c.bf16 %v703_v8, %v702_v30  ;;  %v758_v54 = vld [vmem:[%s4074_s4 + $0x1e0] sm:$0xff]  ;;  %v759_v55 = vld [vmem:[%s4074_s4 + $0x1e8] sm:$0xff]  ;;  %v712_v30 = vld [vmem:[%s4074_s4 + $0x70] sm:$0xff] }
  0x67   :  { %2354 = vmatpush3.bf16.msra.mxu1 %v2353_v56  ;;  %2324 = vmatprep.subr.bf16.mxu0 %v2323_v57  ;;  %v2341_v56 = vpack.c.bf16 %v709_v45, %v708_v33  ;;  %v2373_v57 = vpack.c.bf16 %v741_v50, %v740_v20  ;;  %v2375_v62 = vpack.c.bf16 %v759_v55, %v758_v54  ;;  %v713_v8 = vld [vmem:[%s4074_s4 + $0x78] sm:$0xff]  ;;  %v815_v33 = vld [vmem:[%s4074_s4 + $0x3a8] sm:$0xff]  ;;  %v784_v55 = vld [vmem:[%s4074_s4 + $0x2b0] sm:$0xff] }
  0x68   :  { %2356 = vmatprep.subr.bf16.mxu1 %v2355_v61  ;;  %1106 = vmatprep.mubr.f32.mxu0 %v973_v1  ;;  %v742_v61 = vld [vmem:[%s4074_s4 + $0x160] sm:$0xff]  ;;  %v729_v1 = vld [vmem:[%s4074_s4 + $0xf8] sm:$0xff]  ;;  %v799_v54 = vld [vmem:[%s4074_s4 + $0x328] sm:$0xff] }
  0x69   :  { %1176 = vmatprep.mubr.f32.mxu1 %v974_v4  ;;  %v2345_v4 = vpack.c.bf16 %v711_v60, %v710_v59  ;;  %v2425_v60 = vpack.c.bf16 %v799_v54, %v798_v52 }
  0x6a   :  { %2326 = vmatpush3.bf16.msra.mxu0 %v2325_v5  ;;  %v695_v5 = vld [vmem:[%s4071_s1 + $0x8] sm:$0xff] }
  0x6b   :  { %2358 = vmatpush3.bf16.msra.mxu1 %v2357_v6  ;;  %2328 = vmatprep.subr.bf16.mxu0 %v2327_v7  ;;  %v2377_v6 = vpack.c.bf16 %v743_v63, %v742_v61  ;;  %v2347_v7 = vpack.c.bf16 %v729_v1, %v728_v0  ;;  %v3463_v29 = vrot.slane %v695_v5, %v2801_v13  ;;  %v769_v63 = vld [vmem:[%s4074_s4 + $0x238] sm:$0xff]  ;;  %v800_v0 = vld [vmem:[%s4074_s4 + $0x330] sm:$0xff] }
  0x6c   :  { %2360 = vmatprep.subr.bf16.mxu1 %v2359_v10  ;;  %v2379_v10 = vpack.c.bf16 %v761_v3, %v760_v2  ;;  %v801_v2 = vld [vmem:[%s4074_s4 + $0x338] sm:$0xff]  ;;  %v786_v3 = vld [vmem:[%s4074_s4 + $0x2c0] sm:$0xff] }
  0x6e   :  { %2330 = vmatpush3.bf16.msra.mxu0 %v2329_v17  ;;  %v975_v17 = vcombine.high %v695_v5, %v695_v5  ;;  %v818_v5 = vld [vmem:[%s4074_s4 + $0x3c0] sm:$0xff] }
  0x6f   :  { %2362 = vmatpush3.bf16.msra.mxu1 %v2361_v18  ;;  %2332 = vmatprep.subr.bf16.mxu0 %v2331_v19  ;;  %v2349_v18 = vpack.c.bf16 %v713_v8, %v712_v30  ;;  %v2381_v19 = vpack.c.bf16 %v745_v11, %v744_v9  ;;  %v2429_v30 = vpack.c.bf16 %v801_v2, %v800_v0  ;;  %v770_v9 = vld [vmem:[%s4074_s4 + $0x240] sm:$0xff] }
  0x70   :  { %2364 = vmatprep.subr.bf16.mxu1 %v2363_v24  ;;  %v794_v24 = vld [vmem:[%s4074_s4 + $0x300] sm:$0xff] }
  0x71   :  { %v2417_v36 = vpack.c.bf16 %v795_v26, %v794_v24  ;;  %v802_v11 = vld [vmem:[%s4074_s4 + $0x340] sm:$0xff]  ;;  %v773_v24 = vld [vmem:[%s4074_s4 + $0x258] sm:$0xff] }
  0x72   :  { %2334 = vmatpush3.bf16.msra.mxu0 %v2333_v31  ;;  %v812_v31 = vld [vmem:[%s4074_s4 + $0x390] sm:$0xff]  ;;  %v2433_v22 = vpack.c.bf16 %v803_v14, %v802_v11  ;;  %v805_v26 = vld [vmem:[%s4074_s4 + $0x358] sm:$0xff] }
  0x73   :  { %2366 = vmatpush3.bf16.msra.mxu1 %v2365_v32  ;;  %2336 = vmatprep.subr.bf16.mxu0 %v2335_v34  ;;  %v813_v32 = vld [vmem:[%s4074_s4 + $0x398] sm:$0xff]  ;;  %v3472_v34 = vrot.slane %v975_v17, %v2801_v13  ;;  %v820_v17 = vld [vmem:[%s4074_s4 + $0x3d0] sm:$0xff] }
  0x74   :  { %2368 = vmatprep.subr.bf16.mxu1 %v2367_v39  ;;  %v764_v39 = vld [vmem:[%s4074_s4 + $0x210] sm:$0xff]  ;;  %v2419_v42 = vpack.c.bf16 %v813_v32, %v812_v31  ;;  %v791_v31 = vld [vmem:[%s4074_s4 + $0x2e8] sm:$0xff] }
  0x75   :  { %v991_v45 = vcombine.high %v3472_v34, %v3472_v34  ;;  %v2389_v20 = vpack.c.bf16 %v765_v40, %v764_v39 }
  0x76   :  { %2338 = vmatpush3.bf16.msra.mxu0 %v2337_v46  ;;  %v783_v46 = vld [vmem:[%s4074_s4 + $0x2a8] sm:$0xff] }
  0x77   :  { %2370 = vmatpush3.bf16.msra.mxu1 %v2369_v47  ;;  %2340 = vmatprep.subr.bf16.mxu0 %v2339_v48  ;;  %v990_v47 = vcombine.high %v3463_v29, %v3463_v29  ;;  %v814_v48 = vld [vmem:[%s4074_s4 + $0x3a0] sm:$0xff]  ;;  %v2391_v50 = vpack.c.bf16 %v783_v46, %v782_v44 }
  0x78   :  { %2372 = vmatprep.subr.bf16.mxu1 %v2371_v49  ;;  %v2421_v49 = vpack.c.bf16 %v797_v43, %v796_v41 }
  0x7a   :  { %2342 = vmatpush3.bf16.msra.mxu0 %v2341_v56  ;;  %v785_v56 = vld [vmem:[%s4074_s4 + $0x2b8] sm:$0xff] }
  0x7b   :  { %2374 = vmatpush3.bf16.msra.mxu1 %v2373_v57  ;;  %2344 = vmatprep.subr.bf16.mxu0 %v2343_v58  ;;  %v816_v57 = vld [vmem:[%s4074_s4 + $0x3b0] sm:$0xff]  ;;  %v817_v58 = vld [vmem:[%s4074_s4 + $0x3b8] sm:$0xff]  ;;  %v2395_v61 = vpack.c.bf16 %v785_v56, %v784_v55 }
  0x7c   :  { %2376 = vmatprep.subr.bf16.mxu1 %v2375_v62  ;;  %v768_v62 = vld [vmem:[%s4074_s4 + $0x230] sm:$0xff]  ;;  %v2427_v1 = vpack.c.bf16 %v817_v58, %v816_v57 }
  0x7e   :  { %2346 = vmatpush3.bf16.msra.mxu0 %v2345_v4  ;;  %v787_v4 = vld [vmem:[%s4074_s4 + $0x2c8] sm:$0xff] }
  0x7f   :  { %2378 = vmatpush3.bf16.msra.mxu1 %v2377_v6  ;;  %2348 = vmatprep.subr.bf16.mxu0 %v2347_v7  ;;  %v819_v6 = vld [vmem:[%s4074_s4 + $0x3c8] sm:$0xff]  ;;  %v2397_v7 = vpack.c.bf16 %v769_v63, %v768_v62  ;;  %v2399_v8 = vpack.c.bf16 %v787_v4, %v786_v3 }
  0x80   :  { %2380 = vmatprep.subr.bf16.mxu1 %v2379_v10  ;;  %v771_v10 = vld [vmem:[%s4074_s4 + $0x248] sm:$0xff]  ;;  %v2431_v12 = vpack.c.bf16 %v819_v6, %v818_v5 }
  0x82   :  { %2350 = vmatpush3.bf16.msra.mxu0 %v2349_v18  ;;  %v821_v18 = vld [vmem:[%s4074_s4 + $0x3d8] sm:$0xff] }
  0x83   :  { %2382 = vmatpush3.bf16.msra.mxu1 %v2381_v19  ;;  %2384 = vmatprep.subr.bf16.mxu0 %v2383_v21  ;;  %v2401_v19 = vpack.c.bf16 %v771_v10, %v770_v9  ;;  %v772_v21 = vld [vmem:[%s4074_s4 + $0x250] sm:$0xff]  ;;  %v2435_v27 = vpack.c.bf16 %v821_v18, %v820_v17 }
  0x84   :  { %2416 = vmatprep.subr.bf16.mxu1 %v2415_v25  ;;  %v804_v25 = vld [vmem:[%s4074_s4 + $0x350] sm:$0xff] }
  0x85   :  { %1107 = vmatmul.mubr.f32.vlgmr.msra.gmra.mrb[6].mxu0 %v3256_v51  ;;  %v766_v51 = vld [vmem:[%s4074_s4 + $0x220] sm:$0xff] }
  0x86   :  { %1177 = vmatmul.mubr.f32.vlgmr.msra.gmra.mrb[6].mxu1 %v3265_v53  ;;  %2386 = vmatpush3.bf16.msra.mxu0 %v2385_v35  ;;  %v2423_v53 = vpack.c.bf16 %v815_v33, %v814_v48  ;;  %v2393_v59 = vpack.c.bf16 %v767_v38, %v766_v51 }
  0x87   :  { %2418 = vmatpush3.bf16.msra.mxu1 %v2417_v36  ;;  %2388 = vmatprep.subr.bf16.mxu0 %v2387_v37 }
  0x88   :  { %2420 = vmatprep.subr.bf16.mxu1 %v2419_v42  ;;  %1246 = vmatprep.mubr.f32.mxu0 %v990_v47 }
  0x89   :  { %1316 = vmatprep.mubr.f32.mxu1 %v991_v45 }
  0x8a   :  { %2390 = vmatpush3.bf16.msra.mxu0 %v2389_v20 }
  0x8b   :  { %2422 = vmatpush3.bf16.msra.mxu1 %v2421_v49  ;;  %2392 = vmatprep.subr.bf16.mxu0 %v2391_v50 }
  0x8c   :  { %2424 = vmatprep.subr.bf16.mxu1 %v2423_v53 }
  0x8e   :  { %2394 = vmatpush3.bf16.msra.mxu0 %v2393_v59 }
  0x8f   :  { %2426 = vmatpush3.bf16.msra.mxu1 %v2425_v60  ;;  %2396 = vmatprep.subr.bf16.mxu0 %v2395_v61 }
  0x90   :  { %2428 = vmatprep.subr.bf16.mxu1 %v2427_v1 }
  0x92   :  { %2398 = vmatpush3.bf16.msra.mxu0 %v2397_v7 }
  0x93   :  { %2430 = vmatpush3.bf16.msra.mxu1 %v2429_v30  ;;  %2400 = vmatprep.subr.bf16.mxu0 %v2399_v8 }
  0x94   :  { %2432 = vmatprep.subr.bf16.mxu1 %v2431_v12 }
  0x95   :  { %11 = vsyncpa [#allocation3], 0  ;;  %v822_v32 = vld [vmem:[%s4074_s4 + $0x3e0] sm:$0xff]  ;;  %v823_v35 = vld [vmem:[%s4074_s4 + $0x3e8] sm:$0xff]  ;;  %v2405_v36 = vpack.c.bf16 %v773_v24, %v772_v21  ;;  %v2437_v37 = vpack.c.bf16 %v805_v26, %v804_v25  ;;  %v2407_v39 = vpack.c.bf16 %v791_v31, %v790_v28  ;;  %s2615_s12 = smov [#allocation2]  }
  0x96   :  { %2402 = vmatpush3.bf16.msra.mxu0 %v2401_v19  ;;  %v774_v40 = vld [vmem:[%s4074_s4 + $0x260] sm:$0xff]  ;;  %v775_v41 = vld [vmem:[%s4074_s4 + $0x268] sm:$0xff]  ;;  %v2439_v43 = vpack.c.bf16 %v823_v35, %v822_v32  ;;  %v792_v46 = vld [vmem:[%s4074_s4 + $0x2f0] sm:$0xff]  ;;  %s1618_s13 = sshll.u32 %s2615_s12, 4  ;;  %s1619_s13 = int_to_ptr.vmem [resolvable:$true] %s1618_s13 }
  0x97   :  { %2434 = vmatpush3.bf16.msra.mxu1 %v2433_v22  ;;  %2404 = vmatprep.subr.bf16.mxu0 %v2403_v23  ;;  %v806_v42 = vld [vmem:[%s4074_s4 + $0x360] sm:$0xff]  ;;  %v807_v44 = vld [vmem:[%s4074_s4 + $0x368] sm:$0xff]  ;;  %v793_v47 = vld [vmem:[%s4074_s4 + $0x2f8] sm:$0xff]  ;;  %v2409_v45 = vpack.c.bf16 %v775_v41, %v774_v40  ;;  %s2587_s14 = scalar_lea.vmem %s1619_s13, 32  ;;  %p2592_p1 = scmp.lt.s32.totalorder %s1619_s13, %s1619_s13 }
  0x98   :  { %2436 = vmatprep.subr.bf16.mxu1 %v2435_v27  ;;  %v824_v48 = vld [vmem:[%s4074_s4 + $0x3f0] sm:$0xff]  ;;  %v825_v33 = vld [vmem:[%s4074_s4 + $0x3f8] sm:$0xff]  ;;  %v2441_v49 = vpack.c.bf16 %v807_v44, %v806_v42  ;;  %v2411_v50 = vpack.c.bf16 %v793_v47, %v792_v46  ;;  %v842_v55 = vld [vmem:[%s4074_s4 + $0x480] sm:$0xff]  ;;  %p2588_p0 = scmp.ne.s32.totalorder %s1619_s13, %s2587_s14  ;;  %p2593_p2 = scmp.lt.s32.totalorder %s2587_s14, %s2587_s14 }
  0x99   :  { %v696_v20 = vld [vmem:[%s4071_s1 + $0x10] sm:$0xff]  ;;  %v777_v38 = vld [vmem:[%s4074_s4 + $0x278] sm:$0xff]  ;;  %v2443_v53 = vpack.c.bf16 %v825_v33, %v824_v48  ;;  %v843_v56 = vld [vmem:[%s4074_s4 + $0x488] sm:$0xff] }
  0x9a   :  { %2406 = vmatpush3.bf16.msra.mxu0 %v2405_v36  ;;  %v776_v51 = vld [vmem:[%s4074_s4 + $0x270] sm:$0xff]  ;;  %v809_v54 = vld [vmem:[%s4074_s4 + $0x378] sm:$0xff]  ;;  %v874_v57 = vld [vmem:[%s4074_s4 + $0x580] sm:$0xff]  ;;  %v992_v59 = vcombine.high %v696_v20, %v696_v20  ;;  %v2447_v62 = vpack.c.bf16 %v843_v56, %v842_v55  ;;  %v3670_v6 = vrot.slane %v696_v20, %v2801_v13  ;;  %p2594_p3 = por %p2593_p2, %p2592_p1 }
  0x9b   :  { %2438 = vmatpush3.bf16.msra.mxu1 %v2437_v37  ;;  %2408 = vmatprep.subr.bf16.mxu0 %v2407_v39  ;;  %v808_v52 = vld [vmem:[%s4074_s4 + $0x370] sm:$0xff]  ;;  %v875_v58 = vld [vmem:[%s4074_s4 + $0x588] sm:$0xff]  ;;  %v2413_v60 = vpack.c.bf16 %v777_v38, %v776_v51  ;;  %v826_v63 = vld [vmem:[%s4074_s4 + $0x400] sm:$0xff] }
  0x9c   :  { %2440 = vmatprep.subr.bf16.mxu1 %v2439_v43  ;;  %v2445_v61 = vpack.c.bf16 %v809_v54, %v808_v52  ;;  %v827_v0 = vld [vmem:[%s4074_s4 + $0x408] sm:$0xff]  ;;  %v858_v1 = vld [vmem:[%s4074_s4 + $0x500] sm:$0xff]  ;;  %v2479_v2 = vpack.c.bf16 %v875_v58, %v874_v57  ;;  %v844_v4 = vld [vmem:[%s4074_s4 + $0x490] sm:$0xff]  ;;  %v3679_v8 = vrot.slane %v992_v59, %v2801_v13  ;;  %v1007_v21 = vcombine.high %v3670_v6, %v3670_v6  ;;  %p2595_p4 = pnand %p2594_p3, %p2588_p0 }
  0x9d   :  { %v859_v3 = vld [vmem:[%s4074_s4 + $0x508] sm:$0xff]  ;;  %v845_v5 = vld [vmem:[%s4074_s4 + $0x498] sm:$0xff]  ;;  %v876_v7 = vld [vmem:[%s4074_s4 + $0x590] sm:$0xff]  ;;  %v2449_v9 = vpack.c.bf16 %v827_v0, %v826_v63 }
  0x9e   :  { %2410 = vmatpush3.bf16.msra.mxu0 %v2409_v45  ;;  %v877_v30 = vld [vmem:[%s4074_s4 + $0x598] sm:$0xff]  ;;  %v2481_v10 = vpack.c.bf16 %v859_v3, %v858_v1  ;;  %v2451_v11 = vpack.c.bf16 %v845_v5, %v844_v4  ;;  %v828_v12 = vld [vmem:[%s4074_s4 + $0x410] sm:$0xff]  ;;  %v846_v18 = vld [vmem:[%s4074_s4 + $0x4a0] sm:$0xff]  ;;  %v1008_v24 = vcombine.high %v3679_v8, %v3679_v8 }
  0x9f   :  { %2442 = vmatpush3.bf16.msra.mxu1 %v2441_v49  ;;  %2412 = vmatprep.subr.bf16.mxu0 %v2411_v50  ;;  %v829_v14 = vld [vmem:[%s4074_s4 + $0x418] sm:$0xff]  ;;  %v860_v15 = vld [vmem:[%s4074_s4 + $0x510] sm:$0xff]  ;;  %v2483_v16 = vpack.c.bf16 %v877_v30, %v876_v7  ;;  %v847_v19 = vld [vmem:[%s4074_s4 + $0x4a8] sm:$0xff] }
  0xa0   :  { %2444 = vmatprep.subr.bf16.mxu1 %v2443_v53  ;;  %v861_v17 = vld [vmem:[%s4074_s4 + $0x518] sm:$0xff]  ;;  %v878_v22 = vld [vmem:[%s4074_s4 + $0x5a0] sm:$0xff]  ;;  %v879_v23 = vld [vmem:[%s4074_s4 + $0x5a8] sm:$0xff]  ;;  %v2453_v25 = vpack.c.bf16 %v829_v14, %v828_v12  ;;  %v2455_v27 = vpack.c.bf16 %v847_v19, %v846_v18 }
  0xa1   :  { %v2485_v26 = vpack.c.bf16 %v861_v17, %v860_v15  ;;  %v831_v28 = vld [vmem:[%s4074_s4 + $0x428] sm:$0xff]  ;;  %v862_v31 = vld [vmem:[%s4074_s4 + $0x520] sm:$0xff]  ;;  %v2487_v32 = vpack.c.bf16 %v879_v23, %v878_v22  ;;  %v848_v35 = vld [vmem:[%s4074_s4 + $0x4b0] sm:$0xff] }
  0xa2   :  { %2414 = vmatpush3.bf16.msra.mxu0 %v2413_v60  ;;  %v849_v36 = vld [vmem:[%s4074_s4 + $0x4b8] sm:$0xff]  ;;  %v880_v37 = vld [vmem:[%s4074_s4 + $0x5b0] sm:$0xff]  ;;  %v850_v33 = vld [vmem:[%s4074_s4 + $0x4c0] sm:$0xff] }
  0xa3   :  { %2446 = vmatpush3.bf16.msra.mxu1 %v2445_v61  ;;  %2448 = vmatprep.subr.bf16.mxu0 %v2447_v62  ;;  %v881_v39 = vld [vmem:[%s4074_s4 + $0x5b8] sm:$0xff]  ;;  %v2459_v42 = vpack.c.bf16 %v849_v36, %v848_v35  ;;  %v832_v43 = vld [vmem:[%s4074_s4 + $0x430] sm:$0xff]  ;;  %v851_v45 = vld [vmem:[%s4074_s4 + $0x4c8] sm:$0xff] }
  0xa4   :  { %2480 = vmatprep.subr.bf16.mxu1 %v2479_v2  ;;  %v833_v44 = vld [vmem:[%s4074_s4 + $0x438] sm:$0xff]  ;;  %v864_v46 = vld [vmem:[%s4074_s4 + $0x530] sm:$0xff]  ;;  %v2491_v47 = vpack.c.bf16 %v881_v39, %v880_v37  ;;  %v882_v20 = vld [vmem:[%s4074_s4 + $0x5c0] sm:$0xff]  ;;  %v2463_v38 = vpack.c.bf16 %v851_v45, %v850_v33 }
  0xa5   :  { %1247 = vmatmul.mubr.f32.vlgmr.msra.gmra.mrb[8].mxu0 %v3463_v29  ;;  %v830_v29 = vld [vmem:[%s4074_s4 + $0x420] sm:$0xff]  ;;  %v865_v48 = vld [vmem:[%s4074_s4 + $0x538] sm:$0xff]  ;;  %v883_v49 = vld [vmem:[%s4074_s4 + $0x5c8] sm:$0xff]  ;;  %v2461_v50 = vpack.c.bf16 %v833_v44, %v832_v43 }
  0xa6   :  { %2450 = vmatpush3.bf16.msra.mxu0 %v2449_v9  ;;  %1317 = vmatmul.mubr.f32.vlgmr.msra.gmra.mrb[8].mxu1 %v3472_v34  ;;  %v863_v34 = vld [vmem:[%s4074_s4 + $0x528] sm:$0xff]  ;;  %v2457_v40 = vpack.c.bf16 %v831_v28, %v830_v29  ;;  %v2493_v51 = vpack.c.bf16 %v865_v48, %v864_v46  ;;  %v834_v52 = vld [vmem:[%s4074_s4 + $0x440] sm:$0xff]  ;;  %v2495_v55 = vpack.c.bf16 %v883_v49, %v882_v20  ;;  %v852_v57 = vld [vmem:[%s4074_s4 + $0x4d0] sm:$0xff] }
  0xa7   :  { %2482 = vmatpush3.bf16.msra.mxu1 %v2481_v10  ;;  %2452 = vmatprep.subr.bf16.mxu0 %v2451_v11  ;;  %v2489_v41 = vpack.c.bf16 %v863_v34, %v862_v31  ;;  %v835_v53 = vld [vmem:[%s4074_s4 + $0x448] sm:$0xff]  ;;  %v866_v54 = vld [vmem:[%s4074_s4 + $0x540] sm:$0xff]  ;;  %v853_v58 = vld [vmem:[%s4074_s4 + $0x4d8] sm:$0xff] }
  0xa8   :  { %2484 = vmatprep.subr.bf16.mxu1 %v2483_v16  ;;  %1386 = vmatprep.mubr.f32.mxu0 %v1007_v21  ;;  %v867_v56 = vld [vmem:[%s4074_s4 + $0x548] sm:$0xff]  ;;  %v884_v59 = vld [vmem:[%s4074_s4 + $0x5d0] sm:$0xff]  ;;  %v885_v60 = vld [vmem:[%s4074_s4 + $0x5d8] sm:$0xff]  ;;  %v2465_v61 = vpack.c.bf16 %v835_v53, %v834_v52  ;;  %v2467_v63 = vpack.c.bf16 %v853_v58, %v852_v57 }
  0xa9   :  { %1456 = vmatprep.mubr.f32.mxu1 %v1008_v24  ;;  %v2497_v62 = vpack.c.bf16 %v867_v56, %v866_v54  ;;  %v836_v0 = vld [vmem:[%s4074_s4 + $0x450] sm:$0xff]  ;;  %v837_v1 = vld [vmem:[%s4074_s4 + $0x458] sm:$0xff]  ;;  %v2499_v3 = vpack.c.bf16 %v885_v60, %v884_v59  ;;  %v854_v5 = vld [vmem:[%s4074_s4 + $0x4e0] sm:$0xff] }
  0xaa   :  { %2454 = vmatpush3.bf16.msra.mxu0 %v2453_v25  ;;  %v868_v2 = vld [vmem:[%s4074_s4 + $0x550] sm:$0xff]  ;;  %v869_v4 = vld [vmem:[%s4074_s4 + $0x558] sm:$0xff]  ;;  %v855_v7 = vld [vmem:[%s4074_s4 + $0x4e8] sm:$0xff]  ;;  %v2469_v10 = vpack.c.bf16 %v837_v1, %v836_v0 }
  0xab   :  { %2486 = vmatpush3.bf16.msra.mxu1 %v2485_v26  ;;  %2456 = vmatprep.subr.bf16.mxu0 %v2455_v27  ;;  %v886_v30 = vld [vmem:[%s4074_s4 + $0x5e0] sm:$0xff]  ;;  %v887_v9 = vld [vmem:[%s4074_s4 + $0x5e8] sm:$0xff]  ;;  %v2501_v11 = vpack.c.bf16 %v869_v4, %v868_v2  ;;  %v2471_v12 = vpack.c.bf16 %v855_v7, %v854_v5  ;;  %v856_v19 = vld [vmem:[%s4074_s4 + $0x4f0] sm:$0xff] }
  0xac   :  { %2488 = vmatprep.subr.bf16.mxu1 %v2487_v32  ;;  %v838_v14 = vld [vmem:[%s4074_s4 + $0x460] sm:$0xff]  ;;  %v839_v15 = vld [vmem:[%s4074_s4 + $0x468] sm:$0xff]  ;;  %v2503_v17 = vpack.c.bf16 %v887_v9, %v886_v30  ;;  %v857_v21 = vld [vmem:[%s4074_s4 + $0x4f8] sm:$0xff] }
  0xad   :  { %v870_v16 = vld [vmem:[%s4074_s4 + $0x560] sm:$0xff]  ;;  %v871_v18 = vld [vmem:[%s4074_s4 + $0x568] sm:$0xff]  ;;  %v888_v22 = vld [vmem:[%s4074_s4 + $0x5f0] sm:$0xff]  ;;  %v2473_v24 = vpack.c.bf16 %v839_v15, %v838_v14  ;;  %v2475_v27 = vpack.c.bf16 %v857_v21, %v856_v19 }
  0xae   :  { %2458 = vmatpush3.bf16.msra.mxu0 %v2457_v40  ;;  %v889_v23 = vld [vmem:[%s4074_s4 + $0x5f8] sm:$0xff]  ;;  %v2505_v26 = vpack.c.bf16 %v871_v18, %v870_v16  ;;  %v840_v29 = vld [vmem:[%s4074_s4 + $0x470] sm:$0xff]  ;;  %v906_v35 = vld [vmem:[%s4074_s4 + $0x680] sm:$0xff] }
  0xaf   :  { %2490 = vmatpush3.bf16.msra.mxu1 %v2489_v41  ;;  %2460 = vmatprep.subr.bf16.mxu0 %v2459_v42  ;;  %v697_v25 = vld [vmem:[%s4071_s1 + $0x18] sm:$0xff]  ;;  %v872_v31 = vld [vmem:[%s4074_s4 + $0x570] sm:$0xff]  ;;  %v2507_v32 = vpack.c.bf16 %v889_v23, %v888_v22  ;;  %v907_v36 = vld [vmem:[%s4074_s4 + $0x688] sm:$0xff] }
  0xb0   :  { %2492 = vmatprep.subr.bf16.mxu1 %v2491_v47  ;;  %v841_v28 = vld [vmem:[%s4074_s4 + $0x478] sm:$0xff]  ;;  %v938_v37 = vld [vmem:[%s4074_s4 + $0x780] sm:$0xff]  ;;  %v939_v39 = vld [vmem:[%s4074_s4 + $0x788] sm:$0xff]  ;;  %v1009_v40 = vcombine.high %v697_v25, %v697_v25  ;;  %v2511_v43 = vpack.c.bf16 %v907_v36, %v906_v35  ;;  %v3877_v49 = vrot.slane %v697_v25, %v2801_v13 }
  0xb1   :  { %v873_v34 = vld [vmem:[%s4074_s4 + $0x578] sm:$0xff]  ;;  %v2477_v41 = vpack.c.bf16 %v841_v28, %v840_v29  ;;  %v890_v44 = vld [vmem:[%s4074_s4 + $0x600] sm:$0xff]  ;;  %v891_v46 = vld [vmem:[%s4074_s4 + $0x608] sm:$0xff]  ;;  %v2543_v48 = vpack.c.bf16 %v939_v39, %v938_v37 }
  0xb2   :  { %2462 = vmatpush3.bf16.msra.mxu0 %v2461_v50  ;;  %v2509_v42 = vpack.c.bf16 %v873_v34, %v872_v31  ;;  %v922_v47 = vld [vmem:[%s4074_s4 + $0x700] sm:$0xff]  ;;  %v923_v33 = vld [vmem:[%s4074_s4 + $0x708] sm:$0xff]  ;;  %v908_v45 = vld [vmem:[%s4074_s4 + $0x690] sm:$0xff]  ;;  %v2513_v52 = vpack.c.bf16 %v891_v46, %v890_v44 }
  0xb3   :  { %2494 = vmatpush3.bf16.msra.mxu1 %v2493_v51  ;;  %2464 = vmatprep.subr.bf16.mxu0 %v2463_v38  ;;  %v909_v20 = vld [vmem:[%s4074_s4 + $0x698] sm:$0xff]  ;;  %v940_v50 = vld [vmem:[%s4074_s4 + $0x790] sm:$0xff]  ;;  %v3886_v38 = vrot.slane %v1009_v40, %v2801_v13  ;;  %v2545_v53 = vpack.c.bf16 %v923_v33, %v922_v47  ;;  %v910_v59 = vld [vmem:[%s4074_s4 + $0x6a0] sm:$0xff] }
  0xb4   :  { %2496 = vmatprep.subr.bf16.mxu1 %v2495_v55  ;;  %v941_v51 = vld [vmem:[%s4074_s4 + $0x798] sm:$0xff]  ;;  %v2515_v54 = vpack.c.bf16 %v909_v20, %v908_v45  ;;  %v892_v55 = vld [vmem:[%s4074_s4 + $0x610] sm:$0xff]  ;;  %v911_v60 = vld [vmem:[%s4074_s4 + $0x6a8] sm:$0xff] }
  0xb5   :  { %v893_v56 = vld [vmem:[%s4074_s4 + $0x618] sm:$0xff]  ;;  %v924_v57 = vld [vmem:[%s4074_s4 + $0x710] sm:$0xff]  ;;  %v2547_v13 = vpack.c.bf16 %v941_v51, %v940_v50  ;;  %v1025_v0 = vcombine.high %v3886_v38, %v3886_v38  ;;  %v895_v4 = vld [vmem:[%s4074_s4 + $0x628] sm:$0xff] }
  0xb6   :  { %2466 = vmatpush3.bf16.msra.mxu0 %v2465_v61  ;;  %v925_v58 = vld [vmem:[%s4074_s4 + $0x718] sm:$0xff]  ;;  %v1024_v61 = vcombine.high %v3877_v49, %v3877_v49  ;;  %v2517_v1 = vpack.c.bf16 %v893_v56, %v892_v55  ;;  %v926_v5 = vld [vmem:[%s4074_s4 + $0x720] sm:$0xff]  ;;  %v912_v30 = vld [vmem:[%s4074_s4 + $0x6b0] sm:$0xff] }
  0xb7   :  { %2498 = vmatpush3.bf16.msra.mxu1 %v2497_v62  ;;  %2468 = vmatprep.subr.bf16.mxu0 %v2467_v63  ;;  %v942_v62 = vld [vmem:[%s4074_s4 + $0x7a0] sm:$0xff]  ;;  %v943_v63 = vld [vmem:[%s4074_s4 + $0x7a8] sm:$0xff]  ;;  %v2549_v2 = vpack.c.bf16 %v925_v58, %v924_v57  ;;  %v913_v9 = vld [vmem:[%s4074_s4 + $0x6b8] sm:$0xff] }
  0xb8   :  { %2500 = vmatprep.subr.bf16.mxu1 %v2499_v3  ;;  %v2519_v3 = vpack.c.bf16 %v911_v60, %v910_v59  ;;  %v2551_v7 = vpack.c.bf16 %v943_v63, %v942_v62  ;;  %v2523_v15 = vpack.c.bf16 %v913_v9, %v912_v30  ;;  %v896_v16 = vld [vmem:[%s4074_s4 + $0x630] sm:$0xff]  ;;  %v929_v21 = vld [vmem:[%s4074_s4 + $0x738] sm:$0xff]  ;;  %v914_v22 = vld [vmem:[%s4074_s4 + $0x6c0] sm:$0xff] }
  0xb9   :  { %v928_v18 = vld [vmem:[%s4074_s4 + $0x730] sm:$0xff]  ;;  %v915_v23 = vld [vmem:[%s4074_s4 + $0x6c8] sm:$0xff]  ;;  %v898_v28 = vld [vmem:[%s4074_s4 + $0x640] sm:$0xff] }
  0xba   :  { %2470 = vmatpush3.bf16.msra.mxu0 %v2469_v10  ;;  %v944_v10 = vld [vmem:[%s4074_s4 + $0x7b0] sm:$0xff]  ;;  %v947_v25 = vld [vmem:[%s4074_s4 + $0x7c8] sm:$0xff]  ;;  %v2527_v29 = vpack.c.bf16 %v915_v23, %v914_v22  ;;  %v917_v37 = vld [vmem:[%s4074_s4 + $0x6d8] sm:$0xff] }
  0xbb   :  { %2502 = vmatpush3.bf16.msra.mxu1 %v2501_v11  ;;  %2472 = vmatprep.subr.bf16.mxu0 %v2471_v12  ;;  %v945_v11 = vld [vmem:[%s4074_s4 + $0x7b8] sm:$0xff]  ;;  %v899_v31 = vld [vmem:[%s4074_s4 + $0x648] sm:$0xff]  ;;  %v916_v36 = vld [vmem:[%s4074_s4 + $0x6d0] sm:$0xff] }
  0xbc   :  { %2504 = vmatprep.subr.bf16.mxu1 %v2503_v17  ;;  %v897_v17 = vld [vmem:[%s4074_s4 + $0x638] sm:$0xff]  ;;  %v2555_v19 = vpack.c.bf16 %v945_v11, %v944_v10  ;;  %v931_v35 = vld [vmem:[%s4074_s4 + $0x748] sm:$0xff]  ;;  %v948_v39 = vld [vmem:[%s4074_s4 + $0x7d0] sm:$0xff] }
  0xbd   :  { %v949_v40 = vld [vmem:[%s4074_s4 + $0x7d8] sm:$0xff]  ;;  %v900_v44 = vld [vmem:[%s4074_s4 + $0x650] sm:$0xff]  ;;  %v918_v45 = vld [vmem:[%s4074_s4 + $0x6e0] sm:$0xff] }
  0xbe   :  { %2474 = vmatpush3.bf16.msra.mxu0 %v2473_v24  ;;  %v946_v24 = vld [vmem:[%s4074_s4 + $0x7c0] sm:$0xff]  ;;  %v901_v46 = vld [vmem:[%s4074_s4 + $0x658] sm:$0xff]  ;;  %v932_v47 = vld [vmem:[%s4074_s4 + $0x750] sm:$0xff] }
  0xbf   :  { %2506 = vmatpush3.bf16.msra.mxu1 %v2505_v26  ;;  %2476 = vmatprep.subr.bf16.mxu0 %v2475_v27  ;;  %v2525_v26 = vpack.c.bf16 %v897_v17, %v896_v16  ;;  %v2557_v27 = vpack.c.bf16 %v929_v21, %v928_v18  ;;  %v2559_v34 = vpack.c.bf16 %v947_v25, %v946_v24  ;;  %v933_v33 = vld [vmem:[%s4074_s4 + $0x758] sm:$0xff]  ;;  %v919_v20 = vld [vmem:[%s4074_s4 + $0x6e8] sm:$0xff]  ;;  %v950_v50 = vld [vmem:[%s4074_s4 + $0x7e0] sm:$0xff] }
  0xc0   :  { %2508 = vmatprep.subr.bf16.mxu1 %v2507_v32  ;;  %v930_v32 = vld [vmem:[%s4074_s4 + $0x740] sm:$0xff]  ;;  %v951_v51 = vld [vmem:[%s4074_s4 + $0x7e8] sm:$0xff]  ;;  %v920_v59 = vld [vmem:[%s4074_s4 + $0x6f0] sm:$0xff] }
  0xc1   :  { %v902_v55 = vld [vmem:[%s4074_s4 + $0x660] sm:$0xff]  ;;  %v903_v56 = vld [vmem:[%s4074_s4 + $0x668] sm:$0xff]  ;;  %v921_v60 = vld [vmem:[%s4074_s4 + $0x6f8] sm:$0xff] }
  0xc2   :  { %2478 = vmatpush3.bf16.msra.mxu0 %v2477_v41  ;;  %v2529_v41 = vpack.c.bf16 %v899_v31, %v898_v28  ;;  %v934_v57 = vld [vmem:[%s4074_s4 + $0x760] sm:$0xff]  ;;  %v935_v58 = vld [vmem:[%s4074_s4 + $0x768] sm:$0xff]  ;;  %v953_v62 = vld [vmem:[%s4074_s4 + $0x7f8] sm:$0xff]  ;;  %v2537_v63 = vpack.c.bf16 %v903_v56, %v902_v55 }
  0xc3   :  { %2510 = vmatpush3.bf16.msra.mxu1 %v2509_v42  ;;  %2512 = vmatprep.subr.bf16.mxu0 %v2511_v43  ;;  %v2561_v42 = vpack.c.bf16 %v931_v35, %v930_v32  ;;  %v2531_v43 = vpack.c.bf16 %v917_v37, %v916_v36  ;;  %v1626_v9 = vld [vmem:[%s4073_s3] ss:$0 sm:$0xff] }
  0xc4   :  { %2544 = vmatprep.subr.bf16.mxu1 %v2543_v48  ;;  %v2563_v48 = vpack.c.bf16 %v949_v40, %v948_v39 }
  0xc5   :  { %1387 = vmatmul.mubr.f32.vlgmr.msra.gmra.mrb[10].mxu0 %v3670_v6  ;;  %v894_v6 = vld [vmem:[%s4074_s4 + $0x620] sm:$0xff] }
  0xc6   :  { %2514 = vmatpush3.bf16.msra.mxu0 %v2513_v52  ;;  %1457 = vmatmul.mubr.f32.vlgmr.msra.gmra.mrb[10].mxu1 %v3679_v8  ;;  %v927_v8 = vld [vmem:[%s4074_s4 + $0x728] sm:$0xff]  ;;  %v2521_v12 = vpack.c.bf16 %v895_v4, %v894_v6  ;;  %v2533_v52 = vpack.c.bf16 %v901_v46, %v900_v44  ;;  %v936_v4 = vld [vmem:[%s4074_s4 + $0x770] sm:$0xff] }
  0xc7   :  { %2546 = vmatpush3.bf16.msra.mxu1 %v2545_v53  ;;  %2516 = vmatprep.subr.bf16.mxu0 %v2515_v54  ;;  %v2553_v14 = vpack.c.bf16 %v927_v8, %v926_v5  ;;  %v2565_v53 = vpack.c.bf16 %v933_v33, %v932_v47  ;;  %v2535_v54 = vpack.c.bf16 %v919_v20, %v918_v45  ;;  %v937_v5 = vld [vmem:[%s4074_s4 + $0x778] sm:$0xff] }
  0xc8   :  { %2548 = vmatprep.subr.bf16.mxu1 %v2547_v13  ;;  %1526 = vmatprep.mubr.f32.mxu0 %v1024_v61  ;;  %v2567_v13 = vpack.c.bf16 %v951_v51, %v950_v50  ;;  %v952_v61 = vld [vmem:[%s4074_s4 + $0x7f0] sm:$0xff]  ;;  %v2573_v8 = vpack.c.bf16 %v937_v5, %v936_v4 }
  0xc9   :  { %1596 = vmatprep.mubr.f32.mxu1 %v1025_v0  ;;  %v2569_v0 = vpack.c.bf16 %v935_v58, %v934_v57  ;;  %v2571_v6 = vpack.c.bf16 %v953_v62, %v952_v61 }
  0xca   :  { %2518 = vmatpush3.bf16.msra.mxu0 %v2517_v1  ;;  %v2539_v1 = vpack.c.bf16 %v921_v60, %v920_v59 }
  0xcb   :  { %2550 = vmatpush3.bf16.msra.mxu1 %v2549_v2  ;;  %2520 = vmatprep.subr.bf16.mxu0 %v2519_v3  ;;  %v904_v2 = vld [vmem:[%s4074_s4 + $0x670] sm:$0xff]  ;;  %v905_v3 = vld [vmem:[%s4074_s4 + $0x678] sm:$0xff] }
  0xcc   :  { %2552 = vmatprep.subr.bf16.mxu1 %v2551_v7  ;;  %v2541_v7 = vpack.c.bf16 %v905_v3, %v904_v2 }
  0xce   :  { %2522 = vmatpush3.bf16.msra.mxu0 %v2521_v12 }
  0xcf   :  { %2554 = vmatpush3.bf16.msra.mxu1 %v2553_v14  ;;  %2524 = vmatprep.subr.bf16.mxu0 %v2523_v15 }
  0xd0   :  { %2556 = vmatprep.subr.bf16.mxu1 %v2555_v19 }
  0xd2   :  { %2526 = vmatpush3.bf16.msra.mxu0 %v2525_v26 }
  0xd3   :  { %2558 = vmatpush3.bf16.msra.mxu1 %v2557_v27  ;;  %2528 = vmatprep.subr.bf16.mxu0 %v2527_v29 }
  0xd4   :  { %2560 = vmatprep.subr.bf16.mxu1 %v2559_v34 }
  0xd6   :  { %2530 = vmatpush3.bf16.msra.mxu0 %v2529_v41 }
  0xd7   :  { %2562 = vmatpush3.bf16.msra.mxu1 %v2561_v42  ;;  %2532 = vmatprep.subr.bf16.mxu0 %v2531_v43 }
  0xd8   :  { %2564 = vmatprep.subr.bf16.mxu1 %v2563_v48 }
  0xda   :  { %2534 = vmatpush3.bf16.msra.mxu0 %v2533_v52 }
  0xdb   :  { %2566 = vmatpush3.bf16.msra.mxu1 %v2565_v53  ;;  %2536 = vmatprep.subr.bf16.mxu0 %v2535_v54 }
  0xdc   :  { %2568 = vmatprep.subr.bf16.mxu1 %v2567_v13 }
  0xde   :  { %2538 = vmatpush3.bf16.msra.mxu0 %v2537_v63 }
  0xdf   :  { %2570 = vmatpush3.bf16.msra.mxu1 %v2569_v0  ;;  %2540 = vmatprep.subr.bf16.mxu0 %v2539_v1  ;;  %v1627_v0 = vld [vmem:[%s4075_s5] ss:$0 sm:$0xff] }
  0xe0   :  { %2572 = vmatprep.subr.bf16.mxu1 %v2571_v6 }
  0xe2   :  { %2542 = vmatpush3.bf16.msra.mxu0 %v2541_v7 }
  0xe3   :  { %2574 = vmatpush3.bf16.msra.mxu1 %v2573_v8 }
  0xe5   :  { %1527 = vmatmul.mubr.f32.vlgmr.msra.gmra.mrb[12].mxu0 %v3877_v49 }
  0xe6   :  { %1597 = vmatmul.mubr.f32.vlgmr.msra.gmra.mrb[12].mxu1 %v3886_v38 }
  0xf8   :  { %v1660_v30 = vpop.f32.mrb[0].mxu0 }
  0xf9   :  { %v1661_v10 = vpop.f32.mrb[1].mxu0  ;;  %v1695_v11 = vpop.f32.mrb[0].mxu1 }
  0xfa   :  { %v1662_v12 = vadd.f32 %v1661_v10, %v1660_v30  ;;  %v1696_v14 = vpop.f32.mrb[1].mxu1 }
  0xfb   :  { %v1697_v15 = vadd.f32 %v1696_v14, %v1695_v11 }
  0xfc   :  { %v341_v16 = vadd.f32 %v1662_v12, %v1626_v9 }
  0xfe   :  { %v411_v17 = vadd.f32 %v1697_v15, %v341_v16 }
 0x118   :  { %v1730_v18 = vpop.f32.mrb[2].mxu0 }
 0x119   :  { %v1731_v19 = vpop.f32.mrb[3].mxu0  ;;  %v1765_v21 = vpop.f32.mrb[2].mxu1 }
 0x11a   :  { %v1732_v22 = vadd.f32 %v1731_v19, %v1730_v18  ;;  %v1766_v23 = vpop.f32.mrb[3].mxu1 }
 0x11b   :  { %v1767_v49 = vadd.f32 %v1766_v23, %v1765_v21 }
 0x11c   :  { %v481_v24 = vadd.f32 %v1732_v22, %v411_v17 }
 0x11e   :  { %v551_v38 = vadd.f32 %v1767_v49, %v481_v24 }
 0x138   :  { %v1800_v25 = vpop.f32.mrb[4].mxu0 }
 0x139   :  { %v1801_v26 = vpop.f32.mrb[5].mxu0  ;;  %v690_v27 = vpop.f32.mrb[4].mxu1 }
 0x13a   :  { %v1802_v29 = vadd.f32 %v1801_v26, %v1800_v25  ;;  %v2134_v28 = vpop.f32.mrb[5].mxu1 }
 0x13c   :  { %v621_v31 = vadd.f32 %v1802_v29, %v551_v38 }
 0x13e   :  { %v691_v32 = vadd.f32 %v690_v27, %v621_v31 }
 0x158   :  { %v1852_v34 = vpop.f32.mrb[6].mxu0 }
 0x159   :  { %v1887_v35 = vpop.f32.mrb[6].mxu1  ;;  %v1853_v36 = vpop.f32.mrb[7].mxu0 }
 0x15a   :  { %v1854_v37 = vadd.f32 %v1853_v36, %v1852_v34  ;;  %v1888_v39 = vpop.f32.mrb[7].mxu1 }
 0x15b   :  { %v1889_v40 = vadd.f32 %v1888_v39, %v1887_v35 }
 0x15d   :  { %v1179_v41 = vadd.f32 %v1889_v40, %v1854_v37 }
 0x178   :  { %v1922_v42 = vpop.f32.mrb[8].mxu0 }
 0x179   :  { %v1923_v43 = vpop.f32.mrb[9].mxu0  ;;  %v1957_v44 = vpop.f32.mrb[8].mxu1 }
 0x17a   :  { %v1924_v46 = vadd.f32 %v1923_v43, %v1922_v42  ;;  %v1958_v47 = vpop.f32.mrb[9].mxu1 }
 0x17b   :  { %v1959_v48 = vadd.f32 %v1958_v47, %v1957_v44 }
 0x17c   :  { %v1249_v33 = vadd.f32 %v1924_v46, %v1179_v41 }
 0x17e   :  { %v1319_v45 = vadd.f32 %v1959_v48, %v1249_v33 }
 0x198   :  { %v1992_v20 = vpop.f32.mrb[10].mxu0 }
 0x199   :  { %v1993_v50 = vpop.f32.mrb[11].mxu0  ;;  %v2027_v51 = vpop.f32.mrb[10].mxu1 }
 0x19a   :  { %v1994_v52 = vadd.f32 %v1993_v50, %v1992_v20  ;;  %v2028_v53 = vpop.f32.mrb[11].mxu1 }
 0x19b   :  { %v2029_v54 = vadd.f32 %v2028_v53, %v2027_v51 }
 0x19c   :  { %v1389_v55 = vadd.f32 %v1994_v52, %v1319_v45 }
 0x19e   :  { %v1459_v56 = vadd.f32 %v2029_v54, %v1389_v55 }
 0x1b8   :  { %v2062_v57 = vpop.f32.mrb[12].mxu0 }
 0x1b9   :  { %v2063_v13 = vpop.f32.mrb[13].mxu0  ;;  %v2097_v58 = vpop.f32.mrb[12].mxu1 }
 0x1ba   :  { %v2064_v59 = vadd.f32 %v2063_v13, %v2062_v57  ;;  %v2098_v60 = vpop.f32.mrb[13].mxu1 }
 0x1bb   :  { %v2099_v61 = vadd.f32 %v2098_v60, %v2097_v58 }
 0x1bc   :  { %v1529_v62 = vadd.f32 %v2064_v59, %v1459_v56 }
 0x1be   :  { %v1599_v63 = vadd.f32 %v2099_v61, %v1529_v62 }
 0x1c0   :  { %v1602_v1 = vadd.f32 %v1599_v63, %v691_v32 }
 0x1c2   :  { %v1610_v2 = vadd.f32 %v1627_v0, %v1602_v1 }
 0x1c4   :  { %1611 = vst [vmem:[#allocation2] sm:$0x3] %v1610_v2 }
 0x1c5   :  { %2598 = shalt.err (!%p2595_p4)
}
 0x1c6   :  { %s2599_s16 = scalar_lea.hbm %s4076_s6, 32 }
 0x1c7   :  { %p2600_p5 = scmp.ne.s32.totalorder %s4076_s6, %s2599_s16  ;;  %p2603_p6 = scmp.lt.u32.totalorder %s2599_s16, %s4076_s6 }
 0x1c9   :  { %p2605_p7 = pnand %p2603_p6, %p2600_p5 }
 0x1cb   :  { %2608 = shalt.err (!%p2605_p7)
}
 0x1cc   :  { %1621 = dma.vmem_to_hbm [thread:$0]  %s1619_s13, 32, %s4076_s6, [#allocation3]  }
 0x1cd   :  { %2609 = dma.done.wait [#allocation3], 32  }
 0x1ce   :  { %2610 = vsyncadd [#allocation3], 4294967264 }
 0x1cf   :  { %1625 = vsyncpa [#allocation3], 1 }

// kernel: efficient_resnet_forward.4
= control target key start
LH: loop header
LB: loop body
LE: loop exit
PB: predicated region body
PF: predicated region fallthrough
CT: control target
= control target key end

     0   :  { %s2585_s18 = smov 0   ;;  %s2587_s19 = smov 0   ;;  %s3292_s0 = inlined_call_operand.vmem [shape: bf16[2,64,256], index: 0, kind: input, shape index: {}]   ;;  %s3293_s1 = inlined_call_operand.vmem [shape: bf16[256,64], index: 1, kind: input, shape index: {}]   ;;  %s3294_s2 = inlined_call_operand.vmem [shape: f32[1,64], index: 2, kind: input, shape index: {}]   ;;  %s3295_s3 = inlined_call_operand.vmem [shape: bf16[64,2048], index: 3, kind: input, shape index: {}]   ;;  %s3296_s4 = inlined_call_operand.vmem [shape: f32[1,2048], index: 4, kind: input, shape index: {}]   ;;  %s3297_s5 = inlined_call_operand.vmem [shape: f32[2,1,2048], index: 5, kind: output, shape index: {}]  }
   0x1   :  { %s2589_s20 = smov 0  }
   0x2 LB: > { %s27_s21 = sadd.s32 1, %s2547_s19  ;;  %p2298_p0 = scmp.ge.s32.totalorder %s2551_s20, 1  ;;  %s2551_s20 = sphi %s2589_s20, %s15_s20   ;;  %s2547_s19 = sphi %s2587_s19, %s3299_s19   ;;  %s2543_s18 = sphi %s2585_s18, %s3298_s18  }
   0x3   : > { %p29_p1 = scmp.ge.s32.totalorder %s27_s21, 2  ;;  %p207_p2 = scmp.lt.s32.totalorder %s2551_s20, 3 }
   0x5   : > { %s3301_s21 = smov (%p29_p1, %s27_s21), 0  ;;  %p208_p3 = pnand %p2298_p0, %p207_p2 }
   0x6   : > { %v2501_v0 = vld [vmem:[%s3293_s1 + $0x40] sm:$0xff] (!%p208_p3)   ;;  %v2503_v2 = vld [vmem:[%s3293_s1 + $0x48] sm:$0xff] (!%p208_p3)   ;;  %p240_p4 = scmp.lt.s32.totalorder (!%p208_p3), %s2543_s18, 1  ;;  %v2505_v4 = vld [vmem:[%s3293_s1 + $0x50] sm:$0xff] (!%p208_p3)   ;;  %v2553_v56 = vmov (!%p208_p3), 0   ;;  %vm989_vm0 = vcmask (!%p208_p3), 523264  }
   0x7   : > { %211 = sbr.rel (%p208_p3) target bundleno = 652 (0x28c), region = 40  ;;  %v2502_v1 = vld [vmem:[%s3293_s1] sm:$0xff] (!%p208_p3)   ;;  %2426 = vmatprep.subr.bf16.mxu0 (!%p208_p3), %v2501_v0  ;;  %v2504_v3 = vld [vmem:[%s3293_s1 + $0x8] sm:$0xff] (!%p208_p3)   ;;  %v2506_v5 = vld [vmem:[%s3293_s1 + $0x10] sm:$0xff] (!%p208_p3)   ;;  %1034 = vmatprep.mubr.bf16.mxu1 (!%p208_p3), %v2553_v56 }
   0x8   : > { %2427 = vmatpush3.bf16.msra.mxu0 (!%p208_p3), %v2502_v1  ;;  %v2507_v6 = vld [vmem:[%s3293_s1 + $0x58] sm:$0xff] (!%p208_p3)   ;;  %v2509_v8 = vld [vmem:[%s3293_s1 + $0x60] sm:$0xff] (!%p208_p3)   ;;  %v2511_v10 = vld [vmem:[%s3293_s1 + $0x68] sm:$0xff] (!%p208_p3)  }
   0x9   : > { %2428 = vmatprep.subr.bf16.mxu0 (!%p208_p3), %v2503_v2  ;;  %v2508_v7 = vld [vmem:[%s3293_s1 + $0x18] sm:$0xff] (!%p208_p3)   ;;  %v2510_v9 = vld [vmem:[%s3293_s1 + $0x20] sm:$0xff] (!%p208_p3)   ;;  %v2512_v12 = vld [vmem:[%s3293_s1 + $0x28] sm:$0xff] (!%p208_p3)  }
   0xa   : > { %v2513_v13 = vld [vmem:[%s3293_s1 + $0x70] sm:$0xff] (!%p208_p3)   ;;  %v521_v14 = vld [vmem:[%s3295_s3] sm:$0xff] (!%p208_p3)  ;;  %v2515_v21 = vld [vmem:[%s3293_s1 + $0x78] sm:$0xff] (!%p208_p3)  }
   0xb   : > { %v529_v15 = vld [vmem:[%s3295_s3 + $0x40] sm:$0xff] (!%p208_p3)  ;;  %v2514_v19 = vld [vmem:[%s3293_s1 + $0x30] sm:$0xff] (!%p208_p3)   ;;  %v2516_v25 = vld [vmem:[%s3293_s1 + $0x38] sm:$0xff] (!%p208_p3)  }
   0xc   : > { %2429 = vmatpush3.bf16.msra.mxu0 (!%p208_p3), %v2504_v3  ;;  %v2328_v16 = vcombine.high (!%p208_p3), %v521_v14, %v529_v15  ;;  %v2327_v17 = vcombine.low (!%p208_p3), %v521_v14, %v529_v15  ;;  %v537_v18 = vld [vmem:[%s3295_s3 + $0x80] sm:$0xff] (!%p208_p3)  ;;  %v523_v23 = vld [vmem:[%s3295_s3 + $0x10] sm:$0xff] (!%p208_p3)  ;;  %v522_v57 = vld [vmem:[%s3295_s3 + $0x8] sm:$0xff] (!%p208_p3) }
   0xd   : > { %2430 = vmatprep.subr.bf16.mxu0 (!%p208_p3), %v2505_v4  ;;  %v545_v20 = vld [vmem:[%s3295_s3 + $0xc0] sm:$0xff] (!%p208_p3)  ;;  %v531_v24 = vld [vmem:[%s3295_s3 + $0x50] sm:$0xff] (!%p208_p3)  ;;  %v530_v58 = vld [vmem:[%s3295_s3 + $0x48] sm:$0xff] (!%p208_p3) }
   0xe   : > { %s3303_s18 = smov (!%p240_p4, %s2543_s18), 1  ;;  %1002 = vmatprep.subr.bf16.mxu1 %v2328_v16  ;;  %v2344_v22 = vcombine.high %v537_v18, %v545_v20  ;;  %v2332_v26 = vcombine.high %v523_v23, %v531_v24  ;;  %v2331_v29 = vcombine.low %v523_v23, %v531_v24  ;;  %v539_v35 = vld [vmem:[%s3295_s3 + $0x90] sm:$0xff]  ;;  %v2343_v38 = vcombine.low %v537_v18, %v545_v20  ;;  %v553_v40 = vld [vmem:[%s3295_s3 + $0x100] sm:$0xff]  ;;  %v554_v23 = vld [vmem:[%s3295_s3 + $0x108] sm:$0xff] }
   0xf   : > { %s2425_s13 = sshll.u32 %s3303_s18, 6  ;;  %1003 = vmatpush1.bf16.msra.mxu1 %v2327_v17  ;;  %v547_v36 = vld [vmem:[%s3295_s3 + $0xd0] sm:$0xff]  ;;  %v561_v41 = vld [vmem:[%s3295_s3 + $0x140] sm:$0xff]  ;;  %v2329_v59 = vcombine.low %v522_v57, %v530_v58  ;;  %v2330_v60 = vcombine.high %v522_v57, %v530_v58  ;;  %v562_v24 = vld [vmem:[%s3295_s3 + $0x148] sm:$0xff]  ;;  %s2301_s25 = sshll.u32 %s3303_s18, 4 }
  0x10   : > { %2431 = vmatpush3.bf16.msra.mxu0 %v2506_v5  ;;  %s2636_s22 = scalar_lea.vmem %s3292_s0, %s2425_s13  ;;  %1004 = vmatprep.subr.bf16.mxu1 %v2344_v22  ;;  %v2348_v37 = vcombine.high %v539_v35, %v547_v36  ;;  %v2347_v39 = vcombine.low %v539_v35, %v547_v36  ;;  %v555_v42 = vld [vmem:[%s3295_s3 + $0x110] sm:$0xff]  ;;  %v2360_v43 = vcombine.high %v553_v40, %v561_v41  ;;  %v569_v48 = vld [vmem:[%s3295_s3 + $0x180] sm:$0xff]  ;;  %s3249_s28 = scalar_lea.vmem %s3297_s5, %s2301_s25 }
  0x11   : > { %2432 = vmatprep.subr.bf16.mxu0 %v2507_v6  ;;  %v2519_v11 = vld [vmem:[%s2636_s22 + $0x4] ss:$8 sps:$4 sm:$0xff]   ;;  %v2517_v27 = vld [vmem:[%s2636_s22] ss:$8 sps:$4 sm:$0xff]   ;;  %v2520_v28 = vld [vmem:[%s2636_s22 + $0x14] ss:$8 sps:$4 sm:$0xff]   ;;  %v2359_v45 = vcombine.low %v553_v40, %v561_v41 }
  0x12   : > { %476 = vmatprep.mubr.bf16.mxu0 %v2519_v11  ;;  %v2522_v30 = vld [vmem:[%s2636_s22 + $0x10] ss:$8 sps:$4 sm:$0xff]   ;;  %v2523_v31 = vld [vmem:[%s2636_s22 + $0x24] ss:$8 sps:$4 sm:$0xff]   ;;  %v2525_v32 = vld [vmem:[%s2636_s22 + $0x20] ss:$8 sps:$4 sm:$0xff]  }
  0x13   : > { %v2526_v33 = vld [vmem:[%s2636_s22 + $0x34] ss:$8 sps:$4 sm:$0xff]   ;;  %v2528_v34 = vld [vmem:[%s2636_s22 + $0x30] ss:$8 sps:$4 sm:$0xff]   ;;  %1005 = vmatpush1.bf16.msra.mxu1 %v2343_v38  ;;  %v577_v49 = vld [vmem:[%s3295_s3 + $0x1c0] sm:$0xff] }
  0x14   : > { %2433 = vmatpush3.bf16.msra.mxu0 %v2508_v7  ;;  %v563_v44 = vld [vmem:[%s3295_s3 + $0x150] sm:$0xff]  ;;  %1006 = vmatprep.subr.bf16.mxu1 %v2360_v43  ;;  %v2376_v51 = vcombine.high %v569_v48, %v577_v49  ;;  %v2375_v53 = vcombine.low %v569_v48, %v577_v49  ;;  %v525_v61 = vld [vmem:[%s3295_s3 + $0x20] sm:$0xff]  ;;  %v546_v11 = vld [vmem:[%s3295_s3 + $0xc8] sm:$0xff] }
  0x15   : > { %2434 = vmatprep.subr.bf16.mxu0 %v2509_v8  ;;  %v2363_v46 = vcombine.low %v555_v42, %v563_v44  ;;  %v2364_v47 = vcombine.high %v555_v42, %v563_v44  ;;  %v571_v50 = vld [vmem:[%s3295_s3 + $0x190] sm:$0xff]  ;;  %v533_v62 = vld [vmem:[%s3295_s3 + $0x60] sm:$0xff]  ;;  %v578_v38 = vld [vmem:[%s3295_s3 + $0x1c8] sm:$0xff] }
  0x16   : > { %v579_v52 = vld [vmem:[%s3295_s3 + $0x1d0] sm:$0xff]  ;;  %v2336_v63 = vcombine.high %v525_v61, %v533_v62  ;;  %v2335_v0 = vcombine.low %v525_v61, %v533_v62  ;;  %v2732_v2 = vld [vmem:[%s3294_s2] ss:$0 sm:$0xff] }
  0x17   : > { %1007 = vmatpush1.bf16.msra.mxu1 %v2359_v45  ;;  %v2379_v54 = vcombine.low %v571_v50, %v579_v52  ;;  %v2380_v55 = vcombine.high %v571_v50, %v579_v52  ;;  %v541_v16 = vld [vmem:[%s3295_s3 + $0xa0] sm:$0xff]  ;;  %v2361_v45 = vcombine.low %v554_v23, %v562_v24  ;;  %v535_v61 = vld [vmem:[%s3295_s3 + $0x70] sm:$0xff] }
  0x18   : > { %2435 = vmatpush3.bf16.msra.mxu0 %v2510_v9  ;;  %1008 = vmatprep.subr.bf16.mxu1 %v2376_v51  ;;  %v549_v17 = vld [vmem:[%s3295_s3 + $0xe0] sm:$0xff] }
  0x19   : > { %2436 = vmatprep.subr.bf16.mxu0 %v2511_v10  ;;  %v538_v10 = vld [vmem:[%s3295_s3 + $0x88] sm:$0xff]  ;;  %v573_v40 = vld [vmem:[%s3295_s3 + $0x1a0] sm:$0xff] }
  0x1a   : > { %v581_v41 = vld [vmem:[%s3295_s3 + $0x1e0] sm:$0xff] }
  0x1b   : > { %1009 = vmatpush1.bf16.msra.mxu1 %v2375_v53  ;;  %v2384_v52 = vcombine.high %v573_v40, %v581_v41  ;;  %v524_v53 = vld [vmem:[%s3295_s3 + $0x18] sm:$0xff]  ;;  %v2383_v58 = vcombine.low %v573_v40, %v581_v41 }
  0x1c   : > { %2437 = vmatpush3.bf16.msra.mxu0 %v2512_v12  ;;  %1075 = vmatprep.subr.bf16.mxu1 %v2330_v60  ;;  %v527_v60 = vld [vmem:[%s3295_s3 + $0x30] sm:$0xff] }
  0x1d   : > { %2438 = vmatprep.subr.bf16.mxu0 %v2513_v13 }
  0x20   : > { %2439 = vmatpush3.bf16.msra.mxu0 %v2514_v19 }
  0x21   : > { %2440 = vmatprep.subr.bf16.mxu0 %v2515_v21  ;;  %v2346_v21 = vcombine.high %v538_v10, %v546_v11 }
  0x24   : > { %2441 = vmatpush3.bf16.msra.mxu0 %v2516_v25 }
  0x25   : > { %1148 = vmatprep.subr.bf16.mxu0 %v2332_v26 }
  0x27   : > { %477 = vmatmul.mubr.bf16.vlgmr.msra.gmra.mrb[0].mxu0 %v2517_v27  ;;  %v2352_v27 = vcombine.high %v541_v16, %v549_v17 }
  0x28   : > { %484 = vmatprep.mubr.bf16.mxu0 %v2520_v28  ;;  %1149 = vmatpush1.bf16.msra.mxu0 %v2331_v29  ;;  %v2345_v28 = vcombine.low %v538_v10, %v546_v11 }
  0x29   : > { %1150 = vmatprep.subr.bf16.mxu0 %v2348_v37  ;;  %v570_v37 = vld [vmem:[%s3295_s3 + $0x188] sm:$0xff] }
  0x2a   : > { %v2378_v48 = vcombine.high %v570_v37, %v578_v38  ;;  %v2377_v57 = vcombine.low %v570_v37, %v578_v38  ;;  %v526_v38 = vld [vmem:[%s3295_s3 + $0x28] sm:$0xff] }
  0x2c   : > { %1151 = vmatpush1.bf16.msra.mxu0 %v2347_v39 }
  0x2d   : > { %1152 = vmatprep.subr.bf16.mxu0 %v2364_v47 }
  0x2f   : > { %485 = vmatmul.mubr.bf16.gmra.mrb[4].mxu0 %v2522_v30  ;;  %v2362_v30 = vcombine.high %v554_v23, %v562_v24 }
  0x30   : > { %492 = vmatprep.mubr.bf16.mxu0 %v2523_v31  ;;  %1153 = vmatpush1.bf16.msra.mxu0 %v2363_v46  ;;  %v2351_v31 = vcombine.low %v541_v16, %v549_v17  ;;  %v543_v16 = vld [vmem:[%s3295_s3 + $0xb0] sm:$0xff] }
  0x31   : > { %1154 = vmatprep.subr.bf16.mxu0 %v2380_v55  ;;  %v551_v17 = vld [vmem:[%s3295_s3 + $0xf0] sm:$0xff] }
  0x32   : > { %v2356_v23 = vcombine.high %v543_v16, %v551_v17 }
  0x34   : > { %1155 = vmatpush1.bf16.msra.mxu0 %v2379_v54  ;;  %v532_v54 = vld [vmem:[%s3295_s3 + $0x58] sm:$0xff] }
  0x35   : > { %1294 = vmatprep.subr.bf16.mxu0 %v2336_v63 }
  0x37   : > { %493 = vmatmul.mubr.bf16.gmra.mrb[8].mxu0 %v2525_v32  ;;  %v557_v32 = vld [vmem:[%s3295_s3 + $0x120] sm:$0xff] }
  0x38   : > { %500 = vmatprep.mubr.bf16.mxu0 %v2526_v33  ;;  %v565_v33 = vld [vmem:[%s3295_s3 + $0x160] sm:$0xff] }
  0x39   : > { %v2368_v46 = vcombine.high %v557_v32, %v565_v33  ;;  %v2367_v49 = vcombine.low %v557_v32, %v565_v33  ;;  %v583_v32 = vld [vmem:[%s3295_s3 + $0x1f0] sm:$0xff] }
  0x3f   : > { %501 = vmatmul.mubr.bf16.gmra.mrb[12].mxu0 %v2528_v34 }
  0x40   : > { %1180 = vmatprep.mubr.bf16.mxu0 %v2553_v56 }
  0xfa   : > { %v2442_v1 = vpop.f32.mrb[0].mxu0 }
  0xfb   : > { %v2443_v3 = vpop.f32.mrb[1].mxu0 }
  0xfc   : > { %v2444_v4 = vadd.f32 %v2443_v3, %v2442_v1  ;;  %v2445_v5 = vpop.f32.mrb[2].mxu0 }
  0xfd   : > { %v2446_v6 = vpop.f32.mrb[3].mxu0 }
  0xfe   : > { %v479_v7 = vadd.f32 %v2444_v4, %v2732_v2  ;;  %v2447_v8 = vadd.f32 %v2446_v6, %v2445_v5  ;;  %v2340_v6 = vcombine.high %v527_v60, %v535_v61 }
 0x100   : > { %v482_v9 = vadd.f32 %v2447_v8, %v2732_v2  ;;  %v509_v12 = vmax.f32 %v479_v7, 0.0 }
 0x102   : > { %v510_v13 = vmax.f32 %v482_v9, 0.0  ;;  %v2448_v14 = vpop.f32.mrb[4].mxu0 }
 0x103   : > { %v2449_v15 = vpop.f32.mrb[5].mxu0 }
 0x104   : > { %v2748_v18 = vpack.c.bf16 %v510_v13, %v509_v12  ;;  %v2450_v19 = vadd.f32 %v2449_v15, %v2448_v14  ;;  %v2451_v20 = vpop.f32.mrb[6].mxu0  ;;  %v540_v14 = vld [vmem:[%s3295_s3 + $0x98] sm:$0xff]  ;;  %v2333_v15 = vcombine.low %v524_v53, %v532_v54 }
 0x105   : > { %v2452_v22 = vpop.f32.mrb[7].mxu0 }
 0x106   : > { %v487_v25 = vadd.f32 %v2450_v19, %v2732_v2  ;;  %v2453_v26 = vadd.f32 %v2452_v22, %v2451_v20  ;;  %2391 = vmatmul.mubr.msk.bf16.vlgmr.msra.gmra.mrb[0].mxu1 %vm989_vm0, %v2748_v18  ;;  %2399 = vmatmul.mubr.msk.bf16.vlgmr.msra.gmra.mrb[16].mxu0 %vm989_vm0, %v2748_v18  ;;  %v556_v20 = vld [vmem:[%s3295_s3 + $0x118] sm:$0xff]  ;;  %v2339_v22 = vcombine.low %v527_v60, %v535_v61 }
 0x107   : > { %1076 = vmatpush1.bf16.msra.mxu1 %v2329_v59  ;;  %1044 = vmatprep.mubr.bf16.mxu1 %v2553_v56  ;;  %v2334_v59 = vcombine.high %v524_v53, %v532_v54  ;;  %v558_v53 = vld [vmem:[%s3295_s3 + $0x128] sm:$0xff]  ;;  %v560_v61 = vld [vmem:[%s3295_s3 + $0x138] sm:$0xff] }
 0x108   : > { %v490_v29 = vadd.f32 %v2453_v26, %v2732_v2  ;;  %1077 = vmatprep.subr.bf16.mxu1 %v2346_v21  ;;  %1190 = vmatprep.mubr.bf16.mxu0 %v2553_v56  ;;  %v511_v34 = vmax.f32 %v487_v25, 0.0  ;;  %v564_v21 = vld [vmem:[%s3295_s3 + $0x158] sm:$0xff]  ;;  %v2355_v26 = vcombine.low %v543_v16, %v551_v17  ;;  %v566_v54 = vld [vmem:[%s3295_s3 + $0x168] sm:$0xff] }
 0x109   : > { %1295 = vmatpush1.bf16.msra.mxu0 %v2335_v0  ;;  %v2366_v25 = vcombine.high %v556_v20, %v564_v21  ;;  %v2365_v33 = vcombine.low %v556_v20, %v564_v21 }
 0x10a   : > { %v512_v35 = vmax.f32 %v490_v29, 0.0  ;;  %v2454_v36 = vpop.f32.mrb[8].mxu0  ;;  %1296 = vmatprep.subr.bf16.mxu0 %v2352_v27  ;;  %v559_v27 = vld [vmem:[%s3295_s3 + $0x130] sm:$0xff]  ;;  %v572_v29 = vld [vmem:[%s3295_s3 + $0x198] sm:$0xff] }
 0x10b   : > { %v2455_v39 = vpop.f32.mrb[9].mxu0  ;;  %1078 = vmatpush1.bf16.msra.mxu1 %v2345_v28  ;;  %v567_v28 = vld [vmem:[%s3295_s3 + $0x170] sm:$0xff] }
 0x10c   : > { %v2782_v42 = vpack.c.bf16 %v512_v35, %v511_v34  ;;  %v2456_v43 = vadd.f32 %v2455_v39, %v2454_v36  ;;  %v2457_v44 = vpop.f32.mrb[10].mxu0  ;;  %1079 = vmatprep.subr.bf16.mxu1 %v2362_v30  ;;  %v580_v30 = vld [vmem:[%s3295_s3 + $0x1d8] sm:$0xff]  ;;  %v2372_v34 = vcombine.high %v559_v27, %v567_v28  ;;  %v2371_v36 = vcombine.low %v559_v27, %v567_v28  ;;  %v534_v39 = vld [vmem:[%s3295_s3 + $0x68] sm:$0xff] }
 0x10d   : > { %v2458_v47 = vpop.f32.mrb[11].mxu0  ;;  %1297 = vmatpush1.bf16.msra.mxu0 %v2351_v31  ;;  %v575_v31 = vld [vmem:[%s3295_s3 + $0x1b0] sm:$0xff]  ;;  %v2382_v35 = vcombine.high %v572_v29, %v580_v30  ;;  %v2381_v40 = vcombine.low %v572_v29, %v580_v30 }
 0x10e   : > { %v495_v50 = vadd.f32 %v2456_v43, %v2732_v2  ;;  %v2459_v51 = vadd.f32 %v2458_v47, %v2457_v44  ;;  %2392 = vmatmul.mubr.msk.bf16.gmra.mrb[4].mxu1 %vm989_vm0, %v2782_v42  ;;  %2400 = vmatmul.mubr.msk.bf16.gmra.mrb[20].mxu0 %vm989_vm0, %v2782_v42  ;;  %v2388_v37 = vcombine.high %v575_v31, %v583_v32  ;;  %v528_v44 = vld [vmem:[%s3295_s3 + $0x38] sm:$0xff]  ;;  %v542_v47 = vld [vmem:[%s3295_s3 + $0xa8] sm:$0xff] }
 0x10f   : > { %1054 = vmatprep.mubr.bf16.mxu1 %v2553_v56  ;;  %1200 = vmatprep.mubr.bf16.mxu0 %v2553_v56  ;;  %v2387_v41 = vcombine.low %v575_v31, %v583_v32  ;;  %v2338_v43 = vcombine.high %v526_v38, %v534_v39 }
 0x110   : > { %v498_v55 = vadd.f32 %v2459_v51, %v2732_v2  ;;  %1080 = vmatpush1.bf16.msra.mxu1 %v2361_v45  ;;  %1298 = vmatprep.subr.bf16.mxu0 %v2368_v46  ;;  %v513_v62 = vmax.f32 %v495_v50, 0.0  ;;  %v536_v45 = vld [vmem:[%s3295_s3 + $0x78] sm:$0xff] }
 0x111   : > { %1081 = vmatprep.subr.bf16.mxu1 %v2378_v48  ;;  %1299 = vmatpush1.bf16.msra.mxu0 %v2367_v49  ;;  %v2342_v46 = vcombine.high %v528_v44, %v536_v45  ;;  %v550_v48 = vld [vmem:[%s3295_s3 + $0xe8] sm:$0xff]  ;;  %v2337_v49 = vcombine.low %v526_v38, %v534_v39  ;;  %v544_v50 = vld [vmem:[%s3295_s3 + $0xb8] sm:$0xff] }
 0x112   : > { %v514_v63 = vmax.f32 %v498_v55, 0.0  ;;  %v2460_v0 = vpop.f32.mrb[12].mxu0  ;;  %1300 = vmatprep.subr.bf16.mxu0 %v2384_v52  ;;  %v552_v51 = vld [vmem:[%s3295_s3 + $0xf8] sm:$0xff]  ;;  %v2354_v52 = vcombine.high %v542_v47, %v550_v48  ;;  %v2341_v55 = vcombine.low %v528_v44, %v536_v45 }
 0x113   : > { %v2461_v1 = vpop.f32.mrb[13].mxu0  ;;  %v2357_v60 = vcombine.low %v544_v50, %v552_v51 }
 0x114   : > { %v2804_v3 = vpack.c.bf16 %v514_v63, %v513_v62  ;;  %v2462_v4 = vadd.f32 %v2461_v1, %v2460_v0  ;;  %v2463_v5 = vpop.f32.mrb[14].mxu0  ;;  %1082 = vmatpush1.bf16.msra.mxu1 %v2377_v57  ;;  %v2358_v57 = vcombine.high %v544_v50, %v552_v51  ;;  %v568_v62 = vld [vmem:[%s3295_s3 + $0x178] sm:$0xff]  ;;  %v574_v63 = vld [vmem:[%s3295_s3 + $0x1a8] sm:$0xff] }
 0x115   : > { %v2464_v7 = vpop.f32.mrb[15].mxu0  ;;  %1301 = vmatpush1.bf16.msra.mxu0 %v2383_v58  ;;  %1221 = vmatprep.subr.bf16.mxu1 %v2334_v59  ;;  %v2353_v58 = vcombine.low %v542_v47, %v550_v48  ;;  %v2370_v59 = vcombine.high %v558_v53, %v566_v54  ;;  %v582_v0 = vld [vmem:[%s3295_s3 + $0x1e8] sm:$0xff]  ;;  %v576_v1 = vld [vmem:[%s3295_s3 + $0x1b8] sm:$0xff] }
 0x116   : > { %v503_v8 = vadd.f32 %v2462_v4, %v2732_v2  ;;  %v2465_v9 = vadd.f32 %v2464_v7, %v2463_v5  ;;  %2393 = vmatmul.mubr.msk.bf16.gmra.mrb[8].mxu1 %vm989_vm0, %v2804_v3  ;;  %2401 = vmatmul.mubr.msk.bf16.gmra.mrb[24].mxu0 %vm989_vm0, %v2804_v3  ;;  %v584_v4 = vld [vmem:[%s3295_s3 + $0x1f8] sm:$0xff]  ;;  %v2369_v5 = vcombine.low %v558_v53, %v566_v54 }
 0x117   : > { %1064 = vmatprep.mubr.bf16.mxu1 %v2553_v56  ;;  %1210 = vmatprep.mubr.bf16.mxu0 %v2553_v56  ;;  %v2386_v7 = vcombine.high %v574_v63, %v582_v0 }
 0x118   : > { %v506_v10 = vadd.f32 %v2465_v9, %v2732_v2  ;;  %1440 = vmatprep.subr.bf16.mxu0 %v2340_v6  ;;  %v515_v11 = vmax.f32 %v503_v8, 0.0  ;;  %v548_v2 = vld [vmem:[%s3295_s3 + $0xd8] sm:$0xff]  ;;  %v2374_v6 = vcombine.high %v560_v61, %v568_v62  ;;  %v2373_v8 = vcombine.low %v560_v61, %v568_v62 }
 0x119   : > { %v2350_v19 = vcombine.high %v540_v14, %v548_v2  ;;  %v2349_v24 = vcombine.low %v540_v14, %v548_v2  ;;  %v2390_v9 = vcombine.high %v576_v1, %v584_v4 }
 0x11a   : > { %v516_v12 = vmax.f32 %v506_v10, 0.0  ;;  %v2385_v10 = vcombine.low %v574_v63, %v582_v0 }
 0x11c   : > { %v2814_v13 = vpack.c.bf16 %v516_v12, %v515_v11  ;;  %v2389_v11 = vcombine.low %v576_v1, %v584_v4 }
 0x11e   : > { %2394 = vmatmul.mubr.msk.bf16.gmra.mrb[12].mxu1 %vm989_vm0, %v2814_v13  ;;  %2402 = vmatmul.mubr.msk.bf16.gmra.mrb[28].mxu0 %vm989_vm0, %v2814_v13 }
 0x11f   : > { %1107 = vmatprep.mubr.bf16.mxu1 %v2553_v56  ;;  %1326 = vmatprep.mubr.bf16.mxu0 %v2553_v56 }
 0x126   : > { %2395 = vmatmul.mubr.msk.bf16.vlgmr.msra.gmra.mrb[16].mxu1 %vm989_vm0, %v2748_v18  ;;  %2407 = vmatmul.mubr.msk.bf16.vlgmr.msra.gmra.mrb[32].mxu0 %vm989_vm0, %v2748_v18 }
 0x127   : > { %1222 = vmatpush1.bf16.msra.mxu1 %v2333_v15  ;;  %1117 = vmatprep.mubr.bf16.mxu1 %v2553_v56 }
 0x128   : > { %1223 = vmatprep.subr.bf16.mxu1 %v2350_v19  ;;  %1336 = vmatprep.mubr.bf16.mxu0 %v2553_v56 }
 0x129   : > { %1441 = vmatpush1.bf16.msra.mxu0 %v2339_v22 }
 0x12a   : > { %1442 = vmatprep.subr.bf16.mxu0 %v2356_v23 }
 0x12b   : > { %1224 = vmatpush1.bf16.msra.mxu1 %v2349_v24 }
 0x12c   : > { %1225 = vmatprep.subr.bf16.mxu1 %v2366_v25 }
 0x12d   : > { %1443 = vmatpush1.bf16.msra.mxu0 %v2355_v26 }
 0x12e   : > { %2396 = vmatmul.mubr.msk.bf16.gmra.mrb[20].mxu1 %vm989_vm0, %v2782_v42  ;;  %2408 = vmatmul.mubr.msk.bf16.gmra.mrb[36].mxu0 %vm989_vm0, %v2782_v42 }
 0x12f   : > { %1127 = vmatprep.mubr.bf16.mxu1 %v2553_v56  ;;  %1346 = vmatprep.mubr.bf16.mxu0 %v2553_v56 }
 0x130   : > { %1226 = vmatpush1.bf16.msra.mxu1 %v2365_v33  ;;  %1444 = vmatprep.subr.bf16.mxu0 %v2372_v34 }
 0x131   : > { %1227 = vmatprep.subr.bf16.mxu1 %v2382_v35  ;;  %1445 = vmatpush1.bf16.msra.mxu0 %v2371_v36 }
 0x132   : > { %1446 = vmatprep.subr.bf16.mxu0 %v2388_v37 }
 0x134   : > { %1228 = vmatpush1.bf16.msra.mxu1 %v2381_v40 }
 0x135   : > { %1447 = vmatpush1.bf16.msra.mxu0 %v2387_v41  ;;  %1367 = vmatprep.subr.bf16.mxu1 %v2338_v43 }
 0x136   : > { %2397 = vmatmul.mubr.msk.bf16.gmra.mrb[24].mxu1 %vm989_vm0, %v2804_v3  ;;  %2409 = vmatmul.mubr.msk.bf16.gmra.mrb[40].mxu0 %vm989_vm0, %v2804_v3 }
 0x137   : > { %1137 = vmatprep.mubr.bf16.mxu1 %v2553_v56  ;;  %1356 = vmatprep.mubr.bf16.mxu0 %v2553_v56 }
 0x138   : > { %1513 = vmatprep.subr.bf16.mxu0 %v2342_v46 }
 0x13e   : > { %2398 = vmatmul.mubr.msk.bf16.gmra.mrb[28].mxu1 %vm989_vm0, %v2814_v13  ;;  %2410 = vmatmul.mubr.msk.bf16.gmra.mrb[44].mxu0 %vm989_vm0, %v2814_v13 }
 0x13f   : > { %1253 = vmatprep.mubr.bf16.mxu1 %v2553_v56  ;;  %1472 = vmatprep.mubr.bf16.mxu0 %v2553_v56 }
 0x146   : > { %2403 = vmatmul.mubr.msk.bf16.vlgmr.msra.gmra.mrb[32].mxu1 %vm989_vm0, %v2748_v18  ;;  %2415 = vmatmul.mubr.msk.bf16.vlgmr.msra.gmra.mrb[48].mxu0 %vm989_vm0, %v2748_v18 }
 0x147   : > { %1368 = vmatpush1.bf16.msra.mxu1 %v2337_v49  ;;  %1263 = vmatprep.mubr.bf16.mxu1 %v2553_v56 }
 0x148   : > { %1369 = vmatprep.subr.bf16.mxu1 %v2354_v52  ;;  %1482 = vmatprep.mubr.bf16.mxu0 %v2553_v56 }
 0x149   : > { %1514 = vmatpush1.bf16.msra.mxu0 %v2341_v55 }
 0x14a   : > { %1515 = vmatprep.subr.bf16.mxu0 %v2358_v57 }
 0x14b   : > { %1370 = vmatpush1.bf16.msra.mxu1 %v2353_v58 }
 0x14c   : > { %1371 = vmatprep.subr.bf16.mxu1 %v2370_v59 }
 0x14d   : > { %1516 = vmatpush1.bf16.msra.mxu0 %v2357_v60 }
 0x14e   : > { %2404 = vmatmul.mubr.msk.bf16.gmra.mrb[36].mxu1 %vm989_vm0, %v2782_v42  ;;  %2416 = vmatmul.mubr.msk.bf16.gmra.mrb[52].mxu0 %vm989_vm0, %v2782_v42 }
 0x14f   : > { %1273 = vmatprep.mubr.bf16.mxu1 %v2553_v56  ;;  %1492 = vmatprep.mubr.bf16.mxu0 %v2553_v56 }
 0x150   : > { %1372 = vmatpush1.bf16.msra.mxu1 %v2369_v5  ;;  %1517 = vmatprep.subr.bf16.mxu0 %v2374_v6 }
 0x151   : > { %1373 = vmatprep.subr.bf16.mxu1 %v2386_v7  ;;  %1518 = vmatpush1.bf16.msra.mxu0 %v2373_v8 }
 0x152   : > { %1519 = vmatprep.subr.bf16.mxu0 %v2390_v9 }
 0x154   : > { %1374 = vmatpush1.bf16.msra.mxu1 %v2385_v10 }
 0x155   : > { %1520 = vmatpush1.bf16.msra.mxu0 %v2389_v11  ;;  %2466 = vmatprep.subr.bf16.mxu1 %v2342_v46 }
 0x156   : > { %2405 = vmatmul.mubr.msk.bf16.gmra.mrb[40].mxu1 %vm989_vm0, %v2804_v3  ;;  %2417 = vmatmul.mubr.msk.bf16.gmra.mrb[56].mxu0 %vm989_vm0, %v2804_v3 }
 0x157   : > { %1283 = vmatprep.mubr.bf16.mxu1 %v2553_v56  ;;  %1502 = vmatprep.mubr.bf16.mxu0 %v2553_v56 }
 0x15e   : > { %2406 = vmatmul.mubr.msk.bf16.gmra.mrb[44].mxu1 %vm989_vm0, %v2814_v13  ;;  %2418 = vmatmul.mubr.msk.bf16.gmra.mrb[60].mxu0 %vm989_vm0, %v2814_v13 }
 0x15f   : > { %1399 = vmatprep.mubr.bf16.mxu1 %v2553_v56  ;;  %1545 = vmatprep.mubr.bf16.mxu0 %v2553_v56 }
 0x166   : > { %2411 = vmatmul.mubr.msk.bf16.vlgmr.msra.gmra.mrb[48].mxu1 %vm989_vm0, %v2748_v18  ;;  %2419 = vmatmul.mubr.msk.bf16.vlgmr.msra.gmra.mrb[64].mxu0 %vm989_vm0, %v2748_v18  ;;  %v589_v18 = vlaneseq }
 0x167   : > { %2470 = vmatpush1.bf16.msra.mxu1 %v2341_v55  ;;  %1409 = vmatprep.mubr.bf16.mxu1 %v2553_v56 }
 0x168   : > { %2467 = vmatprep.subr.bf16.mxu1 %v2358_v57  ;;  %v2976_v12 = vshrl.u32 %v589_v18, 7 }
 0x16a   : > { %v591_v14 = vsub.s32 0, %v2976_v12  ;;  %v607_v2 = vsub.s32 4, %v2976_v12  ;;  %v595_v15 = vsub.s32 1, %v2976_v12 }
 0x16b   : > { %2471 = vmatpush1.bf16.msra.mxu1 %v2357_v60 }
 0x16c   : > { %2468 = vmatprep.subr.bf16.mxu1 %v2374_v6 }
 0x16e   : > { %2412 = vmatmul.mubr.msk.bf16.gmra.mrb[52].mxu1 %vm989_vm0, %v2782_v42 }
 0x16f   : > { %1419 = vmatprep.mubr.bf16.mxu1 %v2553_v56  ;;  %2472 = vmatpush1.bf16.msra.mxu1 %v2373_v8 }
 0x170   : > { %2469 = vmatprep.subr.bf16.mxu1 %v2390_v9 }
 0x173   : > { %2473 = vmatpush1.bf16.msra.mxu1 %v2389_v11 }
 0x176   : > { %2413 = vmatmul.mubr.msk.bf16.gmra.mrb[56].mxu1 %vm989_vm0, %v2804_v3 }
 0x177   : > { %1429 = vmatprep.mubr.bf16.mxu1 %v2553_v56 }
 0x17e   : > { %2414 = vmatmul.mubr.msk.bf16.gmra.mrb[60].mxu1 %vm989_vm0, %v2814_v13 }
 0x17f   : > { %1555 = vmatprep.mubr.bf16.mxu1 %v2553_v56 }
 0x186   : > { %2420 = vmatmul.mubr.msk.bf16.vlgmr.msra.gmra.mrb[64].mxu1 %vm989_vm0, %v2782_v42  ;;  %v2983_v42 = vld [vmem:[%s3296_s4] sm:$0xff] }
 0x187   : > { %1565 = vmatprep.mubr.bf16.mxu1 %v2553_v56  ;;  %v3000_v16 = vrot.slane %v2983_v42, %v595_v15 }
 0x18e   : > { %2421 = vmatmul.mubr.msk.bf16.gmra.mrb[68].mxu1 %vm989_vm0, %v2804_v3  ;;  %v611_v3 = vsub.s32 5, %v2976_v12 }
 0x18f   : > { %1575 = vmatprep.mubr.bf16.mxu1 %v2553_v56  ;;  %v2990_v56 = vrot.slane %v2983_v42, %v591_v14 }
 0x190   : > { %v3005_v17 = vrot.slane %v2983_v42, %v611_v3 }
 0x196   : > { %2422 = vmatmul.mubr.msk.bf16.gmra.mrb[72].mxu1 %vm989_vm0, %v2814_v13  ;;  %v2995_v13 = vrot.slane %v2983_v42, %v607_v2 }
 0x1d9   : > { %v1036_v19 = vpop.f32.mrb[0].mxu1  ;;  %v1182_v20 = vpop.f32.mrb[16].mxu0 }
 0x1da   : > { %v1037_v21 = vadd.f32 %v1036_v19, %v2990_v56  ;;  %v1183_v22 = vadd.f32 %v1182_v20, %v2995_v13  ;;  %v1038_v23 = vpop.f32.mrb[1].mxu1  ;;  %v1184_v24 = vpop.f32.mrb[17].mxu0 }
 0x1db   : > { %v1039_v25 = vadd.f32 %v1038_v23, %v3000_v16  ;;  %v1185_v26 = vadd.f32 %v1184_v24, %v3005_v17  ;;  %v1040_v27 = vpop.f32.mrb[2].mxu1  ;;  %v1186_v28 = vpop.f32.mrb[18].mxu0 }
 0x1dc   : > { %v1041_v29 = vadd.f32 %v1040_v27, %v2990_v56  ;;  %v1187_v30 = vadd.f32 %v1186_v28, %v2995_v13  ;;  %v1042_v31 = vpop.f32.mrb[3].mxu1  ;;  %v1188_v32 = vpop.f32.mrb[19].mxu0  ;;  %v1586_v35 = vmax.f32 %v1037_v21, 0.0  ;;  %v1590_v36 = vmax.f32 %v1183_v22, 0.0 }
 0x1dd   : > { %v1043_v33 = vadd.f32 %v1042_v31, %v3000_v16  ;;  %v1189_v34 = vadd.f32 %v1188_v32, %v3005_v17  ;;  %v1587_v39 = vmax.f32 %v1039_v25, 0.0  ;;  %v1591_v40 = vmax.f32 %v1185_v26, 0.0 }
 0x1de   : > { %v1602_v37 = vmax.f32 %v1041_v29, 0.0  ;;  %v1606_v38 = vmax.f32 %v1187_v30, 0.0 }
 0x1df   : > { %v1603_v41 = vmax.f32 %v1043_v33, 0.0  ;;  %v1607_v43 = vmax.f32 %v1189_v34, 0.0 }
 0x1e0   : > { %v1887_v44 = vadd.f32 %v1602_v37, %v1586_v35  ;;  %v1939_v45 = vadd.f32 %v1606_v38, %v1590_v36  ;;  %v599_v35 = vsub.s32 2, %v2976_v12  ;;  %v603_v36 = vsub.s32 3, %v2976_v12 }
 0x1e1   : > { %v1900_v46 = vadd.f32 %v1603_v41, %v1587_v39  ;;  %v1952_v47 = vadd.f32 %v1607_v43, %v1591_v40  ;;  %v1046_v48 = vpop.f32.mrb[4].mxu1  ;;  %v1192_v49 = vpop.f32.mrb[20].mxu0 }
 0x1e2   : > { %v1047_v50 = vadd.f32 %v1046_v48, %v2990_v56  ;;  %v1193_v51 = vadd.f32 %v1192_v49, %v2995_v13  ;;  %v1048_v52 = vpop.f32.mrb[5].mxu1  ;;  %v1194_v53 = vpop.f32.mrb[21].mxu0 }
 0x1e3   : > { %v1049_v54 = vadd.f32 %v1048_v52, %v3000_v16  ;;  %v1195_v55 = vadd.f32 %v1194_v53, %v3005_v17  ;;  %v1050_v57 = vpop.f32.mrb[6].mxu1  ;;  %v1196_v58 = vpop.f32.mrb[22].mxu0 }
 0x1e4   : > { %v1618_v59 = vmax.f32 %v1047_v50, 0.0  ;;  %v1622_v60 = vmax.f32 %v1193_v51, 0.0  ;;  %v1051_v61 = vadd.f32 %v1050_v57, %v2990_v56  ;;  %v1197_v62 = vadd.f32 %v1196_v58, %v2995_v13  ;;  %v1052_v63 = vpop.f32.mrb[7].mxu1  ;;  %v1198_v0 = vpop.f32.mrb[23].mxu0  ;;  %v3036_v57 = vld [vmem:[%s3296_s4 + $0x8] sm:$0xff] }
 0x1e5   : > { %v1619_v1 = vmax.f32 %v1049_v54, 0.0  ;;  %v1623_v4 = vmax.f32 %v1195_v55, 0.0  ;;  %v1053_v5 = vadd.f32 %v1052_v63, %v3000_v16  ;;  %v1199_v6 = vadd.f32 %v1198_v0, %v3005_v17 }
 0x1e6   : > { %v1888_v7 = vadd.f32 %v1887_v44, %v1618_v59  ;;  %v1940_v8 = vadd.f32 %v1939_v45, %v1622_v60  ;;  %v1634_v9 = vmax.f32 %v1051_v61, 0.0  ;;  %v1638_v10 = vmax.f32 %v1197_v62, 0.0 }
 0x1e7   : > { %v1901_v11 = vadd.f32 %v1900_v46, %v1619_v1  ;;  %v1953_v18 = vadd.f32 %v1952_v47, %v1623_v4  ;;  %v1635_v19 = vmax.f32 %v1053_v5, 0.0  ;;  %v1639_v20 = vmax.f32 %v1199_v6, 0.0 }
 0x1e8   : > { %v1889_v21 = vadd.f32 %v1888_v7, %v1634_v9  ;;  %v1941_v22 = vadd.f32 %v1940_v8, %v1638_v10  ;;  %v3041_v0 = vrot.slane %v2983_v42, %v599_v35  ;;  %v3048_v7 = vrot.slane %v3036_v57, %v591_v14 }
 0x1e9   : > { %v1902_v23 = vadd.f32 %v1901_v11, %v1635_v19  ;;  %v1954_v24 = vadd.f32 %v1953_v18, %v1639_v20  ;;  %v1056_v25 = vpop.f32.mrb[8].mxu1  ;;  %v1202_v26 = vpop.f32.mrb[24].mxu0  ;;  %v3053_v8 = vrot.slane %v2983_v42, %v603_v36  ;;  %v2554_v19 = vmov 1966171168  }
 0x1ea   : > { %v1057_v27 = vadd.f32 %v1056_v25, %v2990_v56  ;;  %v1203_v28 = vadd.f32 %v1202_v26, %v2995_v13  ;;  %v1058_v29 = vpop.f32.mrb[9].mxu1  ;;  %v1204_v30 = vpop.f32.mrb[25].mxu0  ;;  %v3057_v20 = vunpack.c.l.s4 %v2554_v19 }
 0x1eb   : > { %v1059_v31 = vadd.f32 %v1058_v29, %v3000_v16  ;;  %v1205_v32 = vadd.f32 %v1204_v30, %v3005_v17  ;;  %v1060_v33 = vpop.f32.mrb[10].mxu1  ;;  %v1206_v34 = vpop.f32.mrb[26].mxu0 }
 0x1ec   : > { %v1650_v37 = vmax.f32 %v1057_v27, 0.0  ;;  %v1654_v38 = vmax.f32 %v1203_v28, 0.0  ;;  %v1061_v39 = vadd.f32 %v1060_v33, %v2990_v56  ;;  %v1207_v40 = vadd.f32 %v1206_v34, %v2995_v13  ;;  %v1062_v41 = vpop.f32.mrb[11].mxu1  ;;  %v1208_v43 = vpop.f32.mrb[27].mxu0 }
 0x1ed   : > { %v1651_v44 = vmax.f32 %v1059_v31, 0.0  ;;  %v1655_v45 = vmax.f32 %v1205_v32, 0.0  ;;  %v1063_v46 = vadd.f32 %v1062_v41, %v3000_v16  ;;  %v1209_v47 = vadd.f32 %v1208_v43, %v3005_v17 }
 0x1ee   : > { %v1890_v48 = vadd.f32 %v1889_v21, %v1650_v37  ;;  %v1942_v49 = vadd.f32 %v1941_v22, %v1654_v38  ;;  %v1666_v50 = vmax.f32 %v1061_v39, 0.0  ;;  %v1670_v51 = vmax.f32 %v1207_v40, 0.0 }
 0x1ef   : > { %v1903_v52 = vadd.f32 %v1902_v23, %v1651_v44  ;;  %v1955_v53 = vadd.f32 %v1954_v24, %v1655_v45  ;;  %v1667_v54 = vmax.f32 %v1063_v46, 0.0  ;;  %v1671_v55 = vmax.f32 %v1209_v47, 0.0 }
 0x1f0   : > { %v1891_v58 = vadd.f32 %v1890_v48, %v1666_v50  ;;  %v1943_v59 = vadd.f32 %v1942_v49, %v1670_v51  ;;  %v3062_v21 = vrot.slane %v3036_v57, %v595_v15 }
 0x1f1   : > { %v1904_v60 = vadd.f32 %v1903_v52, %v1667_v54  ;;  %v1956_v61 = vadd.f32 %v1955_v53, %v1671_v55  ;;  %v1066_v62 = vpop.f32.mrb[12].mxu1  ;;  %v1212_v63 = vpop.f32.mrb[28].mxu0 }
 0x1f2   : > { %v1067_v1 = vadd.f32 %v1066_v62, %v2990_v56  ;;  %v1213_v4 = vadd.f32 %v1212_v63, %v2995_v13  ;;  %v1068_v5 = vpop.f32.mrb[13].mxu1  ;;  %v1214_v6 = vpop.f32.mrb[29].mxu0 }
 0x1f3   : > { %v1069_v9 = vadd.f32 %v1068_v5, %v3000_v16  ;;  %v1215_v10 = vadd.f32 %v1214_v6, %v3005_v17  ;;  %v1070_v11 = vpop.f32.mrb[14].mxu1  ;;  %v1216_v18 = vpop.f32.mrb[30].mxu0 }
 0x1f4   : > { %v1682_v14 = vmax.f32 %v1067_v1, 0.0  ;;  %v1686_v22 = vmax.f32 %v1213_v4, 0.0  ;;  %v1071_v23 = vadd.f32 %v1070_v11, %v2990_v56  ;;  %v1217_v24 = vadd.f32 %v1216_v18, %v2995_v13  ;;  %v1072_v25 = vpop.f32.mrb[15].mxu1  ;;  %v1218_v26 = vpop.f32.mrb[31].mxu0 }
 0x1f5   : > { %v1683_v27 = vmax.f32 %v1069_v9, 0.0  ;;  %v1687_v28 = vmax.f32 %v1215_v10, 0.0  ;;  %v1073_v29 = vadd.f32 %v1072_v25, %v3000_v16  ;;  %v1219_v30 = vadd.f32 %v1218_v26, %v3005_v17 }
 0x1f6   : > { %v1892_v31 = vadd.f32 %v1891_v58, %v1682_v14  ;;  %v1944_v32 = vadd.f32 %v1943_v59, %v1686_v22  ;;  %v1698_v33 = vmax.f32 %v1071_v23, 0.0  ;;  %v1702_v34 = vmax.f32 %v1217_v24, 0.0 }
 0x1f7   : > { %v1905_v15 = vadd.f32 %v1904_v60, %v1683_v27  ;;  %v1957_v37 = vadd.f32 %v1956_v61, %v1687_v28  ;;  %v1699_v38 = vmax.f32 %v1073_v29, 0.0  ;;  %v1703_v39 = vmax.f32 %v1219_v30, 0.0 }
 0x1f8   : > { %v1893_v40 = vadd.f32 %v1892_v31, %v1698_v33  ;;  %v1945_v56 = vadd.f32 %v1944_v32, %v1702_v34  ;;  %v2117_v13 = vunpack.c.0.s8 %v3057_v20 }
 0x1f9   : > { %v1906_v41 = vadd.f32 %v1905_v15, %v1699_v38  ;;  %v1958_v43 = vadd.f32 %v1957_v37, %v1703_v39  ;;  %v1109_v44 = vpop.f32.mrb[16].mxu1  ;;  %v1328_v45 = vpop.f32.mrb[32].mxu0 }
 0x1fa   : > { %v1894_v46 = vrot.slane %v1893_v40, 4  ;;  %v1946_v16 = vrot.slane %v1945_v56, 4  ;;  %v1110_v17 = vadd.f32 %v1109_v44, %v3041_v0  ;;  %v1329_v47 = vadd.f32 %v1328_v45, %v3048_v7  ;;  %v1111_v48 = vpop.f32.mrb[17].mxu1  ;;  %v1330_v49 = vpop.f32.mrb[33].mxu0 }
 0x1fb   : > { %v1907_v50 = vrot.slane %v1906_v41, 4  ;;  %v1959_v51 = vrot.slane %v1958_v43, 4  ;;  %v1112_v52 = vadd.f32 %v1111_v48, %v3053_v8  ;;  %v1331_v53 = vadd.f32 %v1330_v49, %v3062_v21  ;;  %v1113_v54 = vpop.f32.mrb[18].mxu1  ;;  %v1332_v55 = vpop.f32.mrb[34].mxu0 }
 0x1fc   : > { %v1895_v58 = vadd.f32 %v1894_v46, %v1893_v40  ;;  %v1947_v59 = vadd.f32 %v1946_v16, %v1945_v56  ;;  %v1588_v60 = vmax.f32 %v1110_v17, 0.0  ;;  %v1594_v61 = vmax.f32 %v1329_v47, 0.0  ;;  %v1115_v62 = vpop.f32.mrb[19].mxu1  ;;  %v1334_v63 = vpop.f32.mrb[35].mxu0 }
 0x1fd   : > { %v1908_v1 = vadd.f32 %v1907_v50, %v1906_v41  ;;  %v1960_v4 = vadd.f32 %v1959_v51, %v1958_v43  ;;  %v1589_v5 = vmax.f32 %v1112_v52, 0.0  ;;  %v1595_v6 = vmax.f32 %v1331_v53, 0.0 }
 0x1fe   : > { %v1896_v9 = vrot.slane %v1895_v58, 2  ;;  %v1948_v10 = vrot.slane %v1947_v59, 2  ;;  %v1114_v11 = vadd.f32 %v1113_v54, %v3041_v0  ;;  %v1333_v18 = vadd.f32 %v1332_v55, %v3048_v7 }
 0x1ff   : > { %v1909_v19 = vrot.slane %v1908_v1, 2  ;;  %v1961_v14 = vrot.slane %v1960_v4, 2  ;;  %v1116_v22 = vadd.f32 %v1115_v62, %v3053_v8  ;;  %v1335_v23 = vadd.f32 %v1334_v63, %v3062_v21 }
 0x200   : > { %v1897_v24 = vadd.f32 %v1896_v9, %v1895_v58  ;;  %v1949_v25 = vadd.f32 %v1948_v10, %v1947_v59  ;;  %v1604_v26 = vmax.f32 %v1114_v11, 0.0  ;;  %v1610_v27 = vmax.f32 %v1333_v18, 0.0 }
 0x201   : > { %v1910_v28 = vadd.f32 %v1909_v19, %v1908_v1  ;;  %v1962_v29 = vadd.f32 %v1961_v14, %v1960_v4  ;;  %v1605_v30 = vmax.f32 %v1116_v22, 0.0  ;;  %v1611_v31 = vmax.f32 %v1335_v23, 0.0  ;;  %v1119_v32 = vpop.f32.mrb[20].mxu1  ;;  %v1338_v33 = vpop.f32.mrb[36].mxu0 }
 0x202   : > { %v1898_v34 = vrot.slane %v1897_v24, 1  ;;  %v1950_v15 = vrot.slane %v1949_v25, 1  ;;  %v1913_v37 = vadd.f32 %v1604_v26, %v1588_v60  ;;  %v1991_v38 = vadd.f32 %v1610_v27, %v1594_v61  ;;  %v1121_v39 = vpop.f32.mrb[21].mxu1  ;;  %v1340_v40 = vpop.f32.mrb[37].mxu0 }
 0x203   : > { %v1911_v56 = vrot.slane %v1910_v28, 1  ;;  %v1963_v41 = vrot.slane %v1962_v29, 1  ;;  %v1926_v43 = vadd.f32 %v1605_v30, %v1589_v5  ;;  %v2004_v44 = vadd.f32 %v1611_v31, %v1595_v6  ;;  %v1123_v45 = vpop.f32.mrb[22].mxu1  ;;  %v1342_v46 = vpop.f32.mrb[38].mxu0 }
 0x204   : > { %v3077_v16 = vadd.f32 %v1898_v34, %v1897_v24  ;;  %v3079_v17 = vadd.f32 %v1950_v15, %v1949_v25  ;;  %v1120_v47 = vadd.f32 %v1119_v32, %v3041_v0  ;;  %v1339_v48 = vadd.f32 %v1338_v33, %v3048_v7  ;;  %v1125_v49 = vpop.f32.mrb[23].mxu1  ;;  %v1344_v50 = vpop.f32.mrb[39].mxu0 }
 0x205   : > { %v3083_v51 = vadd.f32 %v1911_v56, %v1910_v28  ;;  %v3085_v52 = vadd.f32 %v1963_v41, %v1962_v29  ;;  %v1122_v53 = vadd.f32 %v1121_v39, %v3053_v8  ;;  %v1341_v54 = vadd.f32 %v1340_v40, %v3062_v21 }
 0x206   : > { %v1620_v55 = vmax.f32 %v1120_v47, 0.0  ;;  %v1626_v58 = vmax.f32 %v1339_v48, 0.0  ;;  %v1124_v59 = vadd.f32 %v1123_v45, %v3041_v0  ;;  %v1343_v60 = vadd.f32 %v1342_v46, %v3048_v7 }
 0x207   : > { %v2111_v61 = vcombine.low %v3077_v16, %v3083_v51  ;;  %v2113_v62 = vcombine.low %v3079_v17, %v3085_v52  ;;  %v1621_v63 = vmax.f32 %v1122_v53, 0.0  ;;  %v1627_v1 = vmax.f32 %v1341_v54, 0.0 }
 0x208   : > { %v1914_v4 = vadd.f32 %v1913_v37, %v1620_v55  ;;  %v1992_v5 = vadd.f32 %v1991_v38, %v1626_v58  ;;  %v1636_v6 = vmax.f32 %v1124_v59, 0.0  ;;  %v1642_v9 = vmax.f32 %v1343_v60, 0.0 }
 0x209   : > { %v1927_v10 = vadd.f32 %v1926_v43, %v1621_v63  ;;  %v2005_v11 = vadd.f32 %v2004_v44, %v1627_v1  ;;  %v1129_v18 = vpop.f32.mrb[24].mxu1  ;;  %v1348_v19 = vpop.f32.mrb[40].mxu0  ;;  %v615_v14 = vsub.s32 6, %v2976_v12  ;;  %v619_v22 = vsub.s32 7, %v2976_v12 }
 0x20a   : > { %v1915_v23 = vadd.f32 %v1914_v4, %v1636_v6  ;;  %v1993_v24 = vadd.f32 %v1992_v5, %v1642_v9  ;;  %v1126_v25 = vadd.f32 %v1125_v49, %v3053_v8  ;;  %v1345_v26 = vadd.f32 %v1344_v50, %v3062_v21  ;;  %v1131_v27 = vpop.f32.mrb[25].mxu1  ;;  %v1350_v28 = vpop.f32.mrb[41].mxu0 }
 0x20b   : > { %v1130_v29 = vadd.f32 %v1129_v18, %v3041_v0  ;;  %v1349_v30 = vadd.f32 %v1348_v19, %v3048_v7  ;;  %v1132_v31 = vadd.f32 %v1131_v27, %v3053_v8  ;;  %v1351_v32 = vadd.f32 %v1350_v28, %v3062_v21  ;;  %v1133_v33 = vpop.f32.mrb[26].mxu1  ;;  %v1352_v34 = vpop.f32.mrb[42].mxu0 }
 0x20c   : > { %v1637_v15 = vmax.f32 %v1126_v25, 0.0  ;;  %v1643_v37 = vmax.f32 %v1345_v26, 0.0  ;;  %v1134_v38 = vadd.f32 %v1133_v33, %v3041_v0  ;;  %v1353_v39 = vadd.f32 %v1352_v34, %v3048_v7  ;;  %v1135_v40 = vpop.f32.mrb[27].mxu1  ;;  %v1354_v56 = vpop.f32.mrb[43].mxu0 }
 0x20d   : > { %v1652_v41 = vmax.f32 %v1130_v29, 0.0  ;;  %v1658_v43 = vmax.f32 %v1349_v30, 0.0  ;;  %v1653_v44 = vmax.f32 %v1132_v31, 0.0  ;;  %v1659_v45 = vmax.f32 %v1351_v32, 0.0 }
 0x20e   : > { %v1928_v46 = vadd.f32 %v1927_v10, %v1637_v15  ;;  %v2006_v47 = vadd.f32 %v2005_v11, %v1643_v37  ;;  %v1668_v48 = vmax.f32 %v1134_v38, 0.0  ;;  %v1674_v49 = vmax.f32 %v1353_v39, 0.0 }
 0x20f   : > { %v1916_v50 = vadd.f32 %v1915_v23, %v1652_v41  ;;  %v1994_v53 = vadd.f32 %v1993_v24, %v1658_v43  ;;  %v1136_v54 = vadd.f32 %v1135_v40, %v3053_v8  ;;  %v1355_v55 = vadd.f32 %v1354_v56, %v3062_v21 }
 0x210   : > { %v1929_v58 = vadd.f32 %v1928_v46, %v1653_v44  ;;  %v2007_v59 = vadd.f32 %v2006_v47, %v1659_v45  ;;  %v3110_v60 = vrot.slane %v2983_v42, %v615_v14  ;;  %v3115_v63 = vrot.slane %v3036_v57, %v607_v2 }
 0x211   : > { %v1917_v1 = vadd.f32 %v1916_v50, %v1668_v48  ;;  %v1995_v4 = vadd.f32 %v1994_v53, %v1674_v49  ;;  %v1669_v5 = vmax.f32 %v1136_v54, 0.0  ;;  %v1675_v6 = vmax.f32 %v1355_v55, 0.0  ;;  %v1139_v9 = vpop.f32.mrb[28].mxu1  ;;  %v1358_v10 = vpop.f32.mrb[44].mxu0 }
 0x212   : > { %v1140_v11 = vadd.f32 %v1139_v9, %v3041_v0  ;;  %v1359_v18 = vadd.f32 %v1358_v10, %v3048_v7  ;;  %v1141_v19 = vpop.f32.mrb[29].mxu1  ;;  %v1360_v23 = vpop.f32.mrb[45].mxu0  ;;  %v3122_v24 = vrot.slane %v2983_v42, %v619_v22  ;;  %v3127_v2 = vrot.slane %v3036_v57, %v611_v3 }
 0x213   : > { %v1930_v25 = vadd.f32 %v1929_v58, %v1669_v5  ;;  %v2008_v26 = vadd.f32 %v2007_v59, %v1675_v6  ;;  %v1142_v27 = vadd.f32 %v1141_v19, %v3053_v8  ;;  %v1361_v28 = vadd.f32 %v1360_v23, %v3062_v21  ;;  %v1143_v29 = vpop.f32.mrb[30].mxu1  ;;  %v1362_v30 = vpop.f32.mrb[46].mxu0 }
 0x214   : > { %v1684_v31 = vmax.f32 %v1140_v11, 0.0  ;;  %v1690_v32 = vmax.f32 %v1359_v18, 0.0  ;;  %v1144_v33 = vadd.f32 %v1143_v29, %v3041_v0  ;;  %v1363_v42 = vadd.f32 %v1362_v30, %v3048_v7  ;;  %v1145_v34 = vpop.f32.mrb[31].mxu1  ;;  %v1364_v15 = vpop.f32.mrb[47].mxu0 }
 0x215   : > { %v1685_v37 = vmax.f32 %v1142_v27, 0.0  ;;  %v1691_v38 = vmax.f32 %v1361_v28, 0.0  ;;  %v1146_v3 = vadd.f32 %v1145_v34, %v3053_v8  ;;  %v1365_v39 = vadd.f32 %v1364_v15, %v3062_v21 }
 0x216   : > { %v1918_v40 = vadd.f32 %v1917_v1, %v1684_v31  ;;  %v1996_v56 = vadd.f32 %v1995_v4, %v1690_v32  ;;  %v1700_v41 = vmax.f32 %v1144_v33, 0.0  ;;  %v1706_v43 = vmax.f32 %v1363_v42, 0.0 }
 0x217   : > { %v1931_v44 = vadd.f32 %v1930_v25, %v1685_v37  ;;  %v2009_v45 = vadd.f32 %v2008_v26, %v1691_v38  ;;  %v1701_v46 = vmax.f32 %v1146_v3, 0.0  ;;  %v1707_v47 = vmax.f32 %v1365_v39, 0.0 }
 0x218   : > { %v1919_v48 = vadd.f32 %v1918_v40, %v1700_v41  ;;  %v1997_v0 = vadd.f32 %v1996_v56, %v1706_v43  ;;  %v3138_v7 = vsub.s32 %v2117_v13, %v2976_v12 }
 0x219   : > { %v1932_v49 = vadd.f32 %v1931_v44, %v1701_v46  ;;  %v2010_v50 = vadd.f32 %v2009_v45, %v1707_v47  ;;  %v1255_v8 = vpop.f32.mrb[32].mxu1  ;;  %v1474_v53 = vpop.f32.mrb[48].mxu0 }
 0x21a   : > { %v1920_v21 = vrot.slane %v1919_v48, 4  ;;  %v1998_v54 = vrot.slane %v1997_v0, 4  ;;  %v1256_v55 = vadd.f32 %v1255_v8, %v3110_v60  ;;  %v1475_v58 = vadd.f32 %v1474_v53, %v3115_v63  ;;  %v1257_v59 = vpop.f32.mrb[33].mxu1  ;;  %v1476_v1 = vpop.f32.mrb[49].mxu0 }
 0x21b   : > { %v1933_v4 = vrot.slane %v1932_v49, 4  ;;  %v2011_v5 = vrot.slane %v2010_v50, 4  ;;  %v1258_v6 = vadd.f32 %v1257_v59, %v3122_v24  ;;  %v1477_v20 = vadd.f32 %v1476_v1, %v3127_v2  ;;  %v1259_v13 = vpop.f32.mrb[34].mxu1  ;;  %v1478_v9 = vpop.f32.mrb[50].mxu0 }
 0x21c   : > { %v1921_v10 = vadd.f32 %v1920_v21, %v1919_v48  ;;  %v1999_v11 = vadd.f32 %v1998_v54, %v1997_v0  ;;  %v1592_v18 = vmax.f32 %v1256_v55, 0.0  ;;  %v1598_v19 = vmax.f32 %v1475_v58, 0.0  ;;  %v1261_v23 = vpop.f32.mrb[35].mxu1  ;;  %v1480_v25 = vpop.f32.mrb[51].mxu0 }
 0x21d   : > { %v1934_v26 = vadd.f32 %v1933_v4, %v1932_v49  ;;  %v2012_v27 = vadd.f32 %v2011_v5, %v2010_v50  ;;  %v1593_v28 = vmax.f32 %v1258_v6, 0.0  ;;  %v1599_v29 = vmax.f32 %v1477_v20, 0.0 }
 0x21e   : > { %v1922_v30 = vrot.slane %v1921_v10, 2  ;;  %v2000_v31 = vrot.slane %v1999_v11, 2  ;;  %v1260_v32 = vadd.f32 %v1259_v13, %v3110_v60  ;;  %v1479_v33 = vadd.f32 %v1478_v9, %v3115_v63 }
 0x21f   : > { %v1935_v42 = vrot.slane %v1934_v26, 2  ;;  %v2013_v34 = vrot.slane %v2012_v27, 2  ;;  %v1262_v15 = vadd.f32 %v1261_v23, %v3122_v24  ;;  %v1481_v37 = vadd.f32 %v1480_v25, %v3127_v2 }
 0x220   : > { %v1923_v38 = vadd.f32 %v1922_v30, %v1921_v10  ;;  %v2001_v3 = vadd.f32 %v2000_v31, %v1999_v11  ;;  %v1608_v39 = vmax.f32 %v1260_v32, 0.0  ;;  %v1614_v40 = vmax.f32 %v1479_v33, 0.0 }
 0x221   : > { %v1936_v56 = vadd.f32 %v1935_v42, %v1934_v26  ;;  %v2014_v41 = vadd.f32 %v2013_v34, %v2012_v27  ;;  %v1609_v43 = vmax.f32 %v1262_v15, 0.0  ;;  %v1615_v44 = vmax.f32 %v1481_v37, 0.0  ;;  %v1265_v45 = vpop.f32.mrb[36].mxu1  ;;  %v1484_v46 = vpop.f32.mrb[52].mxu0 }
 0x222   : > { %v1924_v47 = vrot.slane %v1923_v38, 1  ;;  %v2002_v48 = vrot.slane %v2001_v3, 1  ;;  %v1965_v0 = vadd.f32 %v1608_v39, %v1592_v18  ;;  %v2043_v49 = vadd.f32 %v1614_v40, %v1598_v19  ;;  %v1267_v50 = vpop.f32.mrb[37].mxu1  ;;  %v1486_v8 = vpop.f32.mrb[53].mxu0 }
 0x223   : > { %v1937_v53 = vrot.slane %v1936_v56, 1  ;;  %v2015_v21 = vrot.slane %v2014_v41, 1  ;;  %v1978_v54 = vadd.f32 %v1609_v43, %v1593_v28  ;;  %v2056_v55 = vadd.f32 %v1615_v44, %v1599_v29  ;;  %v1269_v58 = vpop.f32.mrb[38].mxu1  ;;  %v1488_v59 = vpop.f32.mrb[54].mxu0 }
 0x224   : > { %v1925_v1 = vadd.f32 %v1924_v47, %v1923_v38  ;;  %v3148_v4 = vadd.f32 %v2002_v48, %v2001_v3  ;;  %v1266_v5 = vadd.f32 %v1265_v45, %v3110_v60  ;;  %v1485_v6 = vadd.f32 %v1484_v46, %v3115_v63  ;;  %v1271_v20 = vpop.f32.mrb[39].mxu1  ;;  %v1490_v13 = vpop.f32.mrb[55].mxu0 }
 0x225   : > { %v1938_v9 = vadd.f32 %v1937_v53, %v1936_v56  ;;  %v3152_v10 = vadd.f32 %v2015_v21, %v2014_v41  ;;  %v1268_v11 = vadd.f32 %v1267_v50, %v3122_v24  ;;  %v1487_v18 = vadd.f32 %v1486_v8, %v3127_v2 }
 0x226   : > { %v1624_v19 = vmax.f32 %v1266_v5, 0.0  ;;  %v1630_v23 = vmax.f32 %v1485_v6, 0.0  ;;  %v1270_v25 = vadd.f32 %v1269_v58, %v3110_v60  ;;  %v1489_v26 = vadd.f32 %v1488_v59, %v3115_v63 }
 0x227   : > { %v2112_v27 = vcombine.low %v1925_v1, %v1938_v9  ;;  %v2160_v28 = vcombine.low %v3148_v4, %v3152_v10  ;;  %v1625_v29 = vmax.f32 %v1268_v11, 0.0  ;;  %v1631_v30 = vmax.f32 %v1487_v18, 0.0 }
 0x228   : > { %v1966_v31 = vadd.f32 %v1965_v0, %v1624_v19  ;;  %v2044_v32 = vadd.f32 %v2043_v49, %v1630_v23  ;;  %v1640_v33 = vmax.f32 %v1270_v25, 0.0  ;;  %v1646_v42 = vmax.f32 %v1489_v26, 0.0 }
 0x229   : > { %v3164_v34 = vrot.slane %v2111_v61, %v3138_v7  ;;  %v3167_v15 = vrot.slane %v2112_v27, %v3138_v7  ;;  %v1979_v37 = vadd.f32 %v1978_v54, %v1625_v29  ;;  %v2057_v38 = vadd.f32 %v2056_v55, %v1631_v30  ;;  %v1275_v3 = vpop.f32.mrb[40].mxu1  ;;  %v1494_v39 = vpop.f32.mrb[56].mxu0 }
 0x22a   : > { %v1967_v40 = vadd.f32 %v1966_v31, %v1640_v33  ;;  %v2045_v56 = vadd.f32 %v2044_v32, %v1646_v42  ;;  %v1272_v41 = vadd.f32 %v1271_v20, %v3122_v24  ;;  %v1491_v43 = vadd.f32 %v1490_v13, %v3127_v2  ;;  %v1277_v44 = vpop.f32.mrb[41].mxu1  ;;  %v1496_v45 = vpop.f32.mrb[57].mxu0 }
 0x22b   : > { %v2143_v16 = vcombine.low %v3164_v34, %v3167_v15  ;;  %v1276_v51 = vadd.f32 %v1275_v3, %v3110_v60  ;;  %v1495_v61 = vadd.f32 %v1494_v39, %v3115_v63  ;;  %v1278_v46 = vadd.f32 %v1277_v44, %v3122_v24  ;;  %v1279_v47 = vpop.f32.mrb[42].mxu1  ;;  %v1498_v48 = vpop.f32.mrb[58].mxu0 }
 0x22c   : > { %v1641_v0 = vmax.f32 %v1272_v41, 0.0  ;;  %v1647_v49 = vmax.f32 %v1491_v43, 0.0  ;;  %v1497_v50 = vadd.f32 %v1496_v45, %v3127_v2  ;;  %v1280_v8 = vadd.f32 %v1279_v47, %v3110_v60  ;;  %v1281_v53 = vpop.f32.mrb[43].mxu1  ;;  %v1500_v21 = vpop.f32.mrb[59].mxu0 }
 0x22d   : > { %v1656_v54 = vmax.f32 %v1276_v51, 0.0  ;;  %v1662_v55 = vmax.f32 %v1495_v61, 0.0  ;;  %v1657_v58 = vmax.f32 %v1278_v46, 0.0  ;;  %v3181_v59 = vrot.slane %v3036_v57, %v599_v35 }
 0x22e   : > { %v1980_v1 = vadd.f32 %v1979_v37, %v1641_v0  ;;  %v2058_v5 = vadd.f32 %v2057_v38, %v1647_v49  ;;  %v1663_v6 = vmax.f32 %v1497_v50, 0.0  ;;  %v1672_v20 = vmax.f32 %v1280_v8, 0.0 }
 0x22f   : > { %v1968_v13 = vadd.f32 %v1967_v40, %v1656_v54  ;;  %v2046_v9 = vadd.f32 %v2045_v56, %v1662_v55  ;;  %v1499_v11 = vadd.f32 %v1498_v48, %v3115_v63  ;;  %v1282_v18 = vadd.f32 %v1281_v53, %v3122_v24 }
 0x230   : > { %v1981_v19 = vadd.f32 %v1980_v1, %v1657_v58  ;;  %v2059_v23 = vadd.f32 %v2058_v5, %v1663_v6  ;;  %v1501_v25 = vadd.f32 %v1500_v21, %v3127_v2  ;;  %v3189_v26 = vrot.slane %v3036_v57, %v615_v14 }
 0x231   : > { %v1969_v35 = vadd.f32 %v1968_v13, %v1672_v20  ;;  %v1678_v27 = vmax.f32 %v1499_v11, 0.0  ;;  %v1673_v29 = vmax.f32 %v1282_v18, 0.0  ;;  %v1285_v30 = vpop.f32.mrb[44].mxu1  ;;  %v1504_v31 = vpop.f32.mrb[60].mxu0  ;;  %v3194_v32 = vrot.slane %v3036_v57, %v603_v36 }
 0x232   : > { %v1679_v33 = vmax.f32 %v1501_v25, 0.0  ;;  %v1286_v42 = vadd.f32 %v1285_v30, %v3110_v60  ;;  %v1505_v37 = vadd.f32 %v1504_v31, %v3115_v63  ;;  %v1287_v38 = vpop.f32.mrb[45].mxu1  ;;  %v1506_v3 = vpop.f32.mrb[61].mxu0  ;;  %v3201_v14 = vrot.slane %v3036_v57, %v619_v22 }
 0x233   : > { %v2047_v39 = vadd.f32 %v2046_v9, %v1678_v27  ;;  %v1982_v40 = vadd.f32 %v1981_v19, %v1673_v29  ;;  %v1288_v56 = vadd.f32 %v1287_v38, %v3122_v24  ;;  %v1507_v41 = vadd.f32 %v1506_v3, %v3127_v2  ;;  %v1289_v36 = vpop.f32.mrb[46].mxu1  ;;  %v1508_v43 = vpop.f32.mrb[62].mxu0 }
 0x234   : > { %v2060_v44 = vadd.f32 %v2059_v23, %v1679_v33  ;;  %v1688_v45 = vmax.f32 %v1286_v42, 0.0  ;;  %v1694_v51 = vmax.f32 %v1505_v37, 0.0  ;;  %v1290_v61 = vadd.f32 %v1289_v36, %v3110_v60  ;;  %v1291_v46 = vpop.f32.mrb[47].mxu1  ;;  %v1510_v47 = vpop.f32.mrb[63].mxu0 }
 0x235   : > { %v1689_v48 = vmax.f32 %v1288_v56, 0.0  ;;  %v1695_v12 = vmax.f32 %v1507_v41, 0.0  ;;  %v1509_v57 = vadd.f32 %v1508_v43, %v3115_v63  ;;  %v1292_v22 = vadd.f32 %v1291_v46, %v3122_v24 }
 0x236   : > { %v1970_v0 = vadd.f32 %v1969_v35, %v1688_v45  ;;  %v2048_v49 = vadd.f32 %v2047_v39, %v1694_v51  ;;  %v1704_v50 = vmax.f32 %v1290_v61, 0.0  ;;  %v1511_v8 = vadd.f32 %v1510_v47, %v3127_v2 }
 0x237   : > { %v1983_v53 = vadd.f32 %v1982_v40, %v1689_v48  ;;  %v2061_v21 = vadd.f32 %v2060_v44, %v1695_v12  ;;  %v1710_v54 = vmax.f32 %v1509_v57, 0.0  ;;  %v1705_v55 = vmax.f32 %v1292_v22, 0.0 }
 0x238   : > { %v1971_v58 = vadd.f32 %v1970_v0, %v1704_v50  ;;  %v1711_v1 = vmax.f32 %v1511_v8, 0.0  ;;  %v2151_v17 = vrot.slane %v2143_v16, %v3138_v7 }
 0x239   : > { %v2049_v60 = vadd.f32 %v2048_v49, %v1710_v54  ;;  %v1984_v5 = vadd.f32 %v1983_v53, %v1705_v55  ;;  %v1401_v6 = vpop.f32.mrb[48].mxu1  ;;  %v1547_v20 = vpop.f32.mrb[64].mxu0 }
 0x23a   : > { %v1972_v13 = vrot.slane %v1971_v58, 4  ;;  %v2062_v9 = vadd.f32 %v2061_v21, %v1711_v1  ;;  %v1402_v63 = vadd.f32 %v1401_v6, %v3181_v59  ;;  %v1548_v24 = vadd.f32 %v1547_v20, %v3189_v26  ;;  %v1403_v11 = vpop.f32.mrb[49].mxu1  ;;  %v1549_v18 = vpop.f32.mrb[65].mxu0 }
 0x23b   : > { %v2050_v19 = vrot.slane %v2049_v60, 4  ;;  %v1985_v2 = vrot.slane %v1984_v5, 4  ;;  %v1404_v23 = vadd.f32 %v1403_v11, %v3194_v32  ;;  %v1550_v25 = vadd.f32 %v1549_v18, %v3201_v14  ;;  %v1405_v35 = vpop.f32.mrb[50].mxu1  ;;  %v1551_v27 = vpop.f32.mrb[66].mxu0 }
 0x23c   : > { %v1973_v29 = vadd.f32 %v1972_v13, %v1971_v58  ;;  %v2063_v30 = vrot.slane %v2062_v9, 4  ;;  %v1596_v31 = vmax.f32 %v1402_v63, 0.0  ;;  %v1600_v33 = vmax.f32 %v1548_v24, 0.0  ;;  %v1407_v42 = vpop.f32.mrb[51].mxu1  ;;  %v1553_v37 = vpop.f32.mrb[67].mxu0 }
 0x23d   : > { %v2051_v38 = vadd.f32 %v2050_v19, %v2049_v60  ;;  %v1986_v3 = vadd.f32 %v1985_v2, %v1984_v5  ;;  %v1597_v39 = vmax.f32 %v1404_v23, 0.0  ;;  %v1601_v40 = vmax.f32 %v1550_v25, 0.0 }
 0x23e   : > { %v1974_v56 = vrot.slane %v1973_v29, 2  ;;  %v2064_v41 = vadd.f32 %v2063_v30, %v2062_v9  ;;  %v1406_v36 = vadd.f32 %v1405_v35, %v3181_v59  ;;  %v1552_v43 = vadd.f32 %v1551_v27, %v3189_v26 }
 0x23f   : > { %v2052_v44 = vrot.slane %v2051_v38, 2  ;;  %v1987_v45 = vrot.slane %v1986_v3, 2  ;;  %v1408_v51 = vadd.f32 %v1407_v42, %v3194_v32  ;;  %v1554_v61 = vadd.f32 %v1553_v37, %v3201_v14 }
 0x240   : > { %v1975_v46 = vadd.f32 %v1974_v56, %v1973_v29  ;;  %v2065_v47 = vrot.slane %v2064_v41, 2  ;;  %v1612_v48 = vmax.f32 %v1406_v36, 0.0  ;;  %v1616_v12 = vmax.f32 %v1552_v43, 0.0 }
 0x241   : > { %v2053_v57 = vadd.f32 %v2052_v44, %v2051_v38  ;;  %v1988_v22 = vadd.f32 %v1987_v45, %v1986_v3  ;;  %v1613_v0 = vmax.f32 %v1408_v51, 0.0  ;;  %v1617_v49 = vmax.f32 %v1554_v61, 0.0  ;;  %v1411_v50 = vpop.f32.mrb[52].mxu1 }
 0x242   : > { %v1976_v8 = vrot.slane %v1975_v46, 1  ;;  %v2066_v53 = vadd.f32 %v2065_v47, %v2064_v41  ;;  %v2017_v21 = vadd.f32 %v1612_v48, %v1596_v31  ;;  %v3217_v54 = vadd.f32 %v1616_v12, %v1600_v33  ;;  %v1413_v55 = vpop.f32.mrb[53].mxu1 }
 0x243   : > { %v2054_v58 = vrot.slane %v2053_v57, 1  ;;  %v1989_v1 = vrot.slane %v1988_v22, 1  ;;  %v2030_v60 = vadd.f32 %v1613_v0, %v1597_v39  ;;  %v3219_v5 = vadd.f32 %v1617_v49, %v1601_v40  ;;  %v1415_v6 = vpop.f32.mrb[54].mxu1 }
 0x244   : > { %v1977_v20 = vadd.f32 %v1976_v8, %v1975_v46  ;;  %v2067_v13 = vrot.slane %v2066_v53, 1  ;;  %v1412_v9 = vadd.f32 %v1411_v50, %v3181_v59  ;;  %v1414_v63 = vadd.f32 %v1413_v55, %v3194_v32  ;;  %v1417_v24 = vpop.f32.mrb[55].mxu1 }
 0x245   : > { %v3223_v11 = vadd.f32 %v2054_v58, %v2053_v57  ;;  %v1990_v18 = vadd.f32 %v1989_v1, %v1988_v22  ;;  %v1416_v19 = vadd.f32 %v1415_v6, %v3181_v59  ;;  %v1418_v2 = vadd.f32 %v1417_v24, %v3194_v32 }
 0x246   : > { %v3227_v23 = vadd.f32 %v2067_v13, %v2066_v53  ;;  %v1628_v25 = vmax.f32 %v1412_v9, 0.0  ;;  %v1629_v35 = vmax.f32 %v1414_v63, 0.0  ;;  %v2135_v37 = vrot.slane %v2113_v62, %v3138_v7 }
 0x247   : > { %v2114_v27 = vcombine.low %v1977_v20, %v1990_v18  ;;  %v1644_v29 = vmax.f32 %v1416_v19, 0.0  ;;  %v1645_v30 = vmax.f32 %v1418_v2, 0.0 }
 0x248   : > { %v2162_v31 = vcombine.low %v3223_v11, %v3227_v23  ;;  %v2018_v33 = vadd.f32 %v2017_v21, %v1628_v25  ;;  %v2031_v42 = vadd.f32 %v2030_v60, %v1629_v35 }
 0x249   : > { %v2142_v38 = vrot.slane %v2114_v27, %v3138_v7  ;;  %v1421_v3 = vpop.f32.mrb[56].mxu1 }
 0x24a   : > { %v2019_v39 = vadd.f32 %v2018_v33, %v1644_v29  ;;  %v2032_v40 = vadd.f32 %v2031_v42, %v1645_v30  ;;  %v1422_v56 = vadd.f32 %v1421_v3, %v3181_v59  ;;  %v1423_v41 = vpop.f32.mrb[57].mxu1 }
 0x24b   : > { %v2144_v36 = vcombine.low %v2135_v37, %v2142_v38  ;;  %v1424_v43 = vadd.f32 %v1423_v41, %v3194_v32  ;;  %v1425_v44 = vpop.f32.mrb[58].mxu1 }
 0x24c   : > { %v1660_v45 = vmax.f32 %v1422_v56, 0.0  ;;  %v1426_v51 = vadd.f32 %v1425_v44, %v3181_v59  ;;  %v1427_v61 = vpop.f32.mrb[59].mxu1 }
 0x24d   : > { %v2158_v52 = vrot.slane %v2144_v36, %v3138_v7  ;;  %v1661_v62 = vmax.f32 %v1424_v43, 0.0  ;;  %v1428_v46 = vadd.f32 %v1427_v61, %v3194_v32 }
 0x24e   : > { %v2020_v47 = vadd.f32 %v2019_v39, %v1660_v45  ;;  %v1676_v48 = vmax.f32 %v1426_v51, 0.0 }
 0x24f   : > { %v2159_v12 = vcombine.low %v2151_v17, %v2158_v52  ;;  %v2033_v57 = vadd.f32 %v2032_v40, %v1661_v62  ;;  %v1677_v22 = vmax.f32 %v1428_v46, 0.0 }
 0x250   : > { %v2021_v0 = vadd.f32 %v2020_v47, %v1676_v48 }
 0x251   : > { %v2034_v49 = vadd.f32 %v2033_v57, %v1677_v22  ;;  %v1431_v50 = vpop.f32.mrb[60].mxu1  ;;  %v2220_v16 = vmul.f32 0.015625, %v2159_v12 }
 0x252   : > { %v1432_v34 = vadd.f32 %v1431_v50, %v3181_v59  ;;  %v1433_v15 = vpop.f32.mrb[61].mxu1 }
 0x253   : > { %v1434_v8 = vadd.f32 %v1433_v15, %v3194_v32  ;;  %v1435_v53 = vpop.f32.mrb[62].mxu1  ;;  %2222 = vst [vmem:[%s3249_s28] sm:$0xff] %v2220_v16 }
 0x254   : > { %v1692_v21 = vmax.f32 %v1432_v34, 0.0  ;;  %v1436_v55 = vadd.f32 %v1435_v53, %v3181_v59  ;;  %v1437_v58 = vpop.f32.mrb[63].mxu1 }
 0x255   : > { %v1693_v1 = vmax.f32 %v1434_v8, 0.0  ;;  %v1438_v60 = vadd.f32 %v1437_v58, %v3194_v32 }
 0x256   : > { %v2022_v6 = vadd.f32 %v2021_v0, %v1692_v21  ;;  %v1708_v20 = vmax.f32 %v1436_v55, 0.0  ;;  %v2170_v21 = vrot.slane %v2160_v28, %v3138_v7 }
 0x257   : > { %v2035_v13 = vadd.f32 %v2034_v49, %v1693_v1  ;;  %v1709_v9 = vmax.f32 %v1438_v60, 0.0 }
 0x258   : > { %v2023_v63 = vadd.f32 %v2022_v6, %v1708_v20 }
 0x259   : > { %v2036_v24 = vadd.f32 %v2035_v13, %v1709_v9  ;;  %v1557_v18 = vpop.f32.mrb[64].mxu1 }
 0x25a   : > { %v2024_v19 = vrot.slane %v2023_v63, 4  ;;  %v1558_v2 = vadd.f32 %v1557_v18, %v3189_v26  ;;  %v1559_v25 = vpop.f32.mrb[65].mxu1 }
 0x25b   : > { %v2037_v35 = vrot.slane %v2036_v24, 4  ;;  %v1560_v27 = vadd.f32 %v1559_v25, %v3201_v14  ;;  %v1561_v59 = vpop.f32.mrb[66].mxu1 }
 0x25c   : > { %v2025_v29 = vadd.f32 %v2024_v19, %v2023_v63  ;;  %v1632_v30 = vmax.f32 %v1558_v2, 0.0  ;;  %v1562_v33 = vadd.f32 %v1561_v59, %v3189_v26  ;;  %v1563_v32 = vpop.f32.mrb[67].mxu1 }
 0x25d   : > { %v2038_v42 = vadd.f32 %v2037_v35, %v2036_v24  ;;  %v1633_v37 = vmax.f32 %v1560_v27, 0.0  ;;  %v1564_v38 = vadd.f32 %v1563_v32, %v3201_v14 }
 0x25e   : > { %v2026_v3 = vrot.slane %v2025_v29, 2  ;;  %v2070_v39 = vadd.f32 %v3217_v54, %v1632_v30  ;;  %v1648_v40 = vmax.f32 %v1562_v33, 0.0 }
 0x25f   : > { %v2039_v56 = vrot.slane %v2038_v42, 2  ;;  %v2083_v41 = vadd.f32 %v3219_v5, %v1633_v37  ;;  %v1649_v36 = vmax.f32 %v1564_v38, 0.0 }
 0x260   : > { %v2027_v43 = vadd.f32 %v2026_v3, %v2025_v29  ;;  %v2071_v44 = vadd.f32 %v2070_v39, %v1648_v40 }
 0x261   : > { %v2040_v45 = vadd.f32 %v2039_v56, %v2038_v42  ;;  %v2084_v51 = vadd.f32 %v2083_v41, %v1649_v36  ;;  %v1567_v61 = vpop.f32.mrb[68].mxu1  ;;  %v2184_v56 = vrot.slane %v2162_v31, %v3138_v7 }
 0x262   : > { %v2028_v17 = vrot.slane %v2027_v43, 1  ;;  %v1568_v52 = vadd.f32 %v1567_v61, %v3189_v26  ;;  %v1569_v62 = vpop.f32.mrb[69].mxu1 }
 0x263   : > { %v2041_v46 = vrot.slane %v2040_v45, 1  ;;  %v1570_v47 = vadd.f32 %v1569_v62, %v3201_v14  ;;  %v1571_v48 = vpop.f32.mrb[70].mxu1 }
 0x264   : > { %v2029_v12 = vadd.f32 %v2028_v17, %v2027_v43  ;;  %v1664_v54 = vmax.f32 %v1568_v52, 0.0  ;;  %v1572_v57 = vadd.f32 %v1571_v48, %v3189_v26  ;;  %v1573_v22 = vpop.f32.mrb[71].mxu1 }
 0x265   : > { %v2042_v5 = vadd.f32 %v2041_v46, %v2040_v45  ;;  %v1665_v0 = vmax.f32 %v1570_v47, 0.0  ;;  %v1574_v49 = vadd.f32 %v1573_v22, %v3201_v14 }
 0x266   : > { %v2072_v50 = vadd.f32 %v2071_v44, %v1664_v54  ;;  %v1680_v34 = vmax.f32 %v1572_v57, 0.0 }
 0x267   : > { %v2161_v15 = vcombine.low %v2029_v12, %v2042_v5  ;;  %v2085_v16 = vadd.f32 %v2084_v51, %v1665_v0  ;;  %v1681_v8 = vmax.f32 %v1574_v49, 0.0 }
 0x268   : > { %v2073_v53 = vadd.f32 %v2072_v50, %v1680_v34 }
 0x269   : > { %v2177_v55 = vrot.slane %v2161_v15, %v3138_v7  ;;  %v2086_v58 = vadd.f32 %v2085_v16, %v1681_v8  ;;  %v1577_v1 = vpop.f32.mrb[72].mxu1 }
 0x26a   : > { %v1578_v60 = vadd.f32 %v1577_v1, %v3189_v26  ;;  %v1579_v6 = vpop.f32.mrb[73].mxu1 }
 0x26b   : > { %v2192_v20 = vcombine.low %v2170_v21, %v2177_v55  ;;  %v1580_v13 = vadd.f32 %v1579_v6, %v3201_v14  ;;  %v1581_v9 = vpop.f32.mrb[74].mxu1 }
 0x26c   : > { %v1696_v63 = vmax.f32 %v1578_v60, 0.0  ;;  %v1582_v24 = vadd.f32 %v1581_v9, %v3189_v26  ;;  %v1583_v18 = vpop.f32.mrb[75].mxu1 }
 0x26d   : > { %v1697_v19 = vmax.f32 %v1580_v13, 0.0  ;;  %v1584_v2 = vadd.f32 %v1583_v18, %v3201_v14  ;;  %v2200_v43 = vrot.slane %v2192_v20, %v3138_v7 }
 0x26e   : > { %v2074_v4 = vadd.f32 %v2073_v53, %v1696_v63  ;;  %v1712_v10 = vmax.f32 %v1582_v24, 0.0 }
 0x26f   : > { %v2087_v28 = vadd.f32 %v2086_v58, %v1697_v19  ;;  %v1713_v25 = vmax.f32 %v1584_v2, 0.0 }
 0x270   : > { %v2075_v35 = vadd.f32 %v2074_v4, %v1712_v10 }
 0x271   : > { %v2088_v27 = vadd.f32 %v2087_v28, %v1713_v25 }
 0x272   : > { %v2076_v59 = vrot.slane %v2075_v35, 4 }
 0x273   : > { %v2089_v29 = vrot.slane %v2088_v27, 4 }
 0x274   : > { %v2077_v30 = vadd.f32 %v2076_v59, %v2075_v35 }
 0x275   : > { %v2090_v33 = vadd.f32 %v2089_v29, %v2088_v27 }
 0x276   : > { %v2078_v32 = vrot.slane %v2077_v30, 2 }
 0x277   : > { %v2091_v42 = vrot.slane %v2090_v33, 2 }
 0x278   : > { %v2079_v37 = vadd.f32 %v2078_v32, %v2077_v30 }
 0x279   : > { %v2092_v38 = vadd.f32 %v2091_v42, %v2090_v33 }
 0x27a   : > { %v2080_v26 = vrot.slane %v2079_v37, 1 }
 0x27b   : > { %v2093_v3 = vrot.slane %v2092_v38, 1 }
 0x27c   : > { %v2081_v39 = vadd.f32 %v2080_v26, %v2079_v37 }
 0x27d   : > { %v2094_v40 = vadd.f32 %v2093_v3, %v2092_v38 }
 0x27f   : > { %v2163_v14 = vcombine.low %v2081_v39, %v2094_v40 }
 0x281   : > { %v2191_v41 = vrot.slane %v2163_v14, %v3138_v7 }
 0x283   : > { %v2193_v36 = vcombine.low %v2184_v56, %v2191_v41 }
 0x285   : > { %v2207_v44 = vrot.slane %v2193_v36, %v3138_v7 }
 0x287   : > { %v2208_v45 = vcombine.low %v2200_v43, %v2207_v44 }
 0x289   : > { %v2221_v51 = vmul.f32 0.015625, %v2208_v45 }
 0x28b   : > { %2223 = vst [vmem:[%s3249_s28 + $0x8] sm:$0xff] %v2221_v51 }
 0x28c PF: > { %s15_s20 = sadd.s32 1, %s2551_s20   ;;  %s3298_s18 = smov %s2547_s19 }
 0x28d   : > { %p12_p5 = scmp.ge.s32.totalorder %s15_s20, 4   ;;  %s3299_s19 = smov %s3301_s21 }
 0x28f   :  { %14 = sbr.rel (!%p12_p5) target bundleno = 2 (0x2), region = 78 }

</bundles_post_ra>
